<compile_context>
chip_gen: v6e
topology: v6e:2x2x1
jax: 0.10.0
libtpu: 0.0.40
codegen_flags: <defaults>
</compile_context>

<pallas_src>
import jax
import jax.numpy as jnp
from jax.experimental import pallas as pl
from jax.experimental.pallas import tpu as pltpu

BN_EPS = 1e-5
LANE = 128                       # lane width; Cout padded to a multiple of this
_VMEM_LIMIT = 32 * 1024 * 1024   # safe scoped-VMEM request on v5e/v6e/v7x


def _round_up(x, m):
    return (x + m - 1) // m * m


# ---------------------------------------------------------------------------
# Fused kernel: [optional BN+ReLU of producing stage] -> zero-pad in VMEM ->
#               im2col -> ONE (H*W, 9*Cin) @ (9*Cin, LANE) MXU matmul -> +bias
#               -> bf16 pre-BN output + per-image BN partial stats (sum, sum^2)
# ---------------------------------------------------------------------------
def _conv_body(x_ref, w_ref, b_ref, scale_ref, shift_ref, y_ref, stat_ref, pad_ref):
    h = y_ref.shape[1]
    wo = y_ref.shape[2]
    cin = x_ref.shape[3]
    lane = w_ref.shape[1]

    x = x_ref[0]                                        # (H, W, Cin)
    if scale_ref is not None:
        # Fused BatchNorm + ReLU of the PREVIOUS stage, applied to the loaded tile.
        x = jnp.maximum(x.astype(jnp.float32) * scale_ref[...] + shift_ref[...], 0.0)

    # Zero "same" border + interior written into a VMEM scratch (no HBM pad pass).
    pad_ref[...] = jnp.zeros(pad_ref.shape, pad_ref.dtype)
    pad_ref[1:h + 1, 1:wo + 1, :] = x.astype(pad_ref.dtype)
    xp = pad_ref[...]                                   # (H+2, W+2, Cin) bf16

    # im2col in VMEM: one (H*W, 9*Cin) patch -> single deep-K MXU matmul.
    cols = [xp[dy:dy + h, dx:dx + wo, :] for dy in range(3) for dx in range(3)]
    patch = jnp.concatenate(cols, axis=-1).reshape(h * wo, 9 * cin)
    y = jnp.dot(patch, w_ref[...], preferred_element_type=jnp.float32)
    y = y + b_ref[...]                                  # (H*W, LANE) f32

    y_ref[0] = y.reshape(h, wo, lane).astype(y_ref.dtype)   # bf16 lane-dense store
    stat_ref[0] = jnp.concatenate(
        [jnp.sum(y, axis=0, keepdims=True),
         jnp.sum(y * y, axis=0, keepdims=True)], axis=0)    # f32 partials


def _make_conv_kernel(apply_act):
    if apply_act:
        def kernel(x_ref, w_ref, b_ref, scale_ref, shift_ref, y_ref, stat_ref, pad_ref):
            _conv_body(x_ref, w_ref, b_ref, scale_ref, shift_ref, y_ref, stat_ref, pad_ref)
    else:
        def kernel(x_ref, w_ref, b_ref, y_ref, stat_ref, pad_ref):
            _conv_body(x_ref, w_ref, b_ref, None, None, y_ref, stat_ref, pad_ref)
    return kernel


# ---------------------------------------------------------------------------
# Pallas wrapper
# ---------------------------------------------------------------------------
def _conv3x3_stats(x_nhwc, w_flat, b_row, scale=None, shift=None):
    """x_nhwc: (N, H, W, Cin) bf16 (unpadded). w_flat: (9*Cin, LANE) bf16.
    Returns (y_pre bf16 (N,H,W,LANE), stats f32 (N,2,LANE))."""
    n, h, w, cin = x_nhwc.shape
    kflat, lane = w_flat.shape
    apply_act = scale is not None

    in_specs = [
        pl.BlockSpec((1, h, w, cin), lambda i: (i, 0, 0, 0)),
        pl.BlockSpec((kflat, lane), lambda i: (0, 0)),     # resident weights
        pl.BlockSpec((1, lane), lambda i: (0, 0)),          # conv bias
    ]
    args = [x_nhwc, w_flat, b_row]
    if apply_act:
        in_specs += [pl.BlockSpec((1, lane), lambda i: (0, 0)),   # BN scale
                     pl.BlockSpec((1, lane), lambda i: (0, 0))]   # BN shift
        args += [scale, shift]

    flops = 2 * n * h * w * kflat * lane
    bytes_accessed = int(x_nhwc.size * x_nhwc.dtype.itemsize
                         + w_flat.size * w_flat.dtype.itemsize
                         + n * h * w * lane * 2          # bf16 y_pre write
                         + n * 2 * lane * 4)             # stats write

    return pl.pallas_call(
        _make_conv_kernel(apply_act),
        grid=(n,),
        in_specs=in_specs,
        out_specs=[
            pl.BlockSpec((1, h, w, lane), lambda i: (i, 0, 0, 0)),
            pl.BlockSpec((1, 2, lane), lambda i: (i, 0, 0)),
        ],
        out_shape=[
            jax.ShapeDtypeStruct((n, h, w, lane), jnp.bfloat16),
            jax.ShapeDtypeStruct((n, 2, lane), jnp.float32),
        ],
        scratch_shapes=[pltpu.VMEM((h + 2, w + 2, cin), jnp.bfloat16)],
        compiler_params=pltpu.CompilerParams(
            dimension_semantics=("parallel",),
            vmem_limit_bytes=_VMEM_LIMIT),
        cost_estimate=pl.CostEstimate(
            flops=flops, transcendentals=0, bytes_accessed=bytes_accessed),
    )(*args)


# ---------------------------------------------------------------------------
# JAX glue
# ---------------------------------------------------------------------------
def _flatten_weight(w_hwio, cin_pad, lane):
    """(3,3,Cin,Cout) -> (9*cin_pad, lane) bf16, zero-padded on both channel axes."""
    kh, kw, cin, cout = w_hwio.shape
    wp = jnp.zeros((kh, kw, cin_pad, lane), jnp.float32)
    wp = wp.at[:, :, :cin, :cout].set(w_hwio.astype(jnp.float32))
    return wp.reshape(kh * kw * cin_pad, lane).astype(jnp.bfloat16)


def _pad_row(v, lane):
    return jnp.zeros((1, lane), jnp.float32).at[0, :v.shape[0]].set(v)


def _pad_1d(v, lane):
    return jnp.zeros((lane,), jnp.float32).at[:v.shape[0]].set(v)


def _bn_scale_shift(stats, gamma_pad, beta_pad, count):
    """Global BatchNorm(train) affine from per-image partial sums (biased var)."""
    s = jnp.sum(stats[:, 0, :], axis=0)
    ss = jnp.sum(stats[:, 1, :], axis=0)
    mean = s / count
    var = jnp.maximum(ss / count - mean * mean, 0.0)
    inv = jax.lax.rsqrt(var + BN_EPS)
    scale = gamma_pad * inv
    shift = beta_pad - mean * scale
    lane = scale.shape[0]
    return scale.reshape(1, lane), shift.reshape(1, lane)


def init_inconv_params(key, in_ch, out_ch):
    """Parameter init mirroring the module's parameter shapes (weights in HWIO)."""
    k1, k2, k3, k4 = jax.random.split(key, 4)
    bound1 = 1.0 / (in_ch * 9) ** 0.5
    bound2 = 1.0 / (out_ch * 9) ** 0.5
    return {
        "w1": jax.random.uniform(k1, (3, 3, in_ch, out_ch), jnp.float32,
                                 -bound1, bound1),
        "b1": jax.random.uniform(k2, (out_ch,), jnp.float32, -bound1, bound1),
        "g1": jnp.ones((out_ch,), jnp.float32),
        "be1": jnp.zeros((out_ch,), jnp.float32),
        "w2": jax.random.uniform(k3, (3, 3, out_ch, out_ch), jnp.float32,
                                 -bound2, bound2),
        "b2": jax.random.uniform(k4, (out_ch,), jnp.float32, -bound2, bound2),
        "g2": jnp.ones((out_ch,), jnp.float32),
        "be2": jnp.zeros((out_ch,), jnp.float32),
    }


def inconv_forward(x_nchw, params):
    """Forward pass of `inconv` (== double_conv). Input/output are NCHW."""
    n, cin, h, w = x_nchw.shape
    cout = params["w1"].shape[-1]
    lane = _round_up(cout, LANE)
    count = float(n * h * w)

    x = jnp.transpose(x_nchw, (0, 2, 3, 1)).astype(jnp.bfloat16)   # NHWC bf16

    # ---- stage 1: conv1 + bias, per-image BN1 partial stats ----
    w1 = _flatten_weight(params["w1"], cin, lane)
    y1_pre, stats1 = _conv3x3_stats(x, w1, _pad_row(params["b1"], lane))
    scale1, shift1 = _bn_scale_shift(stats1, _pad_1d(params["g1"], lane),
                                     _pad_1d(params["be1"], lane), count)

    # ---- stage 2: BN1+ReLU fused into conv2's prologue; padded-lane input ----
    w2 = _flatten_weight(params["w2"], lane, lane)   # input channels zero-padded
    y2_pre, stats2 = _conv3x3_stats(y1_pre, w2, _pad_row(params["b2"], lane),
                                    scale1, shift1)
    scale2, shift2 = _bn_scale_shift(stats2, _pad_1d(params["g2"], lane),
                                     _pad_1d(params["be2"], lane), count)

    # ---- final BN2+ReLU fused with the slice/transpose epilogue (one XLA pass) ----
    y2 = jnp.maximum(y2_pre.astype(jnp.float32) * scale2 + shift2, 0.0)
    return jnp.transpose(y2[..., :cout], (0, 3, 1, 2))             # NCHW f32


# ---------------------------------------------------------------------------
# Pure-JAX reference mirroring the kernel's precision choices
# ---------------------------------------------------------------------------
def _reference_forward(x_nchw, params):
    x = jnp.transpose(x_nchw, (0, 2, 3, 1)).astype(jnp.bfloat16)

    def stage(xin_bf16, wk, b, g, be):
        y = jax.lax.conv_general_dilated(
            xin_bf16, wk.astype(jnp.bfloat16),
            window_strides=(1, 1), padding="SAME",
            dimension_numbers=("NHWC", "HWIO", "NHWC"),
            preferred_element_type=jnp.float32) + b
        mean = jnp.mean(y, axis=(0, 1, 2))
        var = jnp.mean(jnp.square(y - mean), axis=(0, 1, 2))
        scale = g * jax.lax.rsqrt(var + BN_EPS)
        shift = be - mean * scale
        return y.astype(jnp.bfloat16), scale, shift    # bf16 = stored y_pre

    y1_bf, s1, t1 = stage(x, params["w1"], params["b1"], params["g1"], params["be1"])
    a1 = jnp.maximum(y1_bf.astype(jnp.float32) * s1 + t1, 0.0).astype(jnp.bfloat16)
    y2_bf, s2, t2 = stage(a1, params["w2"], params["b2"], params["g2"], params["be2"])
    out = jnp.maximum(y2_bf.astype(jnp.float32) * s2 + t2, 0.0)
    return jnp.transpose(out, (0, 3, 1, 2))


if __name__ == "__main__":
    key = jax.random.PRNGKey(0)
    kx, kp = jax.random.split(key)

    N, IN_CH, OUT_CH, H, W = 2, 4, 8, 16, 16
    x = jax.random.normal(kx, (N, IN_CH, H, W), dtype=jnp.float32)
    params = init_inconv_params(kp, IN_CH, OUT_CH)

    fwd = jax.jit(inconv_forward)
    out = jax.block_until_ready(fwd(x, params))

    assert out.shape == (N, OUT_CH, H, W)
    assert out.dtype == jnp.float32
    assert bool(jnp.all(jnp.isfinite(out)))
    assert bool(jnp.all(out >= 0.0))          # ReLU output is non-negative

    ref = jax.block_until_ready(_reference_forward(x, params))
    max_err = float(jnp.max(jnp.abs(out - ref)))
    # Tolerance covers bf16 storage of the pre-BN intermediates + accumulation-order
    # differences; a real bug would produce O(1) errors.
    assert max_err < 4e-2, f"mismatch vs reference: {max_err}"

    print("KERNEL_OK")
</pallas_src>

<mosaic_0001>
module attributes {stable_mosaic.version = 11 : i64} {
  func.func @kernel(%arg0: i32, %arg1: memref<1x16x16x4xbf16, #tpu.memory_space<vmem>>, %arg2: memref<36x128xbf16, #tpu.memory_space<vmem>>, %arg3: memref<1x128xf32, #tpu.memory_space<vmem>>, %arg4: memref<1x16x16x128xbf16, #tpu.memory_space<vmem>>, %arg5: memref<1x2x128xf32, #tpu.memory_space<vmem>>, %arg6: memref<18x18x4xbf16, #tpu.memory_space<vmem>>) attributes {dimension_semantics = [#tpu.dimension_semantics<parallel>], iteration_bounds = array<i64: 2>, scalar_prefetch = 0 : i64, scratch_operands = 1 : i64, tpu.core_type = #tpu.core_type<tc>, window_params = [{transform_indices = @transform_0, window_bounds = array<i64: 1, 16, 16, 4>}, {pipeline_mode = #tpu.pipeline_mode<synchronous>, transform_indices = @transform_1, window_bounds = array<i64: 36, 128>}, {pipeline_mode = #tpu.pipeline_mode<synchronous>, transform_indices = @transform_2, window_bounds = array<i64: 1, 128>}, {transform_indices = @transform_3, window_bounds = array<i64: 1, 16, 16, 128>}, {transform_indices = @transform_4, window_bounds = array<i64: 1, 2, 128>}]} {
    %c0 = arith.constant 0 : index
    %c0_0 = arith.constant 0 : index
    %c0_1 = arith.constant 0 : index
    %c0_2 = arith.constant 0 : index
    %0 = vector.load %arg1[%c0, %c0_0, %c0_1, %c0_2] : memref<1x16x16x4xbf16, #tpu.memory_space<vmem>>, vector<1x16x16x4xbf16>
    %1 = vector.shape_cast %0 : vector<1x16x16x4xbf16> to vector<16x16x4xbf16>
    %cst = arith.constant 0.000000e+00 : bf16
    %2 = vector.broadcast %cst : bf16 to vector<18x18x4xbf16>
    %c0_3 = arith.constant 0 : index
    %c0_4 = arith.constant 0 : index
    %c0_5 = arith.constant 0 : index
    %3 = vector.load %arg6[%c0_3, %c0_4, %c0_5] : memref<18x18x4xbf16, #tpu.memory_space<vmem>>, vector<18x18x4xbf16>
    tpu.vector_store %arg6[%c0_3, %c0_4, %c0_5], %2 {strides = array<i32>} : memref<18x18x4xbf16, #tpu.memory_space<vmem>>, vector<18x18x4xbf16>,
    %c1 = arith.constant 1 : index
    %c1_6 = arith.constant 1 : index
    %c0_7 = arith.constant 0 : index
    %4 = vector.load %arg6[%c1, %c1_6, %c0_7] : memref<18x18x4xbf16, #tpu.memory_space<vmem>>, vector<16x16x4xbf16>
    tpu.vector_store %arg6[%c1, %c1_6, %c0_7], %1 {strides = array<i32>} : memref<18x18x4xbf16, #tpu.memory_space<vmem>>, vector<16x16x4xbf16>,
    %c0_8 = arith.constant 0 : index
    %c0_9 = arith.constant 0 : index
    %c0_10 = arith.constant 0 : index
    %5 = vector.load %arg6[%c0_8, %c0_9, %c0_10] : memref<18x18x4xbf16, #tpu.memory_space<vmem>>, vector<18x18x4xbf16>
    %6 = vector.extract_strided_slice %5 {offsets = [0, 0, 0], sizes = [16, 16, 4], strides = [1, 1, 1]} : vector<18x18x4xbf16> to vector<16x16x4xbf16>
    %7 = vector.extract_strided_slice %5 {offsets = [0, 1, 0], sizes = [16, 16, 4], strides = [1, 1, 1]} : vector<18x18x4xbf16> to vector<16x16x4xbf16>
    %8 = vector.extract_strided_slice %5 {offsets = [0, 2, 0], sizes = [16, 16, 4], strides = [1, 1, 1]} : vector<18x18x4xbf16> to vector<16x16x4xbf16>
    %9 = vector.extract_strided_slice %5 {offsets = [1, 0, 0], sizes = [16, 16, 4], strides = [1, 1, 1]} : vector<18x18x4xbf16> to vector<16x16x4xbf16>
    %10 = vector.extract_strided_slice %5 {offsets = [1, 1, 0], sizes = [16, 16, 4], strides = [1, 1, 1]} : vector<18x18x4xbf16> to vector<16x16x4xbf16>
    %11 = vector.extract_strided_slice %5 {offsets = [1, 2, 0], sizes = [16, 16, 4], strides = [1, 1, 1]} : vector<18x18x4xbf16> to vector<16x16x4xbf16>
    %12 = vector.extract_strided_slice %5 {offsets = [2, 0, 0], sizes = [16, 16, 4], strides = [1, 1, 1]} : vector<18x18x4xbf16> to vector<16x16x4xbf16>
    %13 = vector.extract_strided_slice %5 {offsets = [2, 1, 0], sizes = [16, 16, 4], strides = [1, 1, 1]} : vector<18x18x4xbf16> to vector<16x16x4xbf16>
    %14 = vector.extract_strided_slice %5 {offsets = [2, 2, 0], sizes = [16, 16, 4], strides = [1, 1, 1]} : vector<18x18x4xbf16> to vector<16x16x4xbf16>
    %15 = tpu.concatenate %6, %7, %8, %9, %10, %11, %12, %13, %14 in 2 : vector<16x16x4xbf16>, vector<16x16x4xbf16>, vector<16x16x4xbf16>, vector<16x16x4xbf16>, vector<16x16x4xbf16>, vector<16x16x4xbf16>, vector<16x16x4xbf16>, vector<16x16x4xbf16>, vector<16x16x4xbf16> -> vector<16x16x36xbf16>
    %16 = vector.shape_cast %15 : vector<16x16x36xbf16> to vector<256x36xbf16>
    %c0_11 = arith.constant 0 : index
    %c0_12 = arith.constant 0 : index
    %17 = vector.load %arg2[%c0_11, %c0_12] : memref<36x128xbf16, #tpu.memory_space<vmem>>, vector<36x128xbf16>
    %cst_13 = arith.constant dense<0.000000e+00> : vector<256x128xf32>
    %18 = tpu.matmul %16, %17, %cst_13 {dimension_numbers = #tpu.dot_dimension_numbers<[1], [0], [0], [1], [0, 0, 1, 1], [], []>} : vector<256x36xbf16>, vector<36x128xbf16>, vector<256x128xf32> -> vector<256x128xf32>
    %c0_14 = arith.constant 0 : index
    %c0_15 = arith.constant 0 : index
    %19 = vector.load %arg3[%c0_14, %c0_15] : memref<1x128xf32, #tpu.memory_space<vmem>>, vector<1x128xf32>
    %20 = vector.broadcast %19 : vector<1x128xf32> to vector<256x128xf32>
    %21 = arith.addf %18, %20 : vector<256x128xf32>
    %22 = vector.shape_cast %21 : vector<256x128xf32> to vector<16x16x128xf32>
    %23 = arith.truncf %22 : vector<16x16x128xf32> to vector<16x16x128xbf16>
    %c0_16 = arith.constant 0 : index
    %c0_17 = arith.constant 0 : index
    %c0_18 = arith.constant 0 : index
    %c0_19 = arith.constant 0 : index
    %24 = vector.load %arg4[%c0_16, %c0_17, %c0_18, %c0_19] : memref<1x16x16x128xbf16, #tpu.memory_space<vmem>>, vector<1x16x16x128xbf16>
    %25 = vector.shape_cast %24 : vector<1x16x16x128xbf16> to vector<16x16x128xbf16>
    %26 = vector.shape_cast %23 : vector<16x16x128xbf16> to vector<1x16x16x128xbf16>
    tpu.vector_store %arg4[%c0_16, %c0_17, %c0_18, %c0_19], %26 {strides = array<i32>} : memref<1x16x16x128xbf16, #tpu.memory_space<vmem>>, vector<1x16x16x128xbf16>,
    %cst_20 = arith.constant dense<0.000000e+00> : vector<128xf32>
    %27 = vector.multi_reduction <add>, %21, %cst_20 [0] : vector<256x128xf32> to vector<128xf32>
    %28 = vector.shape_cast %27 : vector<128xf32> to vector<1x128xf32>
    %29 = arith.mulf %21, %21 : vector<256x128xf32>
    %cst_21 = arith.constant dense<0.000000e+00> : vector<128xf32>
    %30 = vector.multi_reduction <add>, %29, %cst_21 [0] : vector<256x128xf32> to vector<128xf32>
    %31 = vector.shape_cast %30 : vector<128xf32> to vector<1x128xf32>
    %32 = tpu.concatenate %28, %31 in 0 : vector<1x128xf32>, vector<1x128xf32> -> vector<2x128xf32>
    %c0_22 = arith.constant 0 : index
    %c0_23 = arith.constant 0 : index
    %c0_24 = arith.constant 0 : index
    %33 = vector.load %arg5[%c0_22, %c0_23, %c0_24] : memref<1x2x128xf32, #tpu.memory_space<vmem>>, vector<1x2x128xf32>
    %34 = vector.shape_cast %33 : vector<1x2x128xf32> to vector<2x128xf32>
    %35 = vector.shape_cast %32 : vector<2x128xf32> to vector<1x2x128xf32>
    tpu.vector_store %arg5[%c0_22, %c0_23, %c0_24], %35 {strides = array<i32>} : memref<1x2x128xf32, #tpu.memory_space<vmem>>, vector<1x2x128xf32>,
    return
  }
  func.func @transform_0(%arg0: i32) -> (i32, i32, i32, i32) {
    %c0_i32 = arith.constant 0 : i32
    %c0_i32_0 = arith.constant 0 : i32
    %c0_i32_1 = arith.constant 0 : i32
    %c0_i32_2 = arith.constant 0 : i32
    return %arg0, %c0_i32, %c0_i32_0, %c0_i32_1 : i32, i32, i32, i32
  }
  func.func @transform_1(%arg0: i32) -> (i32, i32) {
    %c0_i32 = arith.constant 0 : i32
    %c0_i32_0 = arith.constant 0 : i32
    %c0_i32_1 = arith.constant 0 : i32
    return %c0_i32, %c0_i32_0 : i32, i32
  }
  func.func @transform_2(%arg0: i32) -> (i32, i32) {
    %c0_i32 = arith.constant 0 : i32
    %c0_i32_0 = arith.constant 0 : i32
    %c0_i32_1 = arith.constant 0 : i32
    return %c0_i32, %c0_i32_0 : i32, i32
  }
  func.func @transform_3(%arg0: i32) -> (i32, i32, i32, i32) {
    %c0_i32 = arith.constant 0 : i32
    %c0_i32_0 = arith.constant 0 : i32
    %c0_i32_1 = arith.constant 0 : i32
    %c0_i32_2 = arith.constant 0 : i32
    return %arg0, %c0_i32, %c0_i32_0, %c0_i32_1 : i32, i32, i32, i32
  }
  func.func @transform_4(%arg0: i32) -> (i32, i32, i32) {
    %c0_i32 = arith.constant 0 : i32
    %c0_i32_0 = arith.constant 0 : i32
    %c0_i32_1 = arith.constant 0 : i32
    return %arg0, %c0_i32, %c0_i32_0 : i32, i32, i32
  }
}

module attributes {stable_mosaic.version = 11 : i64} {
  func.func @kernel(%arg0: i32, %arg1: memref<1x16x16x128xbf16, #tpu.memory_space<vmem>>, %arg2: memref<1152x128xbf16, #tpu.memory_space<vmem>>, %arg3: memref<1x128xf32, #tpu.memory_space<vmem>>, %arg4: memref<1x128xf32, #tpu.memory_space<vmem>>, %arg5: memref<1x128xf32, #tpu.memory_space<vmem>>, %arg6: memref<1x16x16x128xbf16, #tpu.memory_space<vmem>>, %arg7: memref<1x2x128xf32, #tpu.memory_space<vmem>>, %arg8: memref<18x18x128xbf16, #tpu.memory_space<vmem>>) attributes {dimension_semantics = [#tpu.dimension_semantics<parallel>], iteration_bounds = array<i64: 2>, scalar_prefetch = 0 : i64, scratch_operands = 1 : i64, tpu.core_type = #tpu.core_type<tc>, window_params = [{transform_indices = @transform_0, window_bounds = array<i64: 1, 16, 16, 128>}, {pipeline_mode = #tpu.pipeline_mode<synchronous>, transform_indices = @transform_1, window_bounds = array<i64: 1152, 128>}, {pipeline_mode = #tpu.pipeline_mode<synchronous>, transform_indices = @transform_2, window_bounds = array<i64: 1, 128>}, {pipeline_mode = #tpu.pipeline_mode<synchronous>, transform_indices = @transform_3, window_bounds = array<i64: 1, 128>}, {pipeline_mode = #tpu.pipeline_mode<synchronous>, transform_indices = @transform_4, window_bounds = array<i64: 1, 128>}, {transform_indices = @transform_5, window_bounds = array<i64: 1, 16, 16, 128>}, {transform_indices = @transform_6, window_bounds = array<i64: 1, 2, 128>}]} {
    %c0 = arith.constant 0 : index
    %c0_0 = arith.constant 0 : index
    %c0_1 = arith.constant 0 : index
    %c0_2 = arith.constant 0 : index
    %0 = vector.load %arg1[%c0, %c0_0, %c0_1, %c0_2] : memref<1x16x16x128xbf16, #tpu.memory_space<vmem>>, vector<1x16x16x128xbf16>
    %1 = vector.shape_cast %0 : vector<1x16x16x128xbf16> to vector<16x16x128xbf16>
    %2 = arith.extf %1 : vector<16x16x128xbf16> to vector<16x16x128xf32>
    %c0_3 = arith.constant 0 : index
    %c0_4 = arith.constant 0 : index
    %3 = vector.load %arg4[%c0_3, %c0_4] : memref<1x128xf32, #tpu.memory_space<vmem>>, vector<1x128xf32>
    %4 = vector.shape_cast %3 : vector<1x128xf32> to vector<1x1x128xf32>
    %5 = vector.broadcast %4 : vector<1x1x128xf32> to vector<16x16x128xf32>
    %6 = arith.mulf %2, %5 : vector<16x16x128xf32>
    %c0_5 = arith.constant 0 : index
    %c0_6 = arith.constant 0 : index
    %7 = vector.load %arg5[%c0_5, %c0_6] : memref<1x128xf32, #tpu.memory_space<vmem>>, vector<1x128xf32>
    %8 = vector.shape_cast %7 : vector<1x128xf32> to vector<1x1x128xf32>
    %9 = vector.broadcast %8 : vector<1x1x128xf32> to vector<16x16x128xf32>
    %10 = arith.addf %6, %9 : vector<16x16x128xf32>
    %cst = arith.constant 0.000000e+00 : f32
    %11 = vector.broadcast %cst : f32 to vector<16x16x128xf32>
    %12 = arith.maximumf %10, %11 : vector<16x16x128xf32>
    %cst_7 = arith.constant 0.000000e+00 : bf16
    %13 = vector.broadcast %cst_7 : bf16 to vector<18x18x128xbf16>
    %c0_8 = arith.constant 0 : index
    %c0_9 = arith.constant 0 : index
    %c0_10 = arith.constant 0 : index
    %14 = vector.load %arg8[%c0_8, %c0_9, %c0_10] : memref<18x18x128xbf16, #tpu.memory_space<vmem>>, vector<18x18x128xbf16>
    tpu.vector_store %arg8[%c0_8, %c0_9, %c0_10], %13 {strides = array<i32>} : memref<18x18x128xbf16, #tpu.memory_space<vmem>>, vector<18x18x128xbf16>,
    %15 = arith.truncf %12 : vector<16x16x128xf32> to vector<16x16x128xbf16>
    %c1 = arith.constant 1 : index
    %c1_11 = arith.constant 1 : index
    %c0_12 = arith.constant 0 : index
    %16 = vector.load %arg8[%c1, %c1_11, %c0_12] : memref<18x18x128xbf16, #tpu.memory_space<vmem>>, vector<16x16x128xbf16>
    tpu.vector_store %arg8[%c1, %c1_11, %c0_12], %15 {strides = array<i32>} : memref<18x18x128xbf16, #tpu.memory_space<vmem>>, vector<16x16x128xbf16>,
    %c0_13 = arith.constant 0 : index
    %c0_14 = arith.constant 0 : index
    %c0_15 = arith.constant 0 : index
    %17 = vector.load %arg8[%c0_13, %c0_14, %c0_15] : memref<18x18x128xbf16, #tpu.memory_space<vmem>>, vector<18x18x128xbf16>
    %18 = vector.extract_strided_slice %17 {offsets = [0, 0, 0], sizes = [16, 16, 128], strides = [1, 1, 1]} : vector<18x18x128xbf16> to vector<16x16x128xbf16>
    %19 = vector.extract_strided_slice %17 {offsets = [0, 1, 0], sizes = [16, 16, 128], strides = [1, 1, 1]} : vector<18x18x128xbf16> to vector<16x16x128xbf16>
    %20 = vector.extract_strided_slice %17 {offsets = [0, 2, 0], sizes = [16, 16, 128], strides = [1, 1, 1]} : vector<18x18x128xbf16> to vector<16x16x128xbf16>
    %21 = vector.extract_strided_slice %17 {offsets = [1, 0, 0], sizes = [16, 16, 128], strides = [1, 1, 1]} : vector<18x18x128xbf16> to vector<16x16x128xbf16>
    %22 = vector.extract_strided_slice %17 {offsets = [1, 1, 0], sizes = [16, 16, 128], strides = [1, 1, 1]} : vector<18x18x128xbf16> to vector<16x16x128xbf16>
    %23 = vector.extract_strided_slice %17 {offsets = [1, 2, 0], sizes = [16, 16, 128], strides = [1, 1, 1]} : vector<18x18x128xbf16> to vector<16x16x128xbf16>
    %24 = vector.extract_strided_slice %17 {offsets = [2, 0, 0], sizes = [16, 16, 128], strides = [1, 1, 1]} : vector<18x18x128xbf16> to vector<16x16x128xbf16>
    %25 = vector.extract_strided_slice %17 {offsets = [2, 1, 0], sizes = [16, 16, 128], strides = [1, 1, 1]} : vector<18x18x128xbf16> to vector<16x16x128xbf16>
    %26 = vector.extract_strided_slice %17 {offsets = [2, 2, 0], sizes = [16, 16, 128], strides = [1, 1, 1]} : vector<18x18x128xbf16> to vector<16x16x128xbf16>
    %27 = tpu.concatenate %18, %19, %20, %21, %22, %23, %24, %25, %26 in 2 : vector<16x16x128xbf16>, vector<16x16x128xbf16>, vector<16x16x128xbf16>, vector<16x16x128xbf16>, vector<16x16x128xbf16>, vector<16x16x128xbf16>, vector<16x16x128xbf16>, vector<16x16x128xbf16>, vector<16x16x128xbf16> -> vector<16x16x1152xbf16>
    %28 = vector.shape_cast %27 : vector<16x16x1152xbf16> to vector<256x1152xbf16>
    %c0_16 = arith.constant 0 : index
    %c0_17 = arith.constant 0 : index
    %29 = vector.load %arg2[%c0_16, %c0_17] : memref<1152x128xbf16, #tpu.memory_space<vmem>>, vector<1152x128xbf16>
    %cst_18 = arith.constant dense<0.000000e+00> : vector<256x128xf32>
    %30 = tpu.matmul %28, %29, %cst_18 {dimension_numbers = #tpu.dot_dimension_numbers<[1], [0], [0], [1], [0, 0, 1, 1], [], []>} : vector<256x1152xbf16>, vector<1152x128xbf16>, vector<256x128xf32> -> vector<256x128xf32>
    %c0_19 = arith.constant 0 : index
    %c0_20 = arith.constant 0 : index
    %31 = vector.load %arg3[%c0_19, %c0_20] : memref<1x128xf32, #tpu.memory_space<vmem>>, vector<1x128xf32>
    %32 = vector.broadcast %31 : vector<1x128xf32> to vector<256x128xf32>
    %33 = arith.addf %30, %32 : vector<256x128xf32>
    %34 = vector.shape_cast %33 : vector<256x128xf32> to vector<16x16x128xf32>
    %35 = arith.truncf %34 : vector<16x16x128xf32> to vector<16x16x128xbf16>
    %c0_21 = arith.constant 0 : index
    %c0_22 = arith.constant 0 : index
    %c0_23 = arith.constant 0 : index
    %c0_24 = arith.constant 0 : index
    %36 = vector.load %arg6[%c0_21, %c0_22, %c0_23, %c0_24] : memref<1x16x16x128xbf16, #tpu.memory_space<vmem>>, vector<1x16x16x128xbf16>
    %37 = vector.shape_cast %36 : vector<1x16x16x128xbf16> to vector<16x16x128xbf16>
    %38 = vector.shape_cast %35 : vector<16x16x128xbf16> to vector<1x16x16x128xbf16>
    tpu.vector_store %arg6[%c0_21, %c0_22, %c0_23, %c0_24], %38 {strides = array<i32>} : memref<1x16x16x128xbf16, #tpu.memory_space<vmem>>, vector<1x16x16x128xbf16>,
    %cst_25 = arith.constant dense<0.000000e+00> : vector<128xf32>
    %39 = vector.multi_reduction <add>, %33, %cst_25 [0] : vector<256x128xf32> to vector<128xf32>
    %40 = vector.shape_cast %39 : vector<128xf32> to vector<1x128xf32>
    %41 = arith.mulf %33, %33 : vector<256x128xf32>
    %cst_26 = arith.constant dense<0.000000e+00> : vector<128xf32>
    %42 = vector.multi_reduction <add>, %41, %cst_26 [0] : vector<256x128xf32> to vector<128xf32>
    %43 = vector.shape_cast %42 : vector<128xf32> to vector<1x128xf32>
    %44 = tpu.concatenate %40, %43 in 0 : vector<1x128xf32>, vector<1x128xf32> -> vector<2x128xf32>
    %c0_27 = arith.constant 0 : index
    %c0_28 = arith.constant 0 : index
    %c0_29 = arith.constant 0 : index
    %45 = vector.load %arg7[%c0_27, %c0_28, %c0_29] : memref<1x2x128xf32, #tpu.memory_space<vmem>>, vector<1x2x128xf32>
    %46 = vector.shape_cast %45 : vector<1x2x128xf32> to vector<2x128xf32>
    %47 = vector.shape_cast %44 : vector<2x128xf32> to vector<1x2x128xf32>
    tpu.vector_store %arg7[%c0_27, %c0_28, %c0_29], %47 {strides = array<i32>} : memref<1x2x128xf32, #tpu.memory_space<vmem>>, vector<1x2x128xf32>,
    return
  }
  func.func @transform_0(%arg0: i32) -> (i32, i32, i32, i32) {
    %c0_i32 = arith.constant 0 : i32
    %c0_i32_0 = arith.constant 0 : i32
    %c0_i32_1 = arith.constant 0 : i32
    %c0_i32_2 = arith.constant 0 : i32
    return %arg0, %c0_i32, %c0_i32_0, %c0_i32_1 : i32, i32, i32, i32
  }
  func.func @transform_1(%arg0: i32) -> (i32, i32) {
    %c0_i32 = arith.constant 0 : i32
    %c0_i32_0 = arith.constant 0 : i32
    %c0_i32_1 = arith.constant 0 : i32
    return %c0_i32, %c0_i32_0 : i32, i32
  }
  func.func @transform_2(%arg0: i32) -> (i32, i32) {
    %c0_i32 = arith.constant 0 : i32
    %c0_i32_0 = arith.constant 0 : i32
    %c0_i32_1 = arith.constant 0 : i32
    return %c0_i32, %c0_i32_0 : i32, i32
  }
  func.func @transform_3(%arg0: i32) -> (i32, i32) {
    %c0_i32 = arith.constant 0 : i32
    %c0_i32_0 = arith.constant 0 : i32
    %c0_i32_1 = arith.constant 0 : i32
    return %c0_i32, %c0_i32_0 : i32, i32
  }
  func.func @transform_4(%arg0: i32) -> (i32, i32) {
    %c0_i32 = arith.constant 0 : i32
    %c0_i32_0 = arith.constant 0 : i32
    %c0_i32_1 = arith.constant 0 : i32
    return %c0_i32, %c0_i32_0 : i32, i32
  }
  func.func @transform_5(%arg0: i32) -> (i32, i32, i32, i32) {
    %c0_i32 = arith.constant 0 : i32
    %c0_i32_0 = arith.constant 0 : i32
    %c0_i32_1 = arith.constant 0 : i32
    %c0_i32_2 = arith.constant 0 : i32
    return %arg0, %c0_i32, %c0_i32_0, %c0_i32_1 : i32, i32, i32, i32
  }
  func.func @transform_6(%arg0: i32) -> (i32, i32, i32) {
    %c0_i32 = arith.constant 0 : i32
    %c0_i32_0 = arith.constant 0 : i32
    %c0_i32_1 = arith.constant 0 : i32
    return %arg0, %c0_i32, %c0_i32_0 : i32, i32, i32
  }
}

</mosaic_0001>

<bundles_post_ra>
// kernel: inconv_forward.2
= control target key start
LH: loop header
LB: loop body
LE: loop exit
PB: predicated region body
PF: predicated region fallthrough
CT: control target
= control target key end

     0   :  { %s2705_s15 = smov 0   ;;  %s3498_s0 = inlined_call_operand.vmem [shape: bf16[2,16,16,4], index: 0, kind: input, shape index: {}]   ;;  %s3499_s1 = inlined_call_operand.vmem [shape: bf16[36,128], index: 1, kind: input, shape index: {}]   ;;  %s3500_s2 = inlined_call_operand.vmem [shape: f32[1,128], index: 2, kind: input, shape index: {}]   ;;  %s3501_s3 = inlined_call_operand.vmem [shape: bf16[2,16,16,128], index: 3, kind: output, shape index: {0}]   ;;  %s3502_s4 = inlined_call_operand.vmem [shape: f32[2,2,128], index: 4, kind: output, shape index: {1}]  }
   0x1 LB: > { %s2309_s16 = sadd.s32 4294967295, %s2669_s15   ;;  %p2313_p0 = scmp.ge.s32.totalorder %s2669_s15, 1  ;;  %s2669_s15 = sphi %s2705_s15, %s15_s15  }
   0x2   : > { %p165_p1 = scmp.lt.s32.totalorder %s2669_s15, 3 }
   0x4   : > { %p166_p2 = pnand %p2313_p0, %p165_p1 }
   0x5   : > { %p195_p3 = scmp.lt.s32.totalorder (!%p166_p2), %s2309_s16, 1  ;;  %s2672_s21 = smov (!%p166_p2), 8  }
   0x6   : > { %169 = sbr.rel (%p166_p2) target bundleno = 639 (0x27f), region = 32  ;;  %s2673_s22 = smov (!%p166_p2), 4  }
   0x7   : > { %s2674_s23 = smov (!%p166_p2), 12   ;;  %s2675_s24 = smov (!%p166_p2), 24  }
   0x8   : > { %s2676_s25 = smov (!%p166_p2), 20   ;;  %s2677_s26 = smov (!%p166_p2), 32  }
   0x9   : > { %s2678_s27 = smov (!%p166_p2), 16   ;;  %s2679_s28 = smov (!%p166_p2), 28  }
   0xb   : > { %vm242_vm0 = vcmask 27648   ;;  %vm245_vm1 = vcmask 24576   ;;  %v2671_v0 = vmov 0   ;;  %s3510_s16 = smov (!%p195_p3, %s2309_s16), 1  ;;  %vm921_vm2 = vsmask.f32 7424 }
   0xc   : > { %243 = vst.msk [vmem:[#allocation2] sm:$0xf] %vm242_vm0, %v2671_v0  ;;  %244 = vst.msk [vmem:[#allocation2 + $0x4] sm:$0xf] %vm242_vm0, %v2671_v0  ;;  %s2409_s17 = sshll.u32 %s3510_s16, 7  ;;  %vm1146_vm6 = vcmask 1046528  }
   0xd   : > { %246 = vst.msk [vmem:[#allocation2 + $0x8] sm:$0x1] %vm245_vm1, %v2671_v0  ;;  %249 = vst.msk [vmem:[#allocation2 + $0x14] sm:$0x1] %vm245_vm1, %v2671_v0  ;;  %s2779_s20 = scalar_lea.vmem %s3498_s0, %s2409_s17  ;;  %vm298_vm3 = vsmask.f32 256  ;;  %s3424_s13 = scalar_lea.vmem %s3501_s3, %s2409_s17 }
   0xe   : > { %247 = vst.msk [vmem:[#allocation2 + $0xc] sm:$0xf] %vm242_vm0, %v2671_v0  ;;  %248 = vst.msk [vmem:[#allocation2 + $0x10] sm:$0xf] %vm242_vm0, %v2671_v0  ;;  %vm299_vm4 = vsmask.f32 4368 }
   0xf   : > { %250 = vst.msk [vmem:[#allocation2 + $0x18] sm:$0xf] %vm242_vm0, %v2671_v0  ;;  %251 = vst.msk [vmem:[#allocation2 + $0x1c] sm:$0xf] %vm242_vm0, %v2671_v0  ;;  %vm623_vm5 = vsmask.f32 7938 }
  0x10   : > { %252 = vst.msk [vmem:[#allocation2 + $0x20] sm:$0x1] %vm245_vm1, %v2671_v0  ;;  %255 = vst.msk [vmem:[#allocation2 + $0x2c] sm:$0x1] %vm245_vm1, %v2671_v0  ;;  %v212_v1 = vld [vmem:[%s2779_s20 + $0x8] sm:$0xf] }
  0x11   : > { %253 = vst.msk [vmem:[#allocation2 + $0x24] sm:$0xf] %vm242_vm0, %v2671_v0  ;;  %254 = vst.msk [vmem:[#allocation2 + $0x28] sm:$0xf] %vm242_vm0, %v2671_v0  ;;  %v213_v2 = vld [vmem:[%s2779_s20 + $0xc] sm:$0xf] }
  0x12   : > { %256 = vst.msk [vmem:[#allocation2 + $0x30] sm:$0xf] %vm242_vm0, %v2671_v0  ;;  %257 = vst.msk [vmem:[#allocation2 + $0x34] sm:$0xf] %vm242_vm0, %v2671_v0  ;;  %v210_v3 = vld [vmem:[%s2779_s20] sm:$0xf] }
  0x13   : > { %258 = vst.msk [vmem:[#allocation2 + $0x38] sm:$0x1] %vm245_vm1, %v2671_v0  ;;  %261 = vst.msk [vmem:[#allocation2 + $0x44] sm:$0x1] %vm245_vm1, %v2671_v0  ;;  %v2620_v4 = vld [vmem:[#allocation2] sm:$0xff]   ;;  %v319_v6 = vshrl.u32 %v212_v1, 16 }
  0x14   : > { %259 = vst.msk [vmem:[#allocation2 + $0x3c] sm:$0xf] %vm242_vm0, %v2671_v0  ;;  %260 = vst.msk [vmem:[#allocation2 + $0x40] sm:$0xf] %vm242_vm0, %v2671_v0  ;;  %v322_v7 = vshll.u32 %v212_v1, 16  ;;  %v327_v8 = vshrl.u32 %v213_v2, 16 }
  0x15   : > { %262 = vst.msk [vmem:[#allocation2 + $0x48] sm:$0xf] %vm242_vm0, %v2671_v0  ;;  %263 = vst.msk [vmem:[#allocation2 + $0x4c] sm:$0xf] %vm242_vm0, %v2671_v0  ;;  %v330_v9 = vshll.u32 %v213_v2, 16  ;;  %v1147_v11 = vrot.slane %v2620_v4, 1 }
  0x16   : > { %264 = vst.msk [vmem:[#allocation2 + $0x50] sm:$0x1] %vm245_vm1, %v2671_v0  ;;  %267 = vst.msk [vmem:[#allocation2 + $0x5c] sm:$0x1] %vm245_vm1, %v2671_v0  ;;  %v211_v10 = vld [vmem:[%s2779_s20 + $0x4] sm:$0xf] }
  0x17   : > { %265 = vst.msk [vmem:[#allocation2 + $0x54] sm:$0xf] %vm242_vm0, %v2671_v0  ;;  %266 = vst.msk [vmem:[#allocation2 + $0x58] sm:$0xf] %vm242_vm0, %v2671_v0  ;;  %v923_v13 = vshrl.u32 %v2620_v4, 16  ;;  %v925_v14 = vshll.u32 %v2620_v4, 16 }
  0x18   : > { %268 = vst.msk [vmem:[#allocation2 + $0x60] sm:$0xf] %vm242_vm0, %v2671_v0  ;;  %269 = vst.msk [vmem:[#allocation2 + $0x64] sm:$0xf] %vm242_vm0, %v2671_v0  ;;  %v321_v17 = vrot.slane %v319_v6, 7  ;;  %v329_v18 = vrot.slane %v327_v8, 7 }
  0x19   : > { %270 = vst.msk [vmem:[#allocation2 + $0x68] sm:$0x1] %vm245_vm1, %v2671_v0  ;;  %273 = vst.msk [vmem:[#allocation2 + $0x74] sm:$0x1] %vm245_vm1, %v2671_v0  ;;  %v634_v19 = vld [vmem:[#allocation2 + $0x18] sm:$0xf] }
  0x1a   : > { %271 = vst.msk [vmem:[#allocation2 + $0x6c] sm:$0xf] %vm242_vm0, %v2671_v0  ;;  %272 = vst.msk [vmem:[#allocation2 + $0x70] sm:$0xf] %vm242_vm0, %v2671_v0  ;;  %v302_v20 = vshrl.u32 %v210_v3, 16  ;;  %v927_v22 = vrot.slane %v925_v14, 1  ;;  %v324_v28 = vor.u32 %v322_v7, %v321_v17  ;;  %v332_v30 = vor.u32 %v330_v9, %v329_v18 }
  0x1b   : > { %274 = vst.msk [vmem:[#allocation2 + $0x78] sm:$0xf] %vm242_vm0, %v2671_v0  ;;  %275 = vst.msk [vmem:[#allocation2 + $0x7c] sm:$0xf] %vm242_vm0, %v2671_v0  ;;  %v305_v24 = vshll.u32 %v210_v3, 16  ;;  %v310_v25 = vshrl.u32 %v211_v10, 16 }
  0x1c   : > { %276 = vst.msk [vmem:[#allocation2 + $0x80] sm:$0x1] %vm245_vm1, %v2671_v0  ;;  %279 = vst.msk [vmem:[#allocation2 + $0x8c] sm:$0x1] %vm245_vm1, %v2671_v0  ;;  %v214_v26 = vld [vmem:[%s2779_s20 + $0x10] sm:$0xf]  ;;  %v928_v31 = vor.u32 %v927_v22, %v923_v13 }
  0x1d   : > { %277 = vst.msk [vmem:[#allocation2 + $0x84] sm:$0xf] %vm242_vm0, %v2671_v0  ;;  %278 = vst.msk [vmem:[#allocation2 + $0x88] sm:$0xf] %vm242_vm0, %v2671_v0  ;;  %v325_v29 = vrot.slane %v321_v17, 4  ;;  %v304_v32 = vrot.slane %v302_v20, 7 }
  0x1e   : > { %280 = vst.msk [vmem:[#allocation2 + $0x90] sm:$0xf] %vm242_vm0, %v2671_v0  ;;  %281 = vst.msk [vmem:[#allocation2 + $0x94] sm:$0xf] %vm242_vm0, %v2671_v0  ;;  %v312_v33 = vrot.slane %v310_v25, 7  ;;  %v313_v34 = vshll.u32 %v211_v10, 16 }
  0x1f   : > { %282 = vst.msk [vmem:[#allocation2 + $0x98] sm:$0x1] %vm245_vm1, %v2671_v0  ;;  %285 = vst.msk [vmem:[#allocation2 + $0xa4] sm:$0x1] %vm245_vm1, %v2671_v0  ;;  %v215_v35 = vld [vmem:[%s2779_s20 + $0x14] sm:$0xf]  ;;  %v307_v43 = vor.u32 %v305_v24, %v304_v32 }
  0x20   : > { %283 = vst.msk [vmem:[#allocation2 + $0x9c] sm:$0xf] %vm242_vm0, %v2671_v0  ;;  %284 = vst.msk [vmem:[#allocation2 + $0xa0] sm:$0xf] %vm242_vm0, %v2671_v0  ;;  %v625_v38 = vld [vmem:[#allocation2 + $0xc] sm:$0xf]  ;;  %v315_v45 = vor.u32 %v313_v34, %v312_v33 }
  0x21   : > { %286 = vst.msk [vmem:[#allocation2 + $0xa8] sm:$0xf] %vm242_vm0, %v2671_v0  ;;  %287 = vst.msk [vmem:[#allocation2 + $0xac] sm:$0xf] %vm242_vm0, %v2671_v0  ;;  %v336_v39 = vshrl.u32 %v214_v26, 16  ;;  %v339_v40 = vshll.u32 %v214_v26, 16 }
  0x22   : > { %288 = vst.msk [vmem:[#allocation2 + $0xb0] sm:$0x1] %vm245_vm1, %v2671_v0  ;;  %291 = vst.msk [vmem:[#allocation2 + $0xbc] sm:$0x1] %vm245_vm1, %v2671_v0  ;;  %v216_v41 = vld [vmem:[%s2779_s20 + $0x18] sm:$0xf] }
  0x23   : > { %289 = vst.msk [vmem:[#allocation2 + $0xb4] sm:$0xf] %vm242_vm0, %v2671_v0  ;;  %290 = vst.msk [vmem:[#allocation2 + $0xb8] sm:$0xf] %vm242_vm0, %v2671_v0  ;;  %v308_v44 = vrot.slane %v304_v32, 4  ;;  %v338_v49 = vrot.slane %v336_v39, 7 }
  0x24   : > { %292 = vst.msk [vmem:[#allocation2 + $0xc0] sm:$0xf] %vm242_vm0, %v2671_v0  ;;  %293 = vst.msk [vmem:[#allocation2 + $0xc4] sm:$0xf] %vm242_vm0, %v2671_v0  ;;  %v631_v47 = vld [vmem:[#allocation2 + $0x14] sm:$0x1] }
  0x25   : > { %294 = vst.msk [vmem:[#allocation2 + $0xc8] sm:$0x1] %vm245_vm1, %v2671_v0  ;;  %297 = vst.msk [vmem:[#allocation2 + $0xd4] sm:$0x1] %vm245_vm1, %v2671_v0  ;;  %v638_v48 = vld [vmem:[#allocation2 + $0x20] sm:$0x1]  ;;  %v341_v59 = vor.u32 %v339_v40, %v338_v49 }
  0x26   : > { %295 = vst.msk [vmem:[#allocation2 + $0xcc] sm:$0xf] %vm242_vm0, %v2671_v0  ;;  %296 = vst.msk [vmem:[#allocation2 + $0xd0] sm:$0xf] %vm242_vm0, %v2671_v0  ;;  %v344_v50 = vshrl.u32 %v215_v35, 16  ;;  %v347_v51 = vshll.u32 %v215_v35, 16 }
  0x27   : > { %v2621_v5 = vld [vmem:[#allocation2 + $0x8] ss:$0 sps:$4 sm:$0x11]   ;;  %vm2787_vm7 = vmor %vm298_vm3, %vm299_vm4  ;;  %v317_v52 = vrot.slane %v312_v33, 4  ;;  %v217_v53 = vld [vmem:[%s2779_s20 + $0x1c] sm:$0xf] }
  0x28   : > { %v1148_v12 = vrot.slane %v2621_v5, 1  ;;  %v930_v15 = vshll.u32 %v2621_v5, 16  ;;  %vm2794_vm8 = vmand %vm242_vm0, %vm623_vm5  ;;  %v333_v36 = vsel %vm2787_vm7, %v325_v29, %v332_v30  ;;  %v316_v54 = vsel %vm2787_vm7, %v308_v44, %v315_v45  ;;  %v641_v56 = vld [vmem:[#allocation2 + $0x24] sm:$0xf]  ;;  %v218_v63 = vld [vmem:[%s2779_s20 + $0x20] sm:$0xf] }
  0x29   : > { %v635_v37 = vsel %vm2794_vm8, %v324_v28, %v634_v19  ;;  %637 = vst.msk [vmem:[#allocation2 + $0x1c] sm:$0xf] %vm242_vm0, %v333_v36  ;;  %vm2810_vm9 = vmand %vm245_vm1, %vm298_vm3  ;;  %v626_v55 = vsel %vm2794_vm8, %v307_v43, %v625_v38  ;;  %v334_v57 = vrot.slane %v329_v18, 4  ;;  %v353_v58 = vshrl.u32 %v216_v41, 16  ;;  %v645_v1 = vld [vmem:[#allocation2 + $0x2c] sm:$0x1] }
  0x2a   : > { %v1149_v21 = vsel %vm1146_vm6, %v1147_v11, %v1148_v12  ;;  %v932_v27 = vrot.slane %v930_v15, 1  ;;  %636 = vst [vmem:[#allocation2 + $0x18] sm:$0xf] %v635_v37  ;;  %627 = vst [vmem:[#allocation2 + $0xc] sm:$0xf] %v626_v55  ;;  %v342_v60 = vrot.slane %v338_v49, 4  ;;  %v632_v62 = vsel %vm2810_vm9, %v317_v52, %v631_v47 }
  0x2b   : > { %1195 = vrot.lane.b32.xlu1 %v1149_v21, %s2672_s21  ;;  %628 = vst.msk [vmem:[#allocation2 + $0x10] sm:$0xf] %vm242_vm0, %v316_v54  ;;  %v346_v61 = vrot.slane %v344_v50, 7  ;;  %633 = vst [vmem:[#allocation2 + $0x14] sm:$0x1] %v632_v62  ;;  %v639_v0 = vsel %vm2810_vm9, %v334_v57, %v638_v48  ;;  %v355_v2 = vrot.slane %v353_v58, 7  ;;  %v642_v6 = vsel %vm2794_vm8, %v341_v59, %v641_v56 }
  0x2c   : > { %v933_v42 = vsel %vm921_vm2, %v928_v31, %v932_v27  ;;  %v356_v3 = vshll.u32 %v216_v41, 16  ;;  %v361_v4 = vshrl.u32 %v217_v53, 16  ;;  %640 = vst [vmem:[#allocation2 + $0x20] sm:$0x1] %v639_v0  ;;  %v364_v8 = vshll.u32 %v217_v53, 16  ;;  %s2318_s14 = sshll.u32 %s3510_s16, 1 }
  0x2d   : > { %1114 = vrot.lane.b32.xlu0 %v933_v42, %s2673_s22  ;;  %v349_v5 = vor.u32 %v347_v51, %v346_v61  ;;  %v351_v7 = vrot.slane %v346_v61, 4  ;;  %v648_v9 = vld [vmem:[#allocation2 + $0x30] sm:$0xf]  ;;  %v652_v10 = vld [vmem:[#allocation2 + $0x38] sm:$0x1]  ;;  %v359_v12 = vrot.slane %v355_v2, 4  ;;  %s208_s19 = scalar_lea.vmem %s3502_s4, %s2318_s14 }
  0x2e   : > { %643 = vst [vmem:[#allocation2 + $0x24] sm:$0xf] %v642_v6  ;;  %v358_v11 = vor.u32 %v356_v3, %v355_v2  ;;  %v363_v13 = vrot.slane %v361_v4, 7  ;;  %v219_v14 = vld [vmem:[%s2779_s20 + $0x24] sm:$0xf]  ;;  %v370_v15 = vshrl.u32 %v218_v63, 16 }
  0x2f   : > { %v350_v18 = vsel %vm2787_vm7, %v342_v60, %v349_v5  ;;  %v646_v19 = vsel %vm2810_vm9, %v351_v7, %v645_v1  ;;  %v373_v20 = vshll.u32 %v218_v63, 16  ;;  %v655_v27 = vld [vmem:[#allocation2 + $0x3c] sm:$0xf]  ;;  %v378_v32 = vshrl.u32 %v219_v14, 16  ;;  %v220_v61 = vld [vmem:[%s2779_s20 + $0x28] sm:$0xf] }
  0x30   : > { %644 = vst.msk [vmem:[#allocation2 + $0x28] sm:$0xf] %vm242_vm0, %v350_v18  ;;  %647 = vst [vmem:[#allocation2 + $0x2c] sm:$0x1] %v646_v19  ;;  %v366_v21 = vor.u32 %v364_v8, %v363_v13  ;;  %v649_v22 = vsel %vm2794_vm8, %v358_v11, %v648_v9  ;;  %v368_v24 = vrot.slane %v363_v13, 4  ;;  %v372_v25 = vrot.slane %v370_v15, 7 }
  0x31   : > { %v2622_v17 = vld [vmem:[#allocation2 + $0x18] sm:$0xff]   ;;  %650 = vst [vmem:[#allocation2 + $0x30] sm:$0xf] %v649_v22  ;;  %v380_v42 = vrot.slane %v378_v32, 7  ;;  %v381_v49 = vshll.u32 %v219_v14, 16  ;;  %v387_v7 = vshrl.u32 %v220_v61, 16 }
  0x32   : > { %1234 = vrot.lane.b32.xlu1 %v2622_v17, %s2674_s23  ;;  %v949_v26 = vshll.u32 %v2622_v17, 16  ;;  %v2837_v28 = vld [vmem:[#allocation2 + $0xc] sm:$0xff]   ;;  %v367_v29 = vsel %vm2787_vm7, %v359_v12, %v366_v21  ;;  %v653_v30 = vsel %vm2810_vm9, %v368_v24, %v652_v10  ;;  %v375_v31 = vor.u32 %v373_v20, %v372_v25  ;;  %v2625_v33 = vld [vmem:[#allocation2 + $0x14] ss:$0 sps:$4 sm:$0x11]  }
  0x33   : > { %651 = vst.msk [vmem:[#allocation2 + $0x34] sm:$0xf] %vm242_vm0, %v367_v29  ;;  %654 = vst [vmem:[#allocation2 + $0x38] sm:$0x1] %v653_v30  ;;  %1232 = vrot.lane.b32.xlu0 %v2837_v28, %s2674_s23  ;;  %v1150_v36 = vrot.slane %v2837_v28, 1  ;;  %v1151_v37 = vrot.slane %v2625_v33, 1  ;;  %v383_v57 = vor.u32 %v381_v49, %v380_v42 }
  0x34   : > { %v2626_v34 = vld [vmem:[#allocation2 + $0x20] ss:$0 sps:$4 sm:$0x11]   ;;  %v656_v35 = vsel %vm2794_vm8, %v375_v31, %v655_v27  ;;  %v937_v38 = vshll.u32 %v2837_v28, 16  ;;  %v947_v39 = vshrl.u32 %v2622_v17, 16  ;;  %v951_v40 = vrot.slane %v949_v26, 1 }
  0x35   : > { %657 = vst [vmem:[#allocation2 + $0x3c] sm:$0xf] %v656_v35  ;;  %v935_v41 = vshrl.u32 %v2837_v28, 16  ;;  %v954_v44 = vshll.u32 %v2626_v34, 16  ;;  %v942_v47 = vshll.u32 %v2625_v33, 16  ;;  %v1152_v50 = vsel %vm1146_vm6, %v1150_v36, %v1151_v37 }
  0x36   : > { %v939_v45 = vrot.slane %v937_v38, 1  ;;  %v1153_v51 = vrot.slane %v2622_v17, 1  ;;  %v1154_v52 = vrot.slane %v2626_v34, 1  ;;  %v376_v56 = vrot.slane %v372_v25, 4  ;;  %v659_v2 = vld [vmem:[#allocation2 + $0x44] sm:$0x1] }
  0x37   : > { %v2851_v43 = vld [vmem:[#allocation2 + $0x24] sm:$0xff]   ;;  %1351 = vrot.lane.b32.xlu0 %v2622_v17, %s2675_s24  ;;  %v2854_v48 = vld [vmem:[#allocation2 + $0x2c] ss:$0 sps:$4 sm:$0x11]   ;;  %v952_v58 = vor.u32 %v951_v40, %v947_v39  ;;  %v956_v59 = vrot.slane %v954_v44, 1  ;;  %v944_v63 = vrot.slane %v942_v47, 1 }
  0x38   : > { %1353 = vrot.lane.b32.xlu1 %v2851_v43, %s2675_s24  ;;  %v961_v53 = vshll.u32 %v2851_v43, 16  ;;  %v959_v54 = vshrl.u32 %v2851_v43, 16  ;;  %v966_v55 = vshll.u32 %v2854_v48, 16  ;;  %v940_v62 = vor.u32 %v939_v45, %v935_v41  ;;  %v221_v3 = vld [vmem:[%s2779_s20 + $0x2c] sm:$0xf] }
  0x39   : > { %v2866_v0 = vsel %vm1146_vm6, %v1153_v51, %v1154_v52  ;;  %v384_v5 = vsel %vm2787_vm7, %v376_v56, %v383_v57  ;;  %v385_v6 = vrot.slane %v380_v42, 4  ;;  %v222_v8 = vld [vmem:[%s2779_s20 + $0x30] sm:$0xf]  ;;  %v223_v9 = vld [vmem:[%s2779_s20 + $0x34] sm:$0xf]  ;;  %v2874_v10 = vsel %vm921_vm2, %v952_v58, %v956_v59 }
  0x3a   : > { %v963_v60 = vrot.slane %v961_v53, 1  ;;  %v968_v1 = vrot.slane %v966_v55, 1  ;;  %658 = vst.msk [vmem:[#allocation2 + $0x40] sm:$0xf] %vm242_vm0, %v384_v5  ;;  %v390_v11 = vshll.u32 %v220_v61, 16  ;;  %v945_v12 = vsel %vm921_vm2, %v940_v62, %v944_v63 }
  0x3b   : > { %1314 = vrot.lane.b32.xlu0 %v1152_v50, %s2676_s25  ;;  %v660_v13 = vsel %vm2810_vm9, %v385_v6, %v659_v2  ;;  %v389_v14 = vrot.slane %v387_v7, 7  ;;  %v395_v15 = vshrl.u32 %v221_v3, 16  ;;  %v224_v17 = vld [vmem:[%s2779_s20 + $0x38] sm:$0xf]  ;;  %v398_v18 = vshll.u32 %v221_v3, 16 }
  0x3c   : > { %1197 = vrot.lane.b32.xlu1 %v1152_v50, %s2672_s21  ;;  %v964_v4 = vor.u32 %v963_v60, %v959_v54  ;;  %661 = vst [vmem:[#allocation2 + $0x44] sm:$0x1] %v660_v13  ;;  %v662_v19 = vld [vmem:[#allocation2 + $0x48] sm:$0xf]  ;;  %v404_v20 = vshrl.u32 %v222_v8, 16  ;;  %v407_v21 = vshll.u32 %v222_v8, 16 }
  0x3d   : > { %v412_v22 = vshrl.u32 %v223_v9, 16  ;;  %v392_v25 = vor.u32 %v390_v11, %v389_v14  ;;  %v393_v26 = vrot.slane %v389_v14, 4  ;;  %v397_v27 = vrot.slane %v395_v15, 7  ;;  %v666_v29 = vld [vmem:[#allocation2 + $0x50] sm:$0x1] }
  0x3e   : > { %v2886_v24 = vsel %vm921_vm2, %v964_v4, %v968_v1  ;;  %v406_v30 = vrot.slane %v404_v20, 7  ;;  %v415_v32 = vshll.u32 %v223_v9, 16  ;;  %v225_v33 = vld [vmem:[%s2779_s20 + $0x3c] sm:$0xf]  ;;  %v421_v34 = vshrl.u32 %v224_v17, 16  ;;  %v2913_v1 = vld [vmem:[#allocation2 + $0x30] sm:$0xff]  }
  0x3f   : > { %1433 = vrot.lane.b32.xlu0 %v2866_v0, %s2677_s26  ;;  %v414_v31 = vrot.slane %v412_v22, 7  ;;  %v400_v35 = vor.u32 %v398_v18, %v397_v27  ;;  %v663_v36 = vsel %vm2794_vm8, %v392_v25, %v662_v19  ;;  %v402_v37 = vrot.slane %v397_v27, 4  ;;  %v669_v38 = vld [vmem:[#allocation2 + $0x54] sm:$0xf]  ;;  %v673_v39 = vld [vmem:[#allocation2 + $0x5c] sm:$0x1] }
  0x40   : > { %1316 = vrot.lane.b32.xlu1 %v2866_v0, %s2676_s25  ;;  %v424_v40 = vshll.u32 %v224_v17, 16  ;;  %664 = vst [vmem:[#allocation2 + $0x48] sm:$0xf] %v663_v36  ;;  %v409_v41 = vor.u32 %v407_v21, %v406_v30  ;;  %v410_v42 = vrot.slane %v406_v30, 4  ;;  %v423_v50 = vrot.slane %v421_v34, 7 }
  0x41   : > { %v417_v44 = vor.u32 %v415_v32, %v414_v31  ;;  %v419_v45 = vrot.slane %v414_v31, 4  ;;  %v401_v47 = vsel %vm2787_vm7, %v393_v26, %v400_v35  ;;  %v667_v49 = vsel %vm2810_vm9, %v402_v37, %v666_v29  ;;  %v676_v56 = vld [vmem:[#allocation2 + $0x60] sm:$0xf]  ;;  %v227_v63 = vld [vmem:[%s2779_s20 + $0x44] sm:$0xf] }
  0x42   : > { %v429_v51 = vshrl.u32 %v225_v33, 16  ;;  %665 = vst.msk [vmem:[#allocation2 + $0x4c] sm:$0xf] %vm242_vm0, %v401_v47  ;;  %668 = vst [vmem:[#allocation2 + $0x50] sm:$0x1] %v667_v49  ;;  %v670_v53 = vsel %vm2794_vm8, %v409_v41, %v669_v38  ;;  %v432_v55 = vshll.u32 %v225_v33, 16  ;;  %v426_v57 = vor.u32 %v424_v40, %v423_v50 }
  0x43   : > { %1116 = vrot.lane.b32.xlu0 %v945_v12, %s2673_s22  ;;  %v418_v52 = vsel %vm2787_vm7, %v410_v42, %v417_v44  ;;  %v674_v54 = vsel %vm2810_vm9, %v419_v45, %v673_v39  ;;  %671 = vst [vmem:[#allocation2 + $0x54] sm:$0xf] %v670_v53  ;;  %v226_v58 = vld [vmem:[%s2779_s20 + $0x40] sm:$0xf]  ;;  %v1156_v59 = vrot.slane %v2851_v43, 1  ;;  %v1157_v60 = vrot.slane %v2854_v48, 1 }
  0x44   : > { %1281 = vrot.lane.b32.xlu1 %v2874_v10, %s2678_s27  ;;  %672 = vst.msk [vmem:[#allocation2 + $0x58] sm:$0xf] %vm242_vm0, %v418_v52  ;;  %675 = vst [vmem:[#allocation2 + $0x5c] sm:$0x1] %v674_v54  ;;  %v427_v61 = vrot.slane %v423_v50, 4  ;;  %v431_v62 = vrot.slane %v429_v51, 7  ;;  %v677_v2 = vsel %vm2794_vm8, %v426_v57, %v676_v56 }
  0x45   : > { %v680_v3 = vld [vmem:[#allocation2 + $0x68] sm:$0x1]  ;;  %678 = vst [vmem:[#allocation2 + $0x60] sm:$0xf] %v677_v2  ;;  %v438_v6 = vshrl.u32 %v226_v58, 16  ;;  %v441_v7 = vshll.u32 %v226_v58, 16  ;;  %v2922_v48 = vsel %vm1146_vm6, %v1156_v59, %v1157_v60 }
  0x46   : > { %v434_v4 = vor.u32 %v432_v55, %v431_v62  ;;  %v436_v5 = vrot.slane %v431_v62, 4  ;;  %v446_v8 = vshrl.u32 %v227_v63, 16  ;;  %v2629_v9 = vld [vmem:[#allocation2 + $0x38] ss:$0 sps:$4 sm:$0x11]   ;;  %v973_v14 = vshll.u32 %v2913_v1, 16 }
  0x47   : > { %1279 = vrot.lane.b32.xlu0 %v945_v12, %s2678_s27  ;;  %v440_v13 = vrot.slane %v438_v6, 7  ;;  %v683_v17 = vld [vmem:[#allocation2 + $0x6c] sm:$0xf]  ;;  %v971_v18 = vshrl.u32 %v2913_v1, 16  ;;  %v978_v19 = vshll.u32 %v2629_v9, 16  ;;  %v449_v22 = vshll.u32 %v227_v63, 16 }
  0x48   : > { %1400 = vrot.lane.b32.xlu1 %v2886_v24, %s2679_s28  ;;  %v435_v11 = vsel %vm2787_vm7, %v427_v61, %v434_v4  ;;  %v681_v12 = vsel %vm2810_vm9, %v436_v5, %v680_v3  ;;  %v975_v20 = vrot.slane %v973_v14, 1  ;;  %v2640_v27 = vld [vmem:[%s3499_s1 + $0x10] ss:$0 sps:$4 sm:$0x33]   ;;  %v2944_v31 = vld [vmem:[#allocation2 + $0x3c] sm:$0xff]   ;;  %v1159_v36 = vrot.slane %v2913_v1, 1 }
  0x49   : > { %679 = vst.msk [vmem:[#allocation2 + $0x64] sm:$0xf] %vm242_vm0, %v435_v11  ;;  %682 = vst [vmem:[#allocation2 + $0x68] sm:$0x1] %v681_v12  ;;  %v443_v15 = vor.u32 %v441_v7, %v440_v13  ;;  %v444_v21 = vrot.slane %v440_v13, 4  ;;  %v980_v30 = vrot.slane %v978_v19, 1 }
  0x4a   : > { %v976_v29 = vor.u32 %v975_v20, %v971_v18  ;;  %v687_v33 = vld [vmem:[#allocation2 + $0x74] sm:$0x1]  ;;  %v228_v34 = vld [vmem:[%s2779_s20 + $0x48] sm:$0xf]  ;;  %v229_v35 = vld [vmem:[%s2779_s20 + $0x4c] sm:$0xf] }
  0x4b   : > { %1398 = vrot.lane.b32.xlu0 %v2874_v10, %s2679_s28  ;;  %v684_v25 = vsel %vm2794_vm8, %v443_v15, %v683_v17  ;;  %v1160_v37 = vrot.slane %v2629_v9, 1  ;;  %vm1789_vm10 = vcmask 1041408   ;;  %v2956_v38 = vld [vmem:[#allocation2 + $0x44] ss:$0 sps:$4 sm:$0x11]   ;;  %v455_v40 = vshrl.u32 %v228_v34, 16 }
  0x4c   : > { %1118 = vrot.lane.b32.xlu1 %v2874_v10, %s2673_s22  ;;  %v448_v10 = vrot.slane %v446_v8, 7  ;;  %685 = vst [vmem:[#allocation2 + $0x6c] sm:$0xf] %v684_v25  ;;  %2601 = vmatprep.subr.msk.bf16.mxu0 %vm1789_vm10, %v2640_v27  ;;  %v458_v41 = vshll.u32 %v228_v34, 16  ;;  %v2965_v42 = vsel %vm921_vm2, %v976_v29, %v980_v30  ;;  %v985_v44 = vshll.u32 %v2944_v31, 16  ;;  %v3008_v34 = vld [vmem:[#allocation2 + $0x48] sm:$0xff]  }
  0x4d   : > { %v463_v45 = vshrl.u32 %v229_v35, 16  ;;  %v466_v47 = vshll.u32 %v229_v35, 16  ;;  %v690_v49 = vld [vmem:[#allocation2 + $0x78] sm:$0xf]  ;;  %2602 = vmatprep.subr.msk.bf16.mxu1 %vm1789_vm10, %v2640_v27  ;;  %v457_v50 = vrot.slane %v455_v40, 7  ;;  %v1791_v51 = vsel %vm1789_vm10, %v2640_v27, 0 }
  0x4e   : > { %v451_v26 = vor.u32 %v449_v22, %v448_v10  ;;  %v230_v52 = vld [vmem:[%s2779_s20 + $0x50] sm:$0xf]  ;;  %v2974_v53 = vsel %vm1146_vm6, %v1159_v36, %v1160_v37  ;;  %2558 = vmatpush3.bf16.msra.mxu0 %v1791_v51  ;;  %v231_v55 = vld [vmem:[%s2779_s20 + $0x54] sm:$0xf]  ;;  %v983_v56 = vshrl.u32 %v2944_v31, 16  ;;  %v990_v57 = vshll.u32 %v2956_v38, 16  ;;  %2598 = vmatpush3.bf16.msra.mxu1 %v1791_v51 }
  0x4f   : > { %1435 = vrot.lane.b32.xlu0 %v2922_v48, %s2677_s26  ;;  %v465_v54 = vrot.slane %v463_v45, 7  ;;  %v460_v58 = vor.u32 %v458_v41, %v457_v50  ;;  %v461_v59 = vrot.slane %v457_v50, 4  ;;  %v694_v60 = vld [vmem:[#allocation2 + $0x80] sm:$0x1]  ;;  %v987_v61 = vrot.slane %v985_v44, 1 }
  0x50   : > { %1120 = vrot.lane.b32.xlu1 %v2886_v24, %s2673_s22  ;;  %v452_v32 = vsel %vm2787_vm7, %v444_v21, %v451_v26  ;;  %v472_v2 = vshrl.u32 %v230_v52, 16  ;;  %v475_v4 = vshll.u32 %v230_v52, 16  ;;  %v480_v5 = vshrl.u32 %v231_v55, 16  ;;  %v232_v6 = vld [vmem:[%s2779_s20 + $0x58] sm:$0xf] }
  0x51   : > { %686 = vst.msk [vmem:[#allocation2 + $0x70] sm:$0xf] %vm242_vm0, %v452_v32  ;;  %v468_v62 = vor.u32 %v466_v47, %v465_v54  ;;  %v470_v63 = vrot.slane %v465_v54, 4  ;;  %v691_v3 = vsel %vm2794_vm8, %v460_v58, %v690_v49  ;;  %v483_v8 = vshll.u32 %v231_v55, 16  ;;  %v697_v13 = vld [vmem:[#allocation2 + $0x84] sm:$0xf] }
  0x52   : > { %692 = vst [vmem:[#allocation2 + $0x78] sm:$0xf] %v691_v3  ;;  %v992_v9 = vrot.slane %v990_v57, 1  ;;  %v474_v12 = vrot.slane %v472_v2, 7  ;;  %v988_v14 = vor.u32 %v987_v61, %v983_v56  ;;  %v233_v15 = vld [vmem:[%s2779_s20 + $0x5c] sm:$0xf] }
  0x53   : > { %1199 = vrot.lane.b32.xlu0 %v2866_v0, %s2672_s21  ;;  %v453_v0 = vrot.slane %v448_v10, 4  ;;  %v469_v7 = vsel %vm2787_vm7, %v461_v59, %v468_v62  ;;  %v695_v11 = vsel %vm2810_vm9, %v470_v63, %v694_v60  ;;  %v489_v17 = vshrl.u32 %v232_v6, 16  ;;  %v701_v20 = vld [vmem:[#allocation2 + $0x8c] sm:$0x1]  ;;  %v234_v26 = vld [vmem:[%s2779_s20 + $0x60] sm:$0xf] }
  0x54   : > { %1201 = vrot.lane.b32.xlu1 %v2922_v48, %s2672_s21  ;;  %693 = vst.msk [vmem:[#allocation2 + $0x7c] sm:$0xf] %vm242_vm0, %v469_v7  ;;  %696 = vst [vmem:[#allocation2 + $0x80] sm:$0x1] %v695_v11  ;;  %v492_v10 = vshll.u32 %v232_v6, 16  ;;  %v477_v18 = vor.u32 %v475_v4, %v474_v12  ;;  %v478_v19 = vrot.slane %v474_v12, 4 }
  0x55   : > { %v688_v39 = vsel %vm2810_vm9, %v453_v0, %v687_v33  ;;  %v491_v25 = vrot.slane %v489_v17, 7  ;;  %v497_v29 = vshrl.u32 %v233_v15, 16  ;;  %v704_v30 = vld [vmem:[#allocation2 + $0x90] sm:$0xf]  ;;  %v235_v32 = vld [vmem:[%s2779_s20 + $0x64] sm:$0xf]  ;;  %v3006_v33 = vsel %vm921_vm2, %v988_v14, %v992_v9 }
  0x56   : > { %689 = vst [vmem:[#allocation2 + $0x74] sm:$0x1] %v688_v39  ;;  %v698_v27 = vsel %vm2794_vm8, %v477_v18, %v697_v13  ;;  %v500_v39 = vshll.u32 %v233_v15, 16  ;;  %v506_v40 = vshrl.u32 %v234_v26, 16  ;;  %v509_v44 = vshll.u32 %v234_v26, 16 }
  0x57   : > { %1236 = vrot.lane.b32.xlu0 %v2851_v43, %s2674_s23  ;;  %v2642_v43 = vld [vmem:[%s3499_s1 + $0x8] sm:$0xff]   ;;  %699 = vst [vmem:[#allocation2 + $0x84] sm:$0xf] %v698_v27  ;;  %v494_v35 = vor.u32 %v492_v10, %v491_v25  ;;  %v495_v36 = vrot.slane %v491_v25, 4  ;;  %v499_v37 = vrot.slane %v497_v29, 7  ;;  %v514_v45 = vshrl.u32 %v235_v32, 16 }
  0x58   : > { %1238 = vrot.lane.b32.xlu1 %v2913_v1, %s2674_s23  ;;  %2559 = vmatprep.subr.bf16.mxu0 %v2642_v43  ;;  %v1162_v47 = vrot.slane %v2944_v31, 1  ;;  %v1163_v49 = vrot.slane %v2956_v38, 1  ;;  %v508_v52 = vrot.slane %v506_v40, 7  ;;  %v517_v54 = vshll.u32 %v235_v32, 16  ;;  %v236_v55 = vld [vmem:[%s2779_s20 + $0x68] sm:$0xf] }
  0x59   : > { %2596 = vmatprep.subr.bf16.mxu1 %v2642_v43  ;;  %2560 = vmatpush3.bf16.msra.mxu0 %v2642_v43  ;;  %v705_v41 = vsel %vm2794_vm8, %v494_v35, %v704_v30  ;;  %v502_v50 = vor.u32 %v500_v39, %v499_v37  ;;  %v504_v51 = vrot.slane %v499_v37, 4  ;;  %v3024_v56 = vld [vmem:[#allocation2 + $0x50] ss:$0 sps:$4 sm:$0x11]   ;;  %v711_v59 = vld [vmem:[#allocation2 + $0x9c] sm:$0xf] }
  0x5a   : > { %2599 = vmatpush3.bf16.msra.mxu1 %v2642_v43  ;;  %v708_v43 = vld [vmem:[#allocation2 + $0x98] sm:$0x1]  ;;  %706 = vst [vmem:[#allocation2 + $0x90] sm:$0xf] %v705_v41  ;;  %v997_v38 = vshll.u32 %v3008_v34, 16  ;;  %v511_v60 = vor.u32 %v509_v44, %v508_v52  ;;  %v3038_v62 = vsel %vm1146_vm6, %v1162_v47, %v1163_v49  ;;  %v512_v63 = vrot.slane %v508_v52, 4 }
  0x5b   : > { %1283 = vrot.lane.b32.xlu0 %v2886_v24, %s2678_s27  ;;  %v2644_v24 = vld [vmem:[%s3499_s1] sm:$0xff]   ;;  %v503_v57 = vsel %vm2787_vm7, %v495_v36, %v502_v50  ;;  %v709_v58 = vsel %vm2810_vm9, %v504_v51, %v708_v43  ;;  %v237_v61 = vld [vmem:[%s2779_s20 + $0x6c] sm:$0xf]  ;;  %v523_v3 = vshrl.u32 %v236_v55, 16  ;;  %v526_v7 = vshll.u32 %v236_v55, 16  ;;  %v3061_v32 = vld [vmem:[#allocation2 + $0x54] sm:$0xff]  }
  0x5c   : > { %1285 = vrot.lane.b32.xlu1 %v2965_v42, %s2678_s27  ;;  %2561 = vmatprep.subr.bf16.mxu0 %v2644_v24  ;;  %707 = vst.msk [vmem:[#allocation2 + $0x94] sm:$0xf] %vm242_vm0, %v503_v57  ;;  %710 = vst [vmem:[#allocation2 + $0x98] sm:$0x1] %v709_v58  ;;  %v715_v2 = vld [vmem:[#allocation2 + $0xa4] sm:$0x1] }
  0x5d   : > { %2597 = vmatprep.subr.bf16.mxu1 %v2644_v24  ;;  %2562 = vmatpush3.bf16.msra.mxu0 %v2644_v24  ;;  %v531_v9 = vshrl.u32 %v237_v61, 16  ;;  %v995_v11 = vshrl.u32 %v3008_v34, 16  ;;  %v1002_v12 = vshll.u32 %v3024_v56, 16  ;;  %v999_v15 = vrot.slane %v997_v38, 1  ;;  %v722_v25 = vld [vmem:[#allocation2 + $0xb0] sm:$0x1] }
  0x5e   : > { %2600 = vmatpush3.bf16.msra.mxu1 %v2644_v24  ;;  %v516_v24 = vrot.slane %v514_v45, 7  ;;  %v239_v26 = vld [vmem:[%s2779_s20 + $0x74] sm:$0xf]  ;;  %v1165_v36 = vrot.slane %v3008_v34, 1  ;;  %v1166_v37 = vrot.slane %v3024_v56, 1  ;;  %v1009_v47 = vshll.u32 %v3061_v32, 16 }
  0x5f   : > { %1318 = vrot.lane.b32.xlu0 %v2922_v48, %s2676_s25  ;;  %v482_v48 = vrot.slane %v480_v5, 7  ;;  %v712_v5 = vsel %vm2794_vm8, %v511_v60, %v711_v59  ;;  %v533_v18 = vrot.slane %v531_v9, 7  ;;  %v1000_v29 = vor.u32 %v999_v15, %v995_v11  ;;  %v725_v43 = vld [vmem:[#allocation2 + $0xb4] sm:$0xf] }
  0x60   : > { %1320 = vrot.lane.b32.xlu1 %v2974_v53, %s2676_s25  ;;  %v519_v4 = vor.u32 %v517_v54, %v516_v24  ;;  %v521_v6 = vrot.slane %v516_v24, 4  ;;  %713 = vst [vmem:[#allocation2 + $0x9c] sm:$0xf] %v712_v5  ;;  %v1004_v30 = vrot.slane %v1002_v12, 1  ;;  %v548_v39 = vshrl.u32 %v239_v26, 16 }
  0x61   : > { %v485_v21 = vor.u32 %v483_v8, %v482_v48  ;;  %v487_v22 = vrot.slane %v482_v48, 4  ;;  %v525_v8 = vrot.slane %v523_v3, 7  ;;  %v718_v48 = vld [vmem:[#allocation2 + $0xa8] sm:$0xf]  ;;  %v551_v40 = vshll.u32 %v239_v26, 16 }
  0x62   : > { %v520_v13 = vsel %vm2787_vm7, %v512_v63, %v519_v4  ;;  %v716_v14 = vsel %vm2810_vm9, %v521_v6, %v715_v2  ;;  %v1005_v44 = vsel %vm921_vm2, %v1000_v29, %v1004_v30  ;;  %v2635_v45 = vld [vmem:[#allocation2 + $0x5c] ss:$0 sps:$4 sm:$0x11]   ;;  %v550_v50 = vrot.slane %v548_v39, 7 }
  0x63   : > { %1355 = vrot.lane.b32.xlu0 %v2913_v1, %s2675_s24  ;;  %v486_v1 = vsel %vm2787_vm7, %v478_v19, %v485_v21  ;;  %v702_v0 = vsel %vm2810_vm9, %v487_v22, %v701_v20  ;;  %714 = vst.msk [vmem:[#allocation2 + $0xa0] sm:$0xf] %vm242_vm0, %v520_v13  ;;  %717 = vst [vmem:[#allocation2 + $0xa4] sm:$0x1] %v716_v14  ;;  %v528_v17 = vor.u32 %v526_v7, %v525_v8  ;;  %v238_v19 = vld [vmem:[%s2779_s20 + $0x70] sm:$0xf] }
  0x64   : > { %1357 = vrot.lane.b32.xlu1 %v2944_v31, %s2675_s24  ;;  %700 = vst.msk [vmem:[#allocation2 + $0x88] sm:$0xf] %vm242_vm0, %v486_v1  ;;  %703 = vst [vmem:[#allocation2 + $0x8c] sm:$0x1] %v702_v0  ;;  %v529_v10 = vrot.slane %v525_v8, 4  ;;  %v538_v22 = vrot.slane %v533_v18, 4  ;;  %v553_v51 = vor.u32 %v551_v40, %v550_v50  ;;  %v1167_v57 = vsel %vm1146_vm6, %v1165_v36, %v1166_v37 }
  0x65   : > { %v719_v21 = vsel %vm2794_vm8, %v528_v17, %v718_v48  ;;  %v540_v27 = vshrl.u32 %v238_v19, 16  ;;  %v543_v35 = vshll.u32 %v238_v19, 16  ;;  %v729_v54 = vld [vmem:[#allocation2 + $0xbc] sm:$0x1]  ;;  %v1007_v55 = vshrl.u32 %v3061_v32, 16 }
  0x66   : > { %720 = vst [vmem:[#allocation2 + $0xa8] sm:$0xf] %v719_v21  ;;  %v555_v56 = vrot.slane %v550_v50, 4  ;;  %v1011_v58 = vrot.slane %v1009_v47, 1  ;;  %v1014_v59 = vshll.u32 %v2635_v45, 16  ;;  %v1168_v6 = vrot.slane %v3061_v32, 1 }
  0x67   : > { %1402 = vrot.lane.b32.xlu0 %v2965_v42, %s2679_s28  ;;  %v542_v0 = vrot.slane %v540_v27, 7  ;;  %v241_v63 = vld [vmem:[%s2779_s20 + $0x7c] sm:$0xf]  ;;  %v1169_v7 = vrot.slane %v2635_v45, 1  ;;  %v732_v14 = vld [vmem:[#allocation2 + $0xc0] sm:$0xf] }
  0x68   : > { %1404 = vrot.lane.b32.xlu1 %v3006_v33, %s2679_s28  ;;  %v730_v38 = vsel %vm2810_vm9, %v555_v56, %v729_v54  ;;  %v1012_v60 = vor.u32 %v1011_v58, %v1007_v55  ;;  %v1016_v24 = vrot.slane %v1014_v59, 1  ;;  %v565_v4 = vshrl.u32 %v241_v63, 16  ;;  %v2637_v19 = vld [vmem:[#allocation2 + $0x68] ss:$0 sps:$4 sm:$0x11]   ;;  %v3119_v27 = vld [vmem:[#allocation2 + $0x6c] sm:$0xff]  }
  0x69   : > { %v545_v41 = vor.u32 %v543_v35, %v542_v0  ;;  %v546_v49 = vrot.slane %v542_v0, 4  ;;  %731 = vst [vmem:[#allocation2 + $0xbc] sm:$0x1] %v730_v38  ;;  %v568_v9 = vshll.u32 %v241_v63, 16  ;;  %v1170_v17 = vsel %vm1146_vm6, %v1168_v6, %v1169_v7  ;;  %v2659_v63 = vld [vmem:[#allocation2] sm:$0xff]  }
  0x6a   : > { %v1017_v2 = vsel %vm921_vm2, %v1012_v60, %v1016_v24  ;;  %v567_v8 = vrot.slane %v565_v4, 7  ;;  %v1026_v16 = vshll.u32 %v2637_v19, 16  ;;  %v1172_v30 = vrot.slane %v2637_v19, 1 }
  0x6b   : > { %1437 = vrot.lane.b32.xlu0 %v2974_v53, %s2677_s26  ;;  %v726_v52 = vsel %vm2794_vm8, %v545_v41, %v725_v43  ;;  %v1031_v35 = vshrl.u32 %v3119_v27, 16  ;;  %vm1465_vm11 = vcmask 31744   ;;  %vm1498_vm12 = vcmask 64512  }
  0x6c   : > { %1122 = vrot.lane.b32.xlu1 %v2965_v42, %s2673_s22  ;;  %v534_v42 = vshll.u32 %v237_v61, 16  ;;  %727 = vst [vmem:[#allocation2 + $0xb4] sm:$0xf] %v726_v52  ;;  %v240_v61 = vld [vmem:[%s2779_s20 + $0x78] sm:$0xf]  ;;  %v570_v13 = vor.u32 %v568_v9, %v567_v8  ;;  %v572_v15 = vrot.slane %v567_v8, 4 }
  0x6d   : > { %v557_v3 = vshrl.u32 %v240_v61, 16  ;;  %v560_v5 = vshll.u32 %v240_v61, 16  ;;  %v1028_v26 = vrot.slane %v1026_v16, 1  ;;  %v3142_v52 = vld [vmem:[#allocation2 + $0x78] sm:$0xff]   ;;  %vm1531_vm13 = vcmask 97280  }
  0x6e   : > { %v536_v20 = vor.u32 %v534_v42, %v533_v18  ;;  %v3101_v42 = vld [vmem:[#allocation2 + $0x60] sm:$0xff]   ;;  %v736_v18 = vld [vmem:[#allocation2 + $0xc8] sm:$0x1]  ;;  %v1045_v58 = vshll.u32 %v3142_v52, 16  ;;  %v1043_v38 = vshrl.u32 %v3142_v52, 16  ;;  %vm1564_vm14 = vcmask 130048  }
  0x6f   : > { %1439 = vrot.lane.b32.xlu0 %v3038_v62, %s2677_s26  ;;  %v737_v21 = vsel %vm2810_vm9, %v572_v15, %v736_v18  ;;  %v1019_v23 = vshrl.u32 %v3101_v42, 16  ;;  %v1171_v29 = vrot.slane %v3101_v42, 1  ;;  %vm1597_vm15 = vcmask 162816  }
  0x70   : > { %1124 = vrot.lane.b32.xlu1 %v3006_v33, %s2673_s22  ;;  %v537_v1 = vsel %vm2787_vm7, %v529_v10, %v536_v20  ;;  %v1021_v20 = vshll.u32 %v3101_v42, 16  ;;  %738 = vst [vmem:[#allocation2 + $0xc8] sm:$0x1] %v737_v21  ;;  %v1047_v60 = vrot.slane %v1045_v58, 1  ;;  %vm1663_vm1 = vcmask 228352  }
  0x71   : > { %721 = vst.msk [vmem:[#allocation2 + $0xac] sm:$0xf] %vm242_vm0, %v537_v1  ;;  %v2639_v1 = vld [vmem:[#allocation2 + $0x74] ss:$0 sps:$4 sm:$0x11]   ;;  %v1173_v0 = vsel %vm1146_vm6, %v1171_v29, %v1172_v30  ;;  %vm1696_vm3 = vcmask 261120  }
  0x72   : > { %v1038_v37 = vshll.u32 %v2639_v1, 16  ;;  %v1175_v50 = vrot.slane %v2639_v1, 1  ;;  %v1048_v4 = vor.u32 %v1047_v60, %v1043_v38  ;;  %vm1756_vm4 = vcmask 293888  }
  0x73   : > { %1203 = vrot.lane.b32.xlu0 %v2974_v53, %s2672_s21  ;;  %v723_v53 = vsel %vm2810_vm9, %v538_v22, %v722_v25  ;;  %v1023_v22 = vrot.slane %v1021_v20, 1 }
  0x74   : > { %1205 = vrot.lane.b32.xlu1 %v3038_v62, %s2672_s21  ;;  %724 = vst [vmem:[#allocation2 + $0xb0] sm:$0x1] %v723_v53  ;;  %v1033_v53 = vshll.u32 %v3119_v27, 16  ;;  %v1040_v43 = vrot.slane %v1038_v37, 1 }
  0x75   : > { %v1024_v25 = vor.u32 %v1023_v22, %v1019_v23 }
  0x76   : > { %v1035_v36 = vrot.slane %v1033_v53, 1 }
  0x77   : > { %1240 = vrot.lane.b32.xlu0 %v2944_v31, %s2674_s23  ;;  %v1029_v46 = vsel %vm921_vm2, %v1024_v25, %v1028_v26 }
  0x78   : > { %1242 = vrot.lane.b32.xlu1 %v3008_v34, %s2674_s23  ;;  %v1036_v41 = vor.u32 %v1035_v36, %v1031_v35 }
  0x7a   : > { %v1041_v47 = vsel %vm921_vm2, %v1036_v41, %v1040_v43 }
  0x7b   : > { %1287 = vrot.lane.b32.xlu0 %v3006_v33, %s2678_s27  ;;  %v554_v33 = vsel %vm2787_vm7, %v546_v49, %v553_v51  ;;  %v1174_v49 = vrot.slane %v3119_v27, 1 }
  0x7c   : > { %1289 = vrot.lane.b32.xlu1 %v1005_v44, %s2678_s27  ;;  %728 = vst.msk [vmem:[#allocation2 + $0xb8] sm:$0xf] %vm242_vm0, %v554_v33 }
  0x7d   : > { %v1176_v55 = vsel %vm1146_vm6, %v1174_v49, %v1175_v50  ;;  %v3195_v50 = vld [vmem:[#allocation2 + $0x90] sm:$0xff]  }
  0x7f   : > { %1322 = vrot.lane.b32.xlu0 %v3038_v62, %s2676_s25  ;;  %v559_v62 = vrot.slane %v557_v3, 7 }
  0x80   : > { %1324 = vrot.lane.b32.xlu1 %v1167_v57, %s2676_s25 }
  0x81   : > { %v562_v11 = vor.u32 %v560_v5, %v559_v62  ;;  %v563_v12 = vrot.slane %v559_v62, 4  ;;  %v3154_v5 = vld [vmem:[#allocation2 + $0x84] sm:$0xff]  }
  0x82   : > { %v1055_v25 = vshrl.u32 %v3154_v5, 16 }
  0x83   : > { %1359 = vrot.lane.b32.xlu0 %v3008_v34, %s2675_s24  ;;  %v733_v48 = vsel %vm2794_vm8, %v562_v11, %v732_v14  ;;  %v571_v10 = vsel %vm2787_vm7, %v563_v12, %v570_v13  ;;  %v1177_v12 = vrot.slane %v3142_v52, 1 }
  0x84   : > { %1361 = vrot.lane.b32.xlu1 %v3061_v32, %s2675_s24  ;;  %734 = vst [vmem:[#allocation2 + $0xc0] sm:$0xf] %v733_v48  ;;  %735 = vst.msk [vmem:[#allocation2 + $0xc4] sm:$0xf] %vm242_vm0, %v571_v10  ;;  %vm1630_vm0 = vcmask 195584   ;;  %v1057_v10 = vshll.u32 %v3154_v5, 16 }
  0x86   : > { %v1059_v26 = vrot.slane %v1057_v10, 1 }
  0x87   : > { %1406 = vrot.lane.b32.xlu0 %v1005_v44, %s2679_s28 }
  0x88   : > { %1408 = vrot.lane.b32.xlu1 %v1017_v2, %s2679_s28  ;;  %v1060_v36 = vor.u32 %v1059_v26, %v1055_v25 }
  0x8b   : > { %1441 = vrot.lane.b32.xlu0 %v1167_v57, %s2677_s26 }
  0x8c   : > { %1126 = vrot.lane.b32.xlu1 %v1005_v44, %s2673_s22 }
  0x8f   : > { %1443 = vrot.lane.b32.xlu0 %v1170_v17, %s2677_s26 }
  0x90   : > { %1128 = vrot.lane.b32.xlu1 %v1017_v2, %s2673_s22 }
  0x93   : > { %1207 = vrot.lane.b32.xlu0 %v1167_v57, %s2672_s21  ;;  %v2643_v57 = vld [vmem:[#allocation2 + $0x80] ss:$0 sps:$4 sm:$0x11]  }
  0x94   : > { %1209 = vrot.lane.b32.xlu1 %v1170_v17, %s2672_s21  ;;  %v1050_v24 = vshll.u32 %v2643_v57, 16  ;;  %v1178_v13 = vrot.slane %v2643_v57, 1  ;;  %v1069_v57 = vshll.u32 %v3195_v50, 16 }
  0x96   : > { %v1052_v62 = vrot.slane %v1050_v24, 1  ;;  %v1179_v16 = vsel %vm1146_vm6, %v1177_v12, %v1178_v13  ;;  %v1071_v38 = vrot.slane %v1069_v57, 1 }
  0x97   : > { %1244 = vrot.lane.b32.xlu0 %v3061_v32, %s2674_s23 }
  0x98   : > { %1246 = vrot.lane.b32.xlu1 %v3101_v42, %s2674_s23  ;;  %v1053_v15 = vsel %vm921_vm2, %v1048_v4, %v1052_v62  ;;  %v2660_v62 = vld [vmem:[#allocation2 + $0x18] sm:$0xff]  }
  0x9b   : > { %1291 = vrot.lane.b32.xlu0 %v1017_v2, %s2678_s27 }
  0x9c   : > { %1293 = vrot.lane.b32.xlu1 %v1029_v46, %s2678_s27 }
  0x9d   : > { %v1196_v39 = vpop.permute.xlu1 %1195 }
  0x9f   : > { %1326 = vrot.lane.b32.xlu0 %v1170_v17, %s2676_s25  ;;  %v1115_v40 = vpop.permute.xlu0 %1114  ;;  %v2646_v17 = vld [vmem:[#allocation2 + $0x8c] ss:$0 sps:$4 sm:$0x11]  }
  0xa0   : > { %1328 = vrot.lane.b32.xlu1 %v1173_v0, %s2676_s25  ;;  %v1467_v2 = vsel %vm1465_vm11, %v2659_v63, %v1115_v40 }
  0xa1   : > { %v1500_v9 = vsel %vm1498_vm12, %v1467_v2, %v1196_v39 }
  0xa3   : > { %1363 = vrot.lane.b32.xlu0 %v3101_v42, %s2675_s24 }
  0xa4   : > { %1365 = vrot.lane.b32.xlu1 %v3119_v27, %s2675_s24  ;;  %v1235_v44 = vpop.permute.xlu1 %1234 }
  0xa5   : > { %v1233_v45 = vpop.permute.xlu0 %1232 }
  0xa7   : > { %1410 = vrot.lane.b32.xlu0 %v1029_v46, %s2679_s28 }
  0xa8   : > { %1412 = vrot.lane.b32.xlu1 %v1041_v47, %s2679_s28 }
  0xa9   : > { %v1352_v51 = vpop.permute.xlu0 %1351 }
  0xaa   : > { %v1354_v54 = vpop.permute.xlu1 %1353 }
  0xab   : > { %1445 = vrot.lane.b32.xlu0 %v1173_v0, %s2677_s26 }
  0xac   : > { %1130 = vrot.lane.b32.xlu1 %v1029_v46, %s2673_s22  ;;  %v1062_v46 = vshll.u32 %v2646_v17, 16 }
  0xad   : > { %v1315_v56 = vpop.permute.xlu0 %1314 }
  0xae   : > { %v1198_v59 = vpop.permute.xlu1 %1197  ;;  %v1064_v37 = vrot.slane %v1062_v46, 1 }
  0xaf   : > { %1447 = vrot.lane.b32.xlu0 %v1176_v55, %s2677_s26 }
  0xb0   : > { %1132 = vrot.lane.b32.xlu1 %v1041_v47, %s2673_s22  ;;  %v1065_v43 = vsel %vm921_vm2, %v1060_v36, %v1064_v37 }
  0xb1   : > { %v1434_v33 = vpop.permute.xlu0 %1433 }
  0xb2   : > { %v1317_v61 = vpop.permute.xlu1 %1316 }
  0xb3   : > { %1211 = vrot.lane.b32.xlu0 %v1173_v0, %s2672_s21 }
  0xb4   : > { %1213 = vrot.lane.b32.xlu1 %v1176_v55, %s2672_s21 }
  0xb5   : > { %v1117_v3 = vpop.permute.xlu0 %1116 }
  0xb6   : > { %v1282_v6 = vpop.permute.xlu1 %1281  ;;  %v1469_v7 = vsel %vm1465_vm11, %v2837_v28, %v1117_v3  ;;  %v1533_v28 = vsel %vm1531_vm13, %v1500_v9, %v1233_v45  ;;  %v1180_v45 = vrot.slane %v3154_v5, 1  ;;  %v3206_v3 = vld [vmem:[#allocation2 + $0x9c] sm:$0xff]  }
  0xb7   : > { %v1502_v8 = vsel %vm1498_vm12, %v1469_v7, %v1198_v59  ;;  %1248 = vrot.lane.b32.xlu0 %v3119_v27, %s2674_s23 }
  0xb8   : > { %v1535_v11 = vsel %vm1531_vm13, %v1502_v8, %v1235_v44  ;;  %1250 = vrot.lane.b32.xlu1 %v3142_v52, %s2674_s23  ;;  %v1183_v8 = vrot.slane %v3195_v50, 1 }
  0xb9   : > { %v1568_v14 = vsel %vm1564_vm14, %v1535_v11, %v1282_v6  ;;  %v1280_v48 = vpop.permute.xlu0 %1279 }
  0xba   : > { %v1401_v18 = vpop.permute.xlu1 %1400  ;;  %v1566_v19 = vsel %vm1564_vm14, %v1533_v28, %v1280_v48  ;;  %v1601_v20 = vsel %vm1597_vm15, %v1568_v14, %v1317_v61  ;;  %v2650_v28 = vld [vmem:[#allocation2 + $0xa4] ss:$0 sps:$4 sm:$0x11]   ;;  %v1081_v14 = vshll.u32 %v3206_v3, 16 }
  0xbb   : > { %v1599_v21 = vsel %vm1597_vm15, %v1566_v19, %v1315_v56  ;;  %1295 = vrot.lane.b32.xlu0 %v1041_v47, %s2678_s27  ;;  %v1634_v29 = vsel %vm1630_vm0, %v1601_v20, %v1354_v54  ;;  %v1181_v47 = vrot.slane %v2646_v17, 1  ;;  %v2648_v56 = vld [vmem:[#allocation2 + $0x98] ss:$0 sps:$4 sm:$0x11]   ;;  %v2661_v17 = vld [vmem:[#allocation2 + $0x24] sm:$0xff]   ;;  %v1086_v46 = vshll.u32 %v2650_v28, 16 }
  0xbc   : > { %1297 = vrot.lane.b32.xlu1 %v1053_v15, %s2678_s27  ;;  %v1632_v23 = vsel %vm1630_vm0, %v1599_v21, %v1352_v51  ;;  %v1667_v0 = vsel %vm1663_vm1, %v1634_v29, %v1401_v18  ;;  %v1074_v60 = vshll.u32 %v2648_v56, 16  ;;  %v1184_v9 = vrot.slane %v2648_v56, 1 }
  0xbd   : > { %v1399_v22 = vpop.permute.xlu0 %1398  ;;  %v1182_v54 = vsel %vm1146_vm6, %v1180_v45, %v1181_v47  ;;  %v1083_v26 = vrot.slane %v1081_v14, 1  ;;  %v1186_v47 = vrot.slane %v3206_v3, 1 }
  0xbe   : > { %v1119_v30 = vpop.permute.xlu1 %1118  ;;  %v1665_v1 = vsel %vm1663_vm1, %v1632_v23, %v1399_v22  ;;  %v1076_v2 = vrot.slane %v1074_v60, 1  ;;  %v1185_v21 = vsel %vm1146_vm6, %v1183_v8, %v1184_v9  ;;  %v1079_v23 = vshrl.u32 %v3206_v3, 16  ;;  %v2662_v8 = vld [vmem:[#allocation2 + $0x30] sm:$0xff]  }
  0xbf   : > { %1330 = vrot.lane.b32.xlu0 %v1176_v55, %s2676_s25  ;;  %v1698_v53 = vsel %vm1696_vm3, %v1665_v1, %v1434_v33  ;;  %v1067_v33 = vshrl.u32 %v3195_v50, 16  ;;  %v1471_v6 = vsel %vm1465_vm11, %v2660_v62, %v1119_v30 }
  0xc0   : > { %1332 = vrot.lane.b32.xlu1 %v1179_v16, %s2676_s25  ;;  %2563 = vmatprep.mubr.msk.bf16.mxu0 %vm1756_vm4, %v1698_v53  ;;  %v1084_v37 = vor.u32 %v1083_v26, %v1079_v23 }
  0xc1   : > { %v1436_v35 = vpop.permute.xlu0 %1435  ;;  %v1072_v63 = vor.u32 %v1071_v38, %v1067_v33 }
  0xc2   : > { %v1121_v39 = vpop.permute.xlu1 %1120  ;;  %v1700_v40 = vsel %vm1696_vm3, %v1667_v0, %v1436_v35 }
  0xc3   : > { %1367 = vrot.lane.b32.xlu0 %v3142_v52, %s2675_s24  ;;  %2564 = vmatmul.mubr.msk.bf16.vlgmr.msra.gmra.mxu0 %vm1756_vm4, %v1700_v40  ;;  %v1077_v13 = vsel %vm921_vm2, %v1072_v63, %v1076_v2  ;;  %v1473_v10 = vsel %vm1465_vm11, %v2661_v17, %v1121_v39  ;;  %v1088_v39 = vrot.slane %v1086_v46, 1 }
  0xc4   : > { %1369 = vrot.lane.b32.xlu1 %v3154_v5, %s2675_s24 }
  0xc5   : > { %v1200_v41 = vpop.permute.xlu0 %1199 }
  0xc6   : > { %v1202_v44 = vpop.permute.xlu1 %1201  ;;  %v1504_v7 = vsel %vm1498_vm12, %v1471_v6, %v1200_v41  ;;  %v3258_v6 = vld [vmem:[#allocation2 + $0xb4] sm:$0xff]  }
  0xc7   : > { %1414 = vrot.lane.b32.xlu0 %v1053_v15, %s2679_s28  ;;  %v1506_v19 = vsel %vm1498_vm12, %v1473_v10, %v1202_v44  ;;  %v1089_v44 = vsel %vm921_vm2, %v1084_v37, %v1088_v39  ;;  %v1105_v17 = vshll.u32 %v3258_v6, 16 }
  0xc8   : > { %1416 = vrot.lane.b32.xlu1 %v1065_v43, %s2679_s28 }
  0xc9   : > { %v1237_v49 = vpop.permute.xlu0 %1236 }
  0xca   : > { %v1239_v51 = vpop.permute.xlu1 %1238  ;;  %v1537_v11 = vsel %vm1531_vm13, %v1504_v7, %v1237_v49  ;;  %v1187_v49 = vrot.slane %v2650_v28, 1 }
  0xcb   : > { %1449 = vrot.lane.b32.xlu0 %v1179_v16, %s2677_s26  ;;  %v1539_v22 = vsel %vm1531_vm13, %v1506_v19, %v1239_v51 }
  0xcc   : > { %1134 = vrot.lane.b32.xlu1 %v1053_v15, %s2673_s22  ;;  %v1188_v56 = vsel %vm1146_vm6, %v1186_v47, %v1187_v49  ;;  %v1192_v49 = vrot.slane %v3258_v6, 1 }
  0xcd   : > { %v1284_v55 = vpop.permute.xlu0 %1283 }
  0xce   : > { %v1286_v58 = vpop.permute.xlu1 %1285  ;;  %v1570_v48 = vsel %vm1564_vm14, %v1537_v11, %v1284_v55 }
  0xcf   : > { %1451 = vrot.lane.b32.xlu0 %v1182_v54, %s2677_s26  ;;  %v1572_v29 = vsel %vm1564_vm14, %v1539_v22, %v1286_v58  ;;  %v2652_v58 = vld [vmem:[#allocation2 + $0xb0] ss:$0 sps:$4 sm:$0x11]  }
  0xd0   : > { %1136 = vrot.lane.b32.xlu1 %v1065_v43, %s2673_s22 }
  0xd1   : > { %v1319_v59 = vpop.permute.xlu0 %1318 }
  0xd2   : > { %v1321_v24 = vpop.permute.xlu1 %1320  ;;  %v1603_v18 = vsel %vm1597_vm15, %v1570_v48, %v1319_v59 }
  0xd3   : > { %1215 = vrot.lane.b32.xlu0 %v1179_v16, %s2672_s21  ;;  %v1605_v53 = vsel %vm1597_vm15, %v1572_v29, %v1321_v24 }
  0xd4   : > { %1217 = vrot.lane.b32.xlu1 %v1182_v54, %s2672_s21 }
  0xd5   : > { %v1356_v61 = vpop.permute.xlu0 %1355 }
  0xd6   : > { %v1358_v4 = vpop.permute.xlu1 %1357  ;;  %v1636_v20 = vsel %vm1630_vm0, %v1603_v18, %v1356_v61  ;;  %v1098_v61 = vshll.u32 %v2652_v58, 16 }
  0xd7   : > { %1252 = vrot.lane.b32.xlu0 %v3154_v5, %s2674_s23  ;;  %v1638_v0 = vsel %vm1630_vm0, %v1605_v53, %v1358_v4 }
  0xd8   : > { %1254 = vrot.lane.b32.xlu1 %v3195_v50, %s2674_s23  ;;  %v1100_v62 = vrot.slane %v1098_v61, 1 }
  0xd9   : > { %v1403_v12 = vpop.permute.xlu0 %1402 }
  0xda   : > { %v1405_v15 = vpop.permute.xlu1 %1404  ;;  %v1669_v16 = vsel %vm1663_vm1, %v1636_v20, %v1403_v12 }
  0xdb   : > { %1299 = vrot.lane.b32.xlu0 %v1065_v43, %s2678_s27  ;;  %v1671_v35 = vsel %vm1663_vm1, %v1638_v0, %v1405_v15  ;;  %v2654_v15 = vld [vmem:[#allocation2 + $0xbc] ss:$0 sps:$4 sm:$0x11]  }
  0xdc   : > { %1301 = vrot.lane.b32.xlu1 %v1077_v13, %s2678_s27  ;;  %v1110_v29 = vshll.u32 %v2654_v15, 16 }
  0xdd   : > { %v1438_v25 = vpop.permute.xlu0 %1437 }
  0xde   : > { %v1123_v30 = vpop.permute.xlu1 %1122  ;;  %v1702_v1 = vsel %vm1696_vm3, %v1669_v16, %v1438_v25  ;;  %v1103_v16 = vshrl.u32 %v3258_v6, 16 }
  0xdf   : > { %1334 = vrot.lane.b32.xlu0 %v1182_v54, %s2676_s25  ;;  %2567 = vmatprep.mubr.msk.bf16.mxu0 %vm1756_vm4, %v1702_v1  ;;  %v3247_v54 = vld [vmem:[#allocation2 + $0xa8] sm:$0xff]   ;;  %v1475_v9 = vsel %vm1465_vm11, %v2662_v8, %v1123_v30 }
  0xe0   : > { %1336 = vrot.lane.b32.xlu1 %v1185_v21, %s2676_s25  ;;  %v1093_v59 = vshll.u32 %v3247_v54, 16  ;;  %v1091_v60 = vshrl.u32 %v3247_v54, 16  ;;  %v1189_v12 = vrot.slane %v3247_v54, 1 }
  0xe1   : > { %v1440_v36 = vpop.permute.xlu0 %1439 }
  0xe2   : > { %v1125_v40 = vpop.permute.xlu1 %1124  ;;  %v1704_v41 = vsel %vm1696_vm3, %v1671_v35, %v1440_v36  ;;  %v1095_v24 = vrot.slane %v1093_v59, 1 }
  0xe3   : > { %1371 = vrot.lane.b32.xlu0 %v3195_v50, %s2675_s24  ;;  %2568 = vmatmul.mubr.msk.bf16.gmra.mxu0 %vm1756_vm4, %v1704_v41  ;;  %v1477_v19 = vsel %vm1465_vm11, %v2944_v31, %v1125_v40  ;;  %v1107_v31 = vrot.slane %v1105_v17, 1  ;;  %v1112_v40 = vrot.slane %v1110_v29, 1 }
  0xe4   : > { %1373 = vrot.lane.b32.xlu1 %v3206_v3, %s2675_s24  ;;  %v1096_v4 = vor.u32 %v1095_v24, %v1091_v60 }
  0xe5   : > { %v1204_v43 = vpop.permute.xlu0 %1203  ;;  %v1108_v39 = vor.u32 %v1107_v31, %v1103_v16 }
  0xe6   : > { %v1206_v45 = vpop.permute.xlu1 %1205  ;;  %v1508_v11 = vsel %vm1498_vm12, %v1475_v9, %v1204_v43  ;;  %v1101_v48 = vsel %vm921_vm2, %v1096_v4, %v1100_v62  ;;  %v2657_v9 = vld [vmem:[#allocation2 + $0xcc] sm:$0xff]  }
  0xe7   : > { %1418 = vrot.lane.b32.xlu0 %v1077_v13, %s2679_s28 }
  0xe8   : > { %1420 = vrot.lane.b32.xlu1 %v1089_v44, %s2679_s28 }
  0xe9   : > { %v1241_v51 = vpop.permute.xlu0 %1240 }
  0xea   : > { %v1243_v55 = vpop.permute.xlu1 %1242  ;;  %v1541_v28 = vsel %vm1531_vm13, %v1508_v11, %v1241_v51  ;;  %v1193_v51 = vrot.slane %v2654_v15, 1 }
  0xeb   : > { %1453 = vrot.lane.b32.xlu0 %v1185_v21, %s2677_s26 }
  0xec   : > { %1138 = vrot.lane.b32.xlu1 %v1077_v13, %s2673_s22  ;;  %v1190_v13 = vrot.slane %v2652_v58, 1  ;;  %v1194_v58 = vsel %vm1146_vm6, %v1192_v49, %v1193_v51 }
  0xed   : > { %v1288_v57 = vpop.permute.xlu0 %1287 }
  0xee   : > { %v1290_v33 = vpop.permute.xlu1 %1289  ;;  %v1574_v10 = vsel %vm1564_vm14, %v1541_v28, %v1288_v57  ;;  %v1191_v22 = vsel %vm1146_vm6, %v1189_v12, %v1190_v13 }
  0xef   : > { %1455 = vrot.lane.b32.xlu0 %v1188_v56, %s2677_s26 }
  0xf0   : > { %1140 = vrot.lane.b32.xlu1 %v1089_v44, %s2673_s22 }
  0xf1   : > { %v1323_v38 = vpop.permute.xlu0 %1322 }
  0xf2   : > { %v1325_v63 = vpop.permute.xlu1 %1324  ;;  %v1607_v20 = vsel %vm1597_vm15, %v1574_v10, %v1323_v38  ;;  %v2658_v10 = vld [vmem:[#allocation2 + $0xd4] ss:$0 sps:$4 sm:$0x11]  }
  0xf3   : > { %1219 = vrot.lane.b32.xlu0 %v1185_v21, %s2672_s21  ;;  %v1510_v21 = vsel %vm1498_vm12, %v1477_v19, %v1206_v45  ;;  %v1113_v45 = vsel %vm921_vm2, %v1108_v39, %v1112_v40  ;;  %v1431_v49 = vrot.slane %v2658_v10, 1 }
  0xf4   : > { %1221 = vrot.lane.b32.xlu1 %v1188_v56, %s2672_s21  ;;  %v1543_v25 = vsel %vm1531_vm13, %v1510_v21, %v1243_v55 }
  0xf5   : > { %v1360_v2 = vpop.permute.xlu0 %1359  ;;  %v1576_v30 = vsel %vm1564_vm14, %v1543_v25, %v1290_v33  ;;  %v2656_v33 = vld [vmem:[#allocation2 + $0xc8] ss:$0 sps:$4 sm:$0x11]   ;;  %v1387_v25 = vshrl.u32 %v2657_v9, 16 }
  0xf6   : > { %v1362_v7 = vpop.permute.xlu1 %1361  ;;  %v1640_v23 = vsel %vm1630_vm0, %v1607_v20, %v1360_v2  ;;  %v1609_v0 = vsel %vm1597_vm15, %v1576_v30, %v1325_v63  ;;  %v1275_v2 = vshll.u32 %v2656_v33, 16 }
  0xf7   : > { %1256 = vrot.lane.b32.xlu0 %v3206_v3, %s2674_s23  ;;  %v1642_v35 = vsel %vm1630_vm0, %v1609_v0, %v1362_v7 }
  0xf8   : > { %1258 = vrot.lane.b32.xlu1 %v3247_v54, %s2674_s23  ;;  %v1277_v8 = vrot.slane %v1275_v2, 1 }
  0xf9   : > { %v1407_v14 = vpop.permute.xlu0 %1406 }
  0xfa   : > { %v1409_v18 = vpop.permute.xlu1 %1408  ;;  %v1673_v26 = vsel %vm1663_vm1, %v1640_v23, %v1407_v14  ;;  %v1312_v14 = vrot.slane %v2656_v33, 1 }
  0xfb   : > { %1303 = vrot.lane.b32.xlu0 %v1089_v44, %s2678_s27  ;;  %v1675_v36 = vsel %vm1663_vm1, %v1642_v35, %v1409_v18  ;;  %v1389_v18 = vshll.u32 %v2657_v9, 16 }
  0xfc   : > { %1305 = vrot.lane.b32.xlu1 %v1101_v48, %s2678_s27 }
  0xfd   : > { %v1442_v46 = vpop.permute.xlu0 %1441  ;;  %v1391_v29 = vrot.slane %v1389_v18, 1 }
  0xfe   : > { %v1127_v1 = vpop.permute.xlu1 %1126  ;;  %v1706_v53 = vsel %vm1696_vm3, %v1673_v26, %v1442_v46 }
  0xff   : > { %1338 = vrot.lane.b32.xlu0 %v1188_v56, %s2676_s25  ;;  %2571 = vmatprep.mubr.msk.bf16.mxu0 %vm1756_vm4, %v1706_v53  ;;  %v3300_v56 = vld [vmem:[#allocation2 + $0xc0] sm:$0xff]   ;;  %v1479_v12 = vsel %vm1465_vm11, %v3008_v34, %v1127_v1  ;;  %v1392_v39 = vor.u32 %v1391_v29, %v1387_v25 }
 0x100   : > { %1340 = vrot.lane.b32.xlu1 %v1191_v22, %s2676_s25  ;;  %v1270_v38 = vshll.u32 %v3300_v56, 16  ;;  %v1268_v61 = vshrl.u32 %v3300_v56, 16  ;;  %v1311_v28 = vrot.slane %v3300_v56, 1 }
 0x101   : > { %v1444_v37 = vpop.permute.xlu0 %1443 }
 0x102   : > { %v1129_v41 = vpop.permute.xlu1 %1128  ;;  %v1708_v43 = vsel %vm1696_vm3, %v1675_v36, %v1444_v37  ;;  %v1272_v63 = vrot.slane %v1270_v38, 1  ;;  %v1313_v16 = vsel %vm1146_vm6, %v1311_v28, %v1312_v14 }
 0x103   : > { %1375 = vrot.lane.b32.xlu0 %v3247_v54, %s2675_s24  ;;  %2572 = vmatmul.mubr.msk.bf16.gmra.mxu0 %vm1756_vm4, %v1708_v43  ;;  %v1481_v20 = vsel %vm1465_vm11, %v3061_v32, %v1129_v41  ;;  %v1394_v32 = vshll.u32 %v2658_v10, 16 }
 0x104   : > { %1377 = vrot.lane.b32.xlu1 %v3258_v6, %s2675_s24  ;;  %v1273_v7 = vor.u32 %v1272_v63, %v1268_v61 }
 0x105   : > { %v1208_v44 = vpop.permute.xlu0 %1207  ;;  %v1396_v40 = vrot.slane %v1394_v32, 1 }
 0x106   : > { %v1210_v47 = vpop.permute.xlu1 %1209  ;;  %v1512_v13 = vsel %vm1498_vm12, %v1479_v12, %v1208_v44  ;;  %v1278_v17 = vsel %vm921_vm2, %v1273_v7, %v1277_v8 }
 0x107   : > { %1422 = vrot.lane.b32.xlu0 %v1101_v48, %s2679_s28  ;;  %v1514_v23 = vsel %vm1498_vm12, %v1481_v20, %v1210_v47  ;;  %v1430_v47 = vrot.slane %v2657_v9, 1 }
 0x108   : > { %1424 = vrot.lane.b32.xlu1 %v1113_v45, %s2679_s28 }
 0x109   : > { %v1245_v55 = vpop.permute.xlu0 %1244 }
 0x10a   : > { %v1247_v57 = vpop.permute.xlu1 %1246 }
 0x10b   : > { %1457 = vrot.lane.b32.xlu0 %v1191_v22, %s2677_s26  ;;  %v1547_v26 = vsel %vm1531_vm13, %v1514_v23, %v1247_v57  ;;  %v1432_v57 = vsel %vm1146_vm6, %v1430_v47, %v1431_v49 }
 0x10c   : > { %1142 = vrot.lane.b32.xlu1 %v1101_v48, %s2673_s22  ;;  %v1545_v48 = vsel %vm1531_vm13, %v1512_v13, %v1245_v55 }
 0x10d   : > { %v1292_v59 = vpop.permute.xlu0 %1291 }
 0x10e   : > { %v1294_v60 = vpop.permute.xlu1 %1293  ;;  %v1578_v34 = vsel %vm1564_vm14, %v1545_v48, %v1292_v59 }
 0x10f   : > { %1459 = vrot.lane.b32.xlu0 %v1194_v58, %s2677_s26  ;;  %v1580_v30 = vsel %vm1564_vm14, %v1547_v26, %v1294_v60 }
 0x110   : > { %1144 = vrot.lane.b32.xlu1 %v1113_v45, %s2673_s22 }
 0x111   : > { %v1327_v24 = vpop.permute.xlu0 %1326 }
 0x112   : > { %v1329_v4 = vpop.permute.xlu1 %1328  ;;  %v1611_v21 = vsel %vm1597_vm15, %v1578_v34, %v1327_v24 }
 0x113   : > { %1223 = vrot.lane.b32.xlu0 %v1191_v22, %s2672_s21  ;;  %v1613_v0 = vsel %vm1597_vm15, %v1580_v30, %v1329_v4 }
 0x114   : > { %1225 = vrot.lane.b32.xlu1 %v1194_v58, %s2672_s21 }
 0x115   : > { %v1364_v62 = vpop.permute.xlu0 %1363 }
 0x116   : > { %v1366_v11 = vpop.permute.xlu1 %1365  ;;  %v1644_v22 = vsel %vm1630_vm0, %v1611_v21, %v1364_v62 }
 0x117   : > { %1260 = vrot.lane.b32.xlu0 %v3258_v6, %s2674_s23  ;;  %v1646_v35 = vsel %vm1630_vm0, %v1613_v0, %v1366_v11 }
 0x118   : > { %1262 = vrot.lane.b32.xlu1 %v3300_v56, %s2674_s23 }
 0x119   : > { %v1411_v15 = vpop.permute.xlu0 %1410 }
 0x11a   : > { %v1413_v19 = vpop.permute.xlu1 %1412  ;;  %v1677_v46 = vsel %vm1663_vm1, %v1644_v22, %v1411_v15 }
 0x11b   : > { %1307 = vrot.lane.b32.xlu0 %v1113_v45, %s2678_s27  ;;  %v1679_v36 = vsel %vm1663_vm1, %v1646_v35, %v1413_v19  ;;  %v1397_v45 = vsel %vm921_vm2, %v1392_v39, %v1396_v40  ;;  %vm2220_vm2 = vcmask 1040384  }
 0x11c   : > { %1309 = vrot.lane.b32.xlu1 %v1278_v17, %s2678_s27 }
 0x11d   : > { %v1446_v31 = vpop.permute.xlu0 %1445 }
 0x11e   : > { %v1131_v1 = vpop.permute.xlu1 %1130  ;;  %v1710_v53 = vsel %vm1696_vm3, %v1677_v46, %v1446_v31 }
 0x11f   : > { %1342 = vrot.lane.b32.xlu0 %v1194_v58, %s2676_s25  ;;  %2575 = vmatprep.mubr.msk.bf16.mxu0 %vm1756_vm4, %v1710_v53  ;;  %v1483_v61 = vsel %vm1465_vm11, %v3101_v42, %v1131_v1 }
 0x120   : > { %1344 = vrot.lane.b32.xlu1 %v1313_v16, %s2676_s25 }
 0x121   : > { %v1448_v37 = vpop.permute.xlu0 %1447 }
 0x122   : > { %v1133_v41 = vpop.permute.xlu1 %1132  ;;  %v1712_v43 = vsel %vm1696_vm3, %v1679_v36, %v1448_v37 }
 0x123   : > { %1379 = vrot.lane.b32.xlu0 %v3300_v56, %s2675_s24  ;;  %2576 = vmatmul.mubr.msk.bf16.gmra.mxu0 %vm1756_vm4, %v1712_v43  ;;  %v1485_v8 = vsel %vm1465_vm11, %v3119_v27, %v1133_v41 }
 0x124   : > { %1381 = vrot.lane.b32.xlu1 %v2657_v9, %s2675_s24 }
 0x125   : > { %v1212_v44 = vpop.permute.xlu0 %1211 }
 0x126   : > { %v1214_v51 = vpop.permute.xlu1 %1213  ;;  %v1516_v63 = vsel %vm1498_vm12, %v1483_v61, %v1212_v44 }
 0x127   : > { %1426 = vrot.lane.b32.xlu0 %v1278_v17, %s2679_s28  ;;  %v1518_v11 = vsel %vm1498_vm12, %v1485_v8, %v1214_v51 }
 0x128   : > { %1428 = vrot.lane.b32.xlu1 %v1397_v45, %s2679_s28 }
 0x129   : > { %v1249_v55 = vpop.permute.xlu0 %1248 }
 0x12a   : > { %v1251_v58 = vpop.permute.xlu1 %1250  ;;  %v1549_v2 = vsel %vm1531_vm13, %v1516_v63, %v1249_v55 }
 0x12b   : > { %1461 = vrot.lane.b32.xlu0 %v1313_v16, %s2677_s26  ;;  %v1551_v13 = vsel %vm1531_vm13, %v1518_v11, %v1251_v58 }
 0x12c   : > { %1463 = vrot.lane.b32.xlu1 %v1432_v57, %s2677_s26 }
 0x12d   : > { %v1296_v56 = vpop.permute.xlu0 %1295 }
 0x12e   : > { %v1298_v59 = vpop.permute.xlu1 %1297  ;;  %v1582_v62 = vsel %vm1564_vm14, %v1549_v2, %v1296_v56 }
 0x12f   : > { %v1584_v14 = vsel %vm1564_vm14, %v1551_v13, %v1298_v59 }
 0x131   : > { %v1331_v33 = vpop.permute.xlu0 %1330 }
 0x132   : > { %v1333_v38 = vpop.permute.xlu1 %1332  ;;  %v1615_v9 = vsel %vm1597_vm15, %v1582_v62, %v1331_v33 }
 0x133   : > { %v1617_v17 = vsel %vm1597_vm15, %v1584_v14, %v1333_v38 }
 0x135   : > { %v1368_v60 = vpop.permute.xlu0 %1367 }
 0x136   : > { %v1370_v24 = vpop.permute.xlu1 %1369  ;;  %v1648_v12 = vsel %vm1630_vm0, %v1615_v9, %v1368_v60 }
 0x137   : > { %v1650_v27 = vsel %vm1630_vm0, %v1617_v17, %v1370_v24 }
 0x139   : > { %v1415_v4 = vpop.permute.xlu0 %1414 }
 0x13a   : > { %v1417_v7 = vpop.permute.xlu1 %1416  ;;  %v1681_v42 = vsel %vm1663_vm1, %v1648_v12, %v1415_v4 }
 0x13b   : > { %v1683_v10 = vsel %vm1663_vm1, %v1650_v27, %v1417_v7 }
 0x13d   : > { %v1450_v28 = vpop.permute.xlu0 %1449 }
 0x13e   : > { %v1135_v48 = vpop.permute.xlu1 %1134  ;;  %v1714_v15 = vsel %vm1696_vm3, %v1681_v42, %v1450_v28 }
 0x13f   : > { %2579 = vmatprep.mubr.msk.bf16.mxu1 %vm1756_vm4, %v1714_v15  ;;  %v1487_v32 = vsel %vm1465_vm11, %v3142_v52, %v1135_v48 }
 0x141   : > { %v1452_v18 = vpop.permute.xlu0 %1451 }
 0x142   : > { %v1137_v34 = vpop.permute.xlu1 %1136  ;;  %v1716_v19 = vsel %vm1696_vm3, %v1683_v10, %v1452_v18 }
 0x143   : > { %2580 = vmatmul.mubr.msk.bf16.vlgmr.msra.gmra.mxu1 %vm1756_vm4, %v1716_v19  ;;  %v1489_v36 = vsel %vm1465_vm11, %v3154_v5, %v1137_v34 }
 0x145   : > { %v1216_v20 = vpop.permute.xlu0 %1215 }
 0x146   : > { %v1218_v21 = vpop.permute.xlu1 %1217  ;;  %v1520_v30 = vsel %vm1498_vm12, %v1487_v32, %v1216_v20 }
 0x147   : > { %v1522_v39 = vsel %vm1498_vm12, %v1489_v36, %v1218_v21 }
 0x149   : > { %v1253_v23 = vpop.permute.xlu0 %1252 }
 0x14a   : > { %v1255_v22 = vpop.permute.xlu1 %1254  ;;  %v1553_v1 = vsel %vm1531_vm13, %v1520_v30, %v1253_v23 }
 0x14b   : > { %v1555_v41 = vsel %vm1531_vm13, %v1522_v39, %v1255_v22  ;;  %v3414_v22 = vld [vmem:[%s3500_s2] ss:$0 sm:$0xff] }
 0x14d   : > { %v1300_v16 = vpop.permute.xlu0 %1299 }
 0x14e   : > { %v1302_v25 = vpop.permute.xlu1 %1301  ;;  %v1586_v0 = vsel %vm1564_vm14, %v1553_v1, %v1300_v16 }
 0x14f   : > { %v1588_v44 = vsel %vm1564_vm14, %v1555_v41, %v1302_v25 }
 0x151   : > { %v1335_v26 = vpop.permute.xlu0 %1334 }
 0x152   : > { %v1337_v46 = vpop.permute.xlu1 %1336  ;;  %v1619_v37 = vsel %vm1597_vm15, %v1586_v0, %v1335_v26 }
 0x153   : > { %v1621_v49 = vsel %vm1597_vm15, %v1588_v44, %v1337_v46 }
 0x155   : > { %v1372_v31 = vpop.permute.xlu0 %1371 }
 0x156   : > { %v1374_v29 = vpop.permute.xlu1 %1373  ;;  %v1652_v40 = vsel %vm1630_vm0, %v1619_v37, %v1372_v31 }
 0x157   : > { %v1654_v5 = vsel %vm1630_vm0, %v1621_v49, %v1374_v29 }
 0x159   : > { %v1419_v53 = vpop.permute.xlu0 %1418 }
 0x15a   : > { %v1421_v35 = vpop.permute.xlu1 %1420  ;;  %v1685_v52 = vsel %vm1663_vm1, %v1652_v40, %v1419_v53 }
 0x15b   : > { %v1687_v51 = vsel %vm1663_vm1, %v1654_v5, %v1421_v35 }
 0x15d   : > { %v1454_v43 = vpop.permute.xlu0 %1453 }
 0x15e   : > { %v1139_v45 = vpop.permute.xlu1 %1138  ;;  %v1718_v47 = vsel %vm1696_vm3, %v1685_v52, %v1454_v43 }
 0x15f   : > { %2583 = vmatprep.mubr.msk.bf16.mxu1 %vm1756_vm4, %v1718_v47  ;;  %v1491_v62 = vsel %vm1465_vm11, %v3195_v50, %v1139_v45 }
 0x161   : > { %v1456_v55 = vpop.permute.xlu0 %1455 }
 0x162   : > { %v1141_v57 = vpop.permute.xlu1 %1140  ;;  %v1720_v58 = vsel %vm1696_vm3, %v1687_v51, %v1456_v55 }
 0x163   : > { %2584 = vmatmul.mubr.msk.bf16.gmra.mxu1 %vm1756_vm4, %v1720_v58  ;;  %v1493_v13 = vsel %vm1465_vm11, %v3206_v3, %v1141_v57 }
 0x165   : > { %v1220_v56 = vpop.permute.xlu0 %1219 }
 0x166   : > { %v1222_v59 = vpop.permute.xlu1 %1221  ;;  %v1524_v7 = vsel %vm1498_vm12, %v1491_v62, %v1220_v56 }
 0x167   : > { %v1526_v28 = vsel %vm1498_vm12, %v1493_v13, %v1222_v59 }
 0x169   : > { %v1257_v33 = vpop.permute.xlu0 %1256 }
 0x16a   : > { %v1259_v38 = vpop.permute.xlu1 %1258  ;;  %v1557_v8 = vsel %vm1531_vm13, %v1524_v7, %v1257_v33 }
 0x16b   : > { %v1559_v48 = vsel %vm1531_vm13, %v1526_v28, %v1259_v38 }
 0x16d   : > { %v1304_v60 = vpop.permute.xlu0 %1303 }
 0x16e   : > { %v1306_v24 = vpop.permute.xlu1 %1305  ;;  %v1590_v11 = vsel %vm1564_vm14, %v1557_v8, %v1304_v60 }
 0x16f   : > { %v1592_v17 = vsel %vm1564_vm14, %v1559_v48, %v1306_v24 }
 0x171   : > { %v1339_v61 = vpop.permute.xlu0 %1338 }
 0x172   : > { %v1341_v63 = vpop.permute.xlu1 %1340  ;;  %v1623_v42 = vsel %vm1597_vm15, %v1590_v11, %v1339_v61 }
 0x173   : > { %v1625_v18 = vsel %vm1597_vm15, %v1592_v17, %v1341_v63 }
 0x175   : > { %v1376_v2 = vpop.permute.xlu0 %1375 }
 0x176   : > { %v1378_v4 = vpop.permute.xlu1 %1377  ;;  %v1656_v14 = vsel %vm1630_vm0, %v1623_v42, %v1376_v2 }
 0x177   : > { %v1658_v3 = vsel %vm1630_vm0, %v1625_v18, %v1378_v4 }
 0x179   : > { %v1423_v9 = vpop.permute.xlu0 %1422 }
 0x17a   : > { %v1425_v12 = vpop.permute.xlu1 %1424  ;;  %v1689_v50 = vsel %vm1663_vm1, %v1656_v14, %v1423_v9 }
 0x17b   : > { %v1691_v34 = vsel %vm1663_vm1, %v1658_v3, %v1425_v12 }
 0x17d   : > { %v1458_v15 = vpop.permute.xlu0 %1457 }
 0x17e   : > { %v1143_v27 = vpop.permute.xlu1 %1142  ;;  %v1722_v10 = vsel %vm1696_vm3, %v1689_v50, %v1458_v15 }
 0x17f   : > { %2587 = vmatprep.mubr.msk.bf16.mxu1 %vm1756_vm4, %v1722_v10  ;;  %v1495_v59 = vsel %vm1465_vm11, %v3247_v54, %v1143_v27 }
 0x181   : > { %v1460_v19 = vpop.permute.xlu0 %1459 }
 0x182   : > { %v1145_v20 = vpop.permute.xlu1 %1144  ;;  %v1724_v21 = vsel %vm1696_vm3, %v1691_v34, %v1460_v19 }
 0x183   : > { %v2565_v23 = vpop.f32.mrf.mxu0  ;;  %2588 = vmatmul.mubr.msk.bf16.gmra.mxu1 %vm1756_vm4, %v1724_v21  ;;  %v1497_v33 = vsel %vm1465_vm11, %v3258_v6, %v1145_v20 }
 0x184   : > { %v1836_v31 = vadd.f32 %v2565_v23, %v3414_v22 }
 0x185   : > { %v1827_v16 = vpop.f32.mrf.mxu0  ;;  %v1224_v25 = vpop.permute.xlu0 %1223 }
 0x186   : > { %v1226_v26 = vpop.permute.xlu1 %1225  ;;  %v1828_v29 = vadd.f32 %v3414_v22, %v1827_v16  ;;  %v2153_v52 = vmul.f32 %v1836_v31, %v1836_v31  ;;  %v1528_v38 = vsel %vm1498_vm12, %v1495_v59, %v1224_v25 }
 0x187   : > { %v2566_v46 = vpop.f32.mrf.mxu0  ;;  %v1530_v60 = vsel %vm1498_vm12, %v1497_v33, %v1226_v26 }
 0x188   : > { %v1839_v32 = vadd.f32 %v2566_v46, %v3414_v22  ;;  %v2151_v36 = vmul.f32 %v1828_v29, %v1828_v29 }
 0x189   : > { %v1830_v30 = vpop.f32.mrf.mxu0  ;;  %v1261_v1 = vpop.permute.xlu0 %1260 }
 0x18a   : > { %v2451_v53 = vpack.c.bf16 %v1839_v32, %v1836_v31  ;;  %v1263_v0 = vpop.permute.xlu1 %1262  ;;  %v1831_v35 = vadd.f32 %v3414_v22, %v1830_v30  ;;  %v2154_v47 = vmul.f32 %v1839_v32, %v1839_v32  ;;  %v1561_v24 = vsel %vm1531_vm13, %v1528_v38, %v1261_v1 }
 0x18b   : > { %v1563_v63 = vsel %vm1531_vm13, %v1530_v60, %v1263_v0 }
 0x18c   : > { %2523 = vst [vmem:[%s3424_s13 + $0x8] sm:$0xff] %v2451_v53   ;;  %v2446_v37 = vpack.c.bf16 %v1831_v35, %v1828_v29  ;;  %v2114_v39 = vadd.f32 %v1831_v35, %v1828_v29  ;;  %v2152_v40 = vmul.f32 %v1831_v35, %v1831_v35 }
 0x18d   : > { %v1308_v41 = vpop.permute.xlu0 %1307 }
 0x18e   : > { %2447 = vst [vmem:[%s3424_s13] sm:$0xff] %v2446_v37   ;;  %v2115_v43 = vadd.f32 %v2114_v39, %v1836_v31  ;;  %v2183_v44 = vadd.f32 %v2152_v40, %v2151_v36  ;;  %v1310_v45 = vpop.permute.xlu1 %1309  ;;  %v1594_v2 = vsel %vm1564_vm14, %v1561_v24, %v1308_v41 }
 0x18f   : > { %v1596_v62 = vsel %vm1564_vm14, %v1563_v63, %v1310_v45 }
 0x190   : > { %v2184_v49 = vadd.f32 %v2183_v44, %v2153_v52  ;;  %v2116_v5 = vadd.f32 %v2115_v43, %v1839_v32 }
 0x191   : > { %v1343_v51 = vpop.permute.xlu0 %1342 }
 0x192   : > { %v1345_v55 = vpop.permute.xlu1 %1344  ;;  %v2185_v57 = vadd.f32 %v2184_v49, %v2154_v47  ;;  %v1627_v7 = vsel %vm1597_vm15, %v1594_v2, %v1343_v51 }
 0x193   : > { %v1629_v54 = vsel %vm1597_vm15, %v1596_v62, %v1345_v55 }
 0x195   : > { %v1380_v58 = vpop.permute.xlu0 %1379 }
 0x196   : > { %v1382_v56 = vpop.permute.xlu1 %1381  ;;  %v1660_v6 = vsel %vm1630_vm0, %v1627_v7, %v1380_v58 }
 0x197   : > { %v1662_v8 = vsel %vm1630_vm0, %v1629_v54, %v1382_v56 }
 0x199   : > { %v1427_v61 = vpop.permute.xlu0 %1426 }
 0x19a   : > { %v1429_v4 = vpop.permute.xlu1 %1428  ;;  %v1693_v9 = vsel %vm1663_vm1, %v1660_v6, %v1427_v61 }
 0x19b   : > { %v1695_v12 = vsel %vm1663_vm1, %v1662_v8, %v1429_v4 }
 0x19d   : > { %v1462_v11 = vpop.permute.xlu0 %1461 }
 0x19e   : > { %v1464_v13 = vpop.permute.xlu1 %1463  ;;  %v1726_v42 = vsel %vm1696_vm3, %v1693_v9, %v1462_v11 }
 0x19f   : > { %v1728_v28 = vsel %vm1696_vm3, %v1695_v12, %v1464_v13  ;;  %2591 = vmatprep.mubr.msk.bf16.mxu1 %vm1756_vm4, %v1726_v42 }
 0x1a0   : > { %2592 = vmatmul.mubr.msk.bf16.gmra.mxu1 %vm1756_vm4, %v1728_v28 }
 0x1a3   : > { %v2569_v14 = vpop.f32.mrf.mxu0 }
 0x1a4   : > { %v1852_v17 = vadd.f32 %v2569_v14, %v3414_v22 }
 0x1a5   : > { %v1843_v48 = vpop.f32.mrf.mxu0 }
 0x1a6   : > { %v1844_v50 = vadd.f32 %v3414_v22, %v1843_v48  ;;  %v2157_v25 = vmul.f32 %v1852_v17, %v1852_v17 }
 0x1a7   : > { %v2570_v15 = vpop.f32.mrf.mxu0 }
 0x1a8   : > { %v2117_v27 = vadd.f32 %v2116_v5, %v1844_v50  ;;  %v2155_v10 = vmul.f32 %v1844_v50, %v1844_v50  ;;  %v1855_v18 = vadd.f32 %v2570_v15, %v3414_v22 }
 0x1a9   : > { %v1846_v3 = vpop.f32.mrf.mxu0 }
 0x1aa   : > { %v2186_v34 = vadd.f32 %v2185_v57, %v2155_v10  ;;  %v2461_v19 = vpack.c.bf16 %v1855_v18, %v1852_v17  ;;  %v1847_v20 = vadd.f32 %v3414_v22, %v1846_v3  ;;  %v2158_v31 = vmul.f32 %v1855_v18, %v1855_v18 }
 0x1ac   : > { %2525 = vst [vmem:[%s3424_s13 + $0x18] sm:$0xff] %v2461_v19   ;;  %v2456_v21 = vpack.c.bf16 %v1847_v20, %v1844_v50  ;;  %v2118_v23 = vadd.f32 %v2117_v27, %v1847_v20  ;;  %v2156_v16 = vmul.f32 %v1847_v20, %v1847_v20 }
 0x1ae   : > { %2524 = vst [vmem:[%s3424_s13 + $0x10] sm:$0xff] %v2456_v21   ;;  %v2119_v26 = vadd.f32 %v2118_v23, %v1852_v17  ;;  %v2187_v46 = vadd.f32 %v2186_v34, %v2156_v16 }
 0x1b0   : > { %v2188_v29 = vadd.f32 %v2187_v46, %v2157_v25  ;;  %v2120_v32 = vadd.f32 %v2119_v26, %v1855_v18 }
 0x1b2   : > { %v2189_v30 = vadd.f32 %v2188_v29, %v2158_v31 }
 0x1c3   : > { %v2573_v1 = vpop.f32.mrf.mxu0 }
 0x1c4   : > { %v1868_v36 = vadd.f32 %v2573_v1, %v3414_v22 }
 0x1c5   : > { %v1859_v53 = vpop.f32.mrf.mxu0 }
 0x1c6   : > { %v1860_v0 = vadd.f32 %v3414_v22, %v1859_v53  ;;  %v2161_v5 = vmul.f32 %v1868_v36, %v1868_v36 }
 0x1c7   : > { %v2574_v35 = vpop.f32.mrf.mxu0 }
 0x1c8   : > { %v2121_v37 = vadd.f32 %v2120_v32, %v1860_v0  ;;  %v2159_v39 = vmul.f32 %v1860_v0, %v1860_v0  ;;  %v1871_v40 = vadd.f32 %v2574_v35, %v3414_v22 }
 0x1c9   : > { %v1862_v41 = vpop.f32.mrf.mxu0 }
 0x1ca   : > { %v2190_v52 = vadd.f32 %v2189_v30, %v2159_v39  ;;  %v2471_v43 = vpack.c.bf16 %v1871_v40, %v1868_v36  ;;  %v1863_v44 = vadd.f32 %v3414_v22, %v1862_v41  ;;  %v2162_v57 = vmul.f32 %v1871_v40, %v1871_v40 }
 0x1cc   : > { %2527 = vst [vmem:[%s3424_s13 + $0x28] sm:$0xff] %v2471_v43   ;;  %v2466_v45 = vpack.c.bf16 %v1863_v44, %v1860_v0  ;;  %v2122_v47 = vadd.f32 %v2121_v37, %v1863_v44  ;;  %v2160_v49 = vmul.f32 %v1863_v44, %v1863_v44 }
 0x1ce   : > { %2526 = vst [vmem:[%s3424_s13 + $0x20] sm:$0xff] %v2466_v45   ;;  %v2123_v51 = vadd.f32 %v2122_v47, %v1868_v36  ;;  %v2191_v55 = vadd.f32 %v2190_v52, %v2160_v49 }
 0x1d0   : > { %v2192_v58 = vadd.f32 %v2191_v55, %v2161_v5  ;;  %v2124_v56 = vadd.f32 %v2123_v51, %v1871_v40 }
 0x1d2   : > { %v2193_v59 = vadd.f32 %v2192_v58, %v2162_v57 }
 0x1e3   : > { %v2577_v33 = vpop.f32.mrf.mxu0 }
 0x1e4   : > { %v1884_v61 = vadd.f32 %v2577_v33, %v3414_v22 }
 0x1e5   : > { %v1875_v38 = vpop.f32.mrf.mxu0 }
 0x1e6   : > { %v1876_v60 = vadd.f32 %v3414_v22, %v1875_v38  ;;  %v2165_v12 = vmul.f32 %v1884_v61, %v1884_v61 }
 0x1e7   : > { %v2578_v24 = vpop.f32.mrf.mxu0 }
 0x1e8   : > { %v2125_v63 = vadd.f32 %v2124_v56, %v1876_v60  ;;  %v2163_v2 = vmul.f32 %v1876_v60, %v1876_v60  ;;  %v1887_v4 = vadd.f32 %v2578_v24, %v3414_v22 }
 0x1e9   : > { %v1878_v62 = vpop.f32.mrf.mxu0 }
 0x1ea   : > { %v2194_v7 = vadd.f32 %v2193_v59, %v2163_v2  ;;  %v2481_v54 = vpack.c.bf16 %v1887_v4, %v1884_v61  ;;  %v1879_v6 = vadd.f32 %v3414_v22, %v1878_v62  ;;  %v2166_v28 = vmul.f32 %v1887_v4, %v1887_v4 }
 0x1ec   : > { %2529 = vst [vmem:[%s3424_s13 + $0x38] sm:$0xff] %v2481_v54   ;;  %v2476_v8 = vpack.c.bf16 %v1879_v6, %v1876_v60  ;;  %v2126_v9 = vadd.f32 %v2125_v63, %v1879_v6  ;;  %v2164_v11 = vmul.f32 %v1879_v6, %v1879_v6 }
 0x1ee   : > { %2528 = vst [vmem:[%s3424_s13 + $0x30] sm:$0xff] %v2476_v8   ;;  %v2127_v13 = vadd.f32 %v2126_v9, %v1884_v61  ;;  %v2195_v42 = vadd.f32 %v2194_v7, %v2164_v11 }
 0x1f0   : > { %v2196_v14 = vadd.f32 %v2195_v42, %v2165_v12  ;;  %v2128_v48 = vadd.f32 %v2127_v13, %v1887_v4 }
 0x1f2   : > { %v2197_v50 = vadd.f32 %v2196_v14, %v2166_v28 }
 0x203   : > { %v2581_v15 = vpop.f32.mrf.mxu1 }
 0x204   : > { %v1900_v18 = vadd.f32 %v2581_v15, %v3414_v22 }
 0x205   : > { %v1891_v17 = vpop.f32.mrf.mxu1 }
 0x206   : > { %v1892_v27 = vadd.f32 %v3414_v22, %v1891_v17  ;;  %v2169_v31 = vmul.f32 %v1900_v18, %v1900_v18 }
 0x207   : > { %v2582_v10 = vpop.f32.mrf.mxu1 }
 0x208   : > { %v2129_v3 = vadd.f32 %v2128_v48, %v1892_v27  ;;  %v2167_v34 = vmul.f32 %v1892_v27, %v1892_v27  ;;  %v1903_v19 = vadd.f32 %v2582_v10, %v3414_v22 }
 0x209   : > { %v1894_v20 = vpop.f32.mrf.mxu1 }
 0x20a   : > { %v2198_v21 = vadd.f32 %v2197_v50, %v2167_v34  ;;  %v2491_v23 = vpack.c.bf16 %v1903_v19, %v1900_v18  ;;  %v1895_v16 = vadd.f32 %v3414_v22, %v1894_v20  ;;  %v2170_v30 = vmul.f32 %v1903_v19, %v1903_v19 }
 0x20c   : > { %2531 = vst [vmem:[%s3424_s13 + $0x48] sm:$0xff] %v2491_v23   ;;  %v2486_v25 = vpack.c.bf16 %v1895_v16, %v1892_v27  ;;  %v2130_v26 = vadd.f32 %v2129_v3, %v1895_v16  ;;  %v2168_v46 = vmul.f32 %v1895_v16, %v1895_v16 }
 0x20e   : > { %2530 = vst [vmem:[%s3424_s13 + $0x40] sm:$0xff] %v2486_v25   ;;  %v2131_v29 = vadd.f32 %v2130_v26, %v1900_v18  ;;  %v2199_v32 = vadd.f32 %v2198_v21, %v2168_v46 }
 0x210   : > { %v2200_v1 = vadd.f32 %v2199_v32, %v2169_v31  ;;  %v2132_v53 = vadd.f32 %v2131_v29, %v1903_v19 }
 0x212   : > { %v2201_v0 = vadd.f32 %v2200_v1, %v2170_v30 }
 0x223   : > { %v2585_v35 = vpop.f32.mrf.mxu1 }
 0x224   : > { %v1916_v39 = vadd.f32 %v2585_v35, %v3414_v22 }
 0x225   : > { %v1907_v36 = vpop.f32.mrf.mxu1 }
 0x226   : > { %v1908_v52 = vadd.f32 %v3414_v22, %v1907_v36  ;;  %v2173_v4 = vmul.f32 %v1916_v39, %v1916_v39 }
 0x227   : > { %v2586_v37 = vpop.f32.mrf.mxu1 }
 0x228   : > { %v1919_v40 = vadd.f32 %v2586_v37, %v3414_v22  ;;  %v2171_v38 = vmul.f32 %v1908_v52, %v1908_v52  ;;  %v2133_v60 = vadd.f32 %v2132_v53, %v1908_v52 }
 0x229   : > { %v1910_v41 = vpop.f32.mrf.mxu1 }
 0x22a   : > { %v2501_v43 = vpack.c.bf16 %v1919_v40, %v1916_v39  ;;  %v1911_v44 = vadd.f32 %v3414_v22, %v1910_v41  ;;  %v2202_v61 = vadd.f32 %v2201_v0, %v2171_v38  ;;  %v2174_v54 = vmul.f32 %v1919_v40, %v1919_v40 }
 0x22c   : > { %2533 = vst [vmem:[%s3424_s13 + $0x58] sm:$0xff] %v2501_v43   ;;  %v2496_v45 = vpack.c.bf16 %v1911_v44, %v1908_v52  ;;  %v2172_v24 = vmul.f32 %v1911_v44, %v1911_v44  ;;  %v2134_v63 = vadd.f32 %v2133_v60, %v1911_v44 }
 0x22e   : > { %2532 = vst [vmem:[%s3424_s13 + $0x50] sm:$0xff] %v2496_v45   ;;  %v2203_v2 = vadd.f32 %v2202_v61, %v2172_v24  ;;  %v2135_v62 = vadd.f32 %v2134_v63, %v1916_v39 }
 0x230   : > { %v2204_v7 = vadd.f32 %v2203_v2, %v2173_v4  ;;  %v2136_v6 = vadd.f32 %v2135_v62, %v1919_v40 }
 0x232   : > { %v2205_v11 = vadd.f32 %v2204_v7, %v2174_v54 }
 0x243   : > { %v2589_v47 = vpop.f32.mrf.mxu1 }
 0x244   : > { %v1932_v51 = vadd.f32 %v2589_v47, %v3414_v22 }
 0x245   : > { %v1923_v49 = vpop.f32.mrf.mxu1 }
 0x246   : > { %v1924_v58 = vadd.f32 %v3414_v22, %v1923_v49  ;;  %v2177_v48 = vmul.f32 %v1932_v51, %v1932_v51 }
 0x247   : > { %v2590_v5 = vpop.f32.mrf.mxu1 }
 0x248   : > { %v1935_v55 = vadd.f32 %v2590_v5, %v3414_v22  ;;  %v2175_v8 = vmul.f32 %v1924_v58, %v1924_v58  ;;  %v2137_v9 = vadd.f32 %v2136_v6, %v1924_v58 }
 0x249   : > { %v1926_v57 = vpop.f32.mrf.mxu1 }
 0x24a   : > { %v2511_v56 = vpack.c.bf16 %v1935_v55, %v1932_v51  ;;  %v1927_v59 = vadd.f32 %v3414_v22, %v1926_v57  ;;  %v2206_v13 = vadd.f32 %v2205_v11, %v2175_v8  ;;  %v2178_v10 = vmul.f32 %v1935_v55, %v1935_v55 }
 0x24c   : > { %2535 = vst [vmem:[%s3424_s13 + $0x68] sm:$0xff] %v2511_v56   ;;  %v2506_v33 = vpack.c.bf16 %v1927_v59, %v1924_v58  ;;  %v2176_v12 = vmul.f32 %v1927_v59, %v1927_v59  ;;  %v2138_v42 = vadd.f32 %v2137_v9, %v1927_v59 }
 0x24e   : > { %2534 = vst [vmem:[%s3424_s13 + $0x60] sm:$0xff] %v2506_v33   ;;  %v2207_v28 = vadd.f32 %v2206_v13, %v2176_v12  ;;  %v2139_v50 = vadd.f32 %v2138_v42, %v1932_v51 }
 0x250   : > { %v2208_v17 = vadd.f32 %v2207_v28, %v2177_v48  ;;  %v2140_v34 = vadd.f32 %v2139_v50, %v1935_v55 }
 0x252   : > { %v2209_v16 = vadd.f32 %v2208_v17, %v2178_v10 }
 0x260   : > { %v2593_v14 = vpop.f32.mrf.mxu1 }
 0x261   : > { %v1948_v3 = vadd.f32 %v2593_v14, %v3414_v22 }
 0x262   : > { %v1939_v15 = vpop.f32.mrf.mxu1 }
 0x263   : > { %v1940_v27 = vadd.f32 %v3414_v22, %v1939_v15  ;;  %v2181_v30 = vmul.f32 %v1948_v3, %v1948_v3 }
 0x264   : > { %v2594_v18 = vpop.f32.mrf.mxu1 }
 0x265   : > { %v2179_v19 = vmul.f32 %v1940_v27, %v1940_v27  ;;  %v1951_v20 = vadd.f32 %v2594_v18, %v3414_v22  ;;  %v2141_v23 = vadd.f32 %v2140_v34, %v1940_v27 }
 0x266   : > { %v1942_v21 = vpop.f32.mrf.mxu1 }
 0x267   : > { %v2521_v25 = vpack.c.bf16 %v1951_v20, %v1948_v3  ;;  %v1943_v26 = vadd.f32 %v3414_v22, %v1942_v21  ;;  %v2210_v46 = vadd.f32 %v2209_v16, %v2179_v19  ;;  %v2182_v0 = vmul.f32 %v1951_v20, %v1951_v20 }
 0x269   : > { %2537 = vst [vmem:[%s3424_s13 + $0x78] sm:$0xff] %v2521_v25   ;;  %v2516_v31 = vpack.c.bf16 %v1943_v26, %v1940_v27  ;;  %v2142_v29 = vadd.f32 %v2141_v23, %v1943_v26  ;;  %v2180_v32 = vmul.f32 %v1943_v26, %v1943_v26 }
 0x26b   : > { %2536 = vst [vmem:[%s3424_s13 + $0x70] sm:$0xff] %v2516_v31   ;;  %v2143_v1 = vadd.f32 %v2142_v29, %v1948_v3  ;;  %v2211_v53 = vadd.f32 %v2210_v46, %v2180_v32 }
 0x26d   : > { %v2144_v35 = vadd.f32 %v2143_v1, %v1951_v20  ;;  %v2212_v36 = vadd.f32 %v2211_v53, %v2181_v30 }
 0x26f   : > { %v2145_v37 = vrot.slane %v2144_v35, 4  ;;  %v2213_v39 = vadd.f32 %v2212_v36, %v2182_v0 }
 0x271   : > { %v2146_v40 = vadd.f32 %v2145_v37, %v2144_v35  ;;  %v2214_v41 = vrot.slane %v2213_v39, 4 }
 0x273   : > { %v2147_v52 = vrot.slane %v2146_v40, 2  ;;  %v2215_v43 = vadd.f32 %v2214_v41, %v2213_v39 }
 0x275   : > { %v2148_v22 = vadd.f32 %v2147_v52, %v2146_v40  ;;  %v2216_v44 = vrot.slane %v2215_v43, 2 }
 0x277   : > { %v2149_v45 = vrot.slane %v2148_v22, 1  ;;  %v2217_v47 = vadd.f32 %v2216_v44, %v2215_v43 }
 0x279   : > { %v2218_v49 = vrot.slane %v2217_v47, 1  ;;  %v2150_v5 = vadd.f32 %v2149_v45, %v2148_v22 }
 0x27b   : > { %v2219_v51 = vadd.f32 %v2218_v49, %v2217_v47 }
 0x27d   : > { %v2221_v55 = vsel %vm2220_vm2, %v2150_v5, %v2219_v51 }
 0x27e   : > { %2222 = vst [vmem:[%s208_s19] sm:$0x3] %v2221_v55 }
 0x27f PF: > { %s15_s15 = sadd.s32 1, %s2669_s15  }
 0x280   : > { %p12_p4 = scmp.ge.s32.totalorder %s15_s15, 4  }
 0x282   :  { %14 = sbr.rel (!%p12_p4) target bundleno = 1 (0x1), region = 75 }

// kernel: inconv_forward.3
= control target key start
LH: loop header
LB: loop body
LE: loop exit
PB: predicated region body
PF: predicated region fallthrough
CT: control target
= control target key end

     0   :  { %s4433_s21 = smov 0   ;;  %s5800_s0 = inlined_call_operand.vmem [shape: bf16[2,16,16,128], index: 0, kind: input, shape index: {}]   ;;  %s5801_s1 = inlined_call_operand.vmem [shape: bf16[1152,128], index: 1, kind: input, shape index: {}]   ;;  %s5802_s2 = inlined_call_operand.vmem [shape: f32[1,128], index: 2, kind: input, shape index: {}]   ;;  %s5803_s3 = inlined_call_operand.vmem [shape: f32[1,128], index: 3, kind: input, shape index: {}]   ;;  %s5804_s4 = inlined_call_operand.vmem [shape: f32[1,128], index: 4, kind: input, shape index: {}]   ;;  %s5805_s5 = inlined_call_operand.vmem [shape: bf16[2,16,16,128], index: 5, kind: output, shape index: {0}]   ;;  %s5806_s6 = inlined_call_operand.vmem [shape: f32[2,2,128], index: 6, kind: output, shape index: {1}]  }
   0x1 LB: > { %s3296_s22 = sadd.s32 4294967295, %s4395_s21   ;;  %p3300_p0 = scmp.ge.s32.totalorder %s4395_s21, 1  ;;  %s4395_s21 = sphi %s4433_s21, %s17_s21  }
   0x2   : > { %p215_p1 = scmp.lt.s32.totalorder %s4395_s21, 3 }
   0x4   : > { %p216_p2 = pnand %p3300_p0, %p215_p1 }
   0x6   : > { %219 = sbr.rel (%p216_p2) target bundleno = 583 (0x247), region = 40 }
   0xb   : > { %v4268_v0 = vld [vmem:[%s5801_s1 + $0x78] sm:$0xff]   ;;  %v4397_v2 = vmov 0   ;;  %v4270_v3 = vld [vmem:[%s5801_s1 + $0x70] sm:$0xff]   ;;  %v4272_v5 = vld [vmem:[%s5801_s1 + $0x68] sm:$0xff]   ;;  %p249_p3 = scmp.lt.s32.totalorder %s3296_s22, 1  ;;  %vm1436_vm0 = vcmask 1046528  }
   0xc   : > { %v4269_v1 = vld [vmem:[%s5801_s1 + $0x38] sm:$0xff]   ;;  %438 = vst [vmem:[#allocation2] sm:$0xf] %v4397_v2  ;;  %439 = vst [vmem:[#allocation2 + $0x4] sm:$0xf] %v4397_v2  ;;  %3723 = vmatprep.subr.bf16.mxu0 %v4268_v0  ;;  %4243 = vmatprep.subr.bf16.mxu1 %v4268_v0  ;;  %v4271_v4 = vld [vmem:[%s5801_s1 + $0x30] sm:$0xff]  }
   0xd   : > { %440 = vst [vmem:[#allocation2 + $0x8] sm:$0x1] %v4397_v2  ;;  %441 = vst [vmem:[#allocation2 + $0xc] sm:$0xf] %v4397_v2  ;;  %3724 = vmatpush3.bf16.msra.mxu0 %v4269_v1  ;;  %4251 = vmatpush3.bf16.msra.mxu1 %v4269_v1  ;;  %v4273_v6 = vld [vmem:[%s5801_s1 + $0x28] sm:$0xff]   ;;  %v4274_v7 = vld [vmem:[%s5801_s1 + $0x60] sm:$0xff]  }
   0xe   : > { %442 = vst [vmem:[#allocation2 + $0x10] sm:$0xf] %v4397_v2  ;;  %443 = vst [vmem:[#allocation2 + $0x14] sm:$0x1] %v4397_v2  ;;  %3725 = vmatprep.subr.bf16.mxu0 %v4270_v3  ;;  %4244 = vmatprep.subr.bf16.mxu1 %v4270_v3  ;;  %s5842_s22 = smov (!%p249_p3, %s3296_s22), 1  ;;  %v4275_v8 = vld [vmem:[%s5801_s1 + $0x20] sm:$0xff]  }
   0xf   : > { %444 = vst [vmem:[#allocation2 + $0x18] sm:$0xf] %v4397_v2  ;;  %445 = vst [vmem:[#allocation2 + $0x1c] sm:$0xf] %v4397_v2  ;;  %v4276_v9 = vld [vmem:[%s5801_s1 + $0x58] sm:$0xff]   ;;  %s3483_s17 = sshll.u32 %s5842_s22, 7 }
  0x10   : > { %446 = vst [vmem:[#allocation2 + $0x20] sm:$0x1] %v4397_v2  ;;  %447 = vst [vmem:[#allocation2 + $0x24] sm:$0xf] %v4397_v2  ;;  %v4277_v10 = vld [vmem:[%s5801_s1 + $0x18] sm:$0xff]   ;;  %v4278_v11 = vld [vmem:[%s5801_s1 + $0x50] sm:$0xff]   ;;  %s4486_s26 = scalar_lea.vmem %s5800_s0, %s3483_s17  ;;  %s5695_s16 = scalar_lea.vmem %s5805_s5, %s3483_s17 }
  0x11   : > { %448 = vst [vmem:[#allocation2 + $0x28] sm:$0xf] %v4397_v2  ;;  %449 = vst [vmem:[#allocation2 + $0x2c] sm:$0x1] %v4397_v2  ;;  %3726 = vmatpush3.bf16.msra.mxu0 %v4271_v4  ;;  %4252 = vmatpush3.bf16.msra.mxu1 %v4271_v4  ;;  %v3703_v14 = vld [vmem:[%s4486_s26 + $0x58] sm:$0xff]   ;;  %v4279_v15 = vld [vmem:[%s5801_s1 + $0x10] sm:$0xff]  }
  0x12   : > { %450 = vst [vmem:[#allocation2 + $0x30] sm:$0xf] %v4397_v2  ;;  %451 = vst [vmem:[#allocation2 + $0x34] sm:$0xf] %v4397_v2  ;;  %3727 = vmatprep.subr.bf16.mxu0 %v4272_v5  ;;  %4245 = vmatprep.subr.bf16.mxu1 %v4272_v5  ;;  %v4499_v19 = vld [vmem:[%s5803_s3] ss:$0 sm:$0xff]  ;;  %v3595_v22 = vunpack.c.l.bf16 %v3703_v14  ;;  %v3596_v23 = vunpack.c.h.bf16 %v3703_v14 }
  0x13   : > { %452 = vst [vmem:[#allocation2 + $0x38] sm:$0x1] %v4397_v2  ;;  %453 = vst [vmem:[#allocation2 + $0x3c] sm:$0xf] %v4397_v2  ;;  %v4488_v12 = vld [vmem:[#allocation2] sm:$0xff]   ;;  %v4280_v20 = vld [vmem:[%s5801_s1 + $0x48] sm:$0xff]  }
  0x14   : > { %454 = vst [vmem:[#allocation2 + $0x40] sm:$0xf] %v4397_v2  ;;  %455 = vst [vmem:[#allocation2 + $0x44] sm:$0x1] %v4397_v2  ;;  %v1229_v16 = vshrl.u32 %v4488_v12, 16  ;;  %v1231_v17 = vshll.u32 %v4488_v12, 16  ;;  %v357_v27 = vmul.f32 %v3595_v22, %v4499_v19  ;;  %v358_v28 = vmul.f32 %v3596_v23, %v4499_v19 }
  0x15   : > { %456 = vst [vmem:[#allocation2 + $0x48] sm:$0xf] %v4397_v2  ;;  %457 = vst [vmem:[#allocation2 + $0x4c] sm:$0xf] %v4397_v2  ;;  %3728 = vmatpush3.bf16.msra.mxu0 %v4273_v6  ;;  %4253 = vmatpush3.bf16.msra.mxu1 %v4273_v6  ;;  %v4507_v26 = vld [vmem:[%s5804_s4] ss:$0 sm:$0xff] }
  0x16   : > { %458 = vst [vmem:[#allocation2 + $0x50] sm:$0x1] %v4397_v2  ;;  %459 = vst [vmem:[#allocation2 + $0x54] sm:$0xf] %v4397_v2  ;;  %3729 = vmatprep.subr.bf16.mxu0 %v4274_v7  ;;  %4246 = vmatprep.subr.bf16.mxu1 %v4274_v7  ;;  %v1233_v24 = vrot.slane %v1231_v17, 1  ;;  %v1437_v29 = vrot.slane %v4488_v12, 1  ;;  %v396_v33 = vadd.f32 %v4507_v26, %v357_v27 }
  0x17   : > { %460 = vst [vmem:[#allocation2 + $0x58] sm:$0xf] %v4397_v2  ;;  %461 = vst [vmem:[#allocation2 + $0x5c] sm:$0x1] %v4397_v2  ;;  %vm1227_vm1 = vsmask.f32 7424  ;;  %v397_v34 = vadd.f32 %v4507_v26, %v358_v28 }
  0x18   : > { %462 = vst [vmem:[#allocation2 + $0x60] sm:$0xf] %v4397_v2  ;;  %463 = vst [vmem:[#allocation2 + $0x64] sm:$0xf] %v4397_v2  ;;  %v4281_v30 = vld [vmem:[%s5801_s1 + $0x8] sm:$0xff]   ;;  %v1234_v31 = vor.u32 %v1233_v24, %v1229_v16  ;;  %v4282_v32 = vld [vmem:[%s5801_s1 + $0x40] sm:$0xff]  }
  0x19   : > { %464 = vst [vmem:[#allocation2 + $0x68] sm:$0x1] %v4397_v2  ;;  %465 = vst [vmem:[#allocation2 + $0x6c] sm:$0xf] %v4397_v2  ;;  %3730 = vmatpush3.bf16.msra.mxu0 %v4275_v8  ;;  %4254 = vmatpush3.bf16.msra.mxu1 %v4275_v8  ;;  %vm588_vm2 = vsmask.f32 256 }
  0x1a   : > { %466 = vst [vmem:[#allocation2 + $0x70] sm:$0xf] %v4397_v2  ;;  %467 = vst [vmem:[#allocation2 + $0x74] sm:$0x1] %v4397_v2  ;;  %3731 = vmatprep.subr.bf16.mxu0 %v4276_v9  ;;  %4247 = vmatprep.subr.bf16.mxu1 %v4276_v9  ;;  %v3550_v35 = vld [vmem:[%s4486_s26] sm:$0xff]   ;;  %v428_v41 = vmax.f32 %v396_v33, 0.0 }
  0x1b   : > { %468 = vst [vmem:[#allocation2 + $0x78] sm:$0xf] %v4397_v2  ;;  %469 = vst [vmem:[#allocation2 + $0x7c] sm:$0xf] %v4397_v2  ;;  %vm589_vm3 = vsmask.f32 4368  ;;  %v3551_v38 = vunpack.c.l.bf16 %v3550_v35  ;;  %v3552_v39 = vunpack.c.h.bf16 %v3550_v35 }
  0x1c   : > { %470 = vst [vmem:[#allocation2 + $0x80] sm:$0x1] %v4397_v2  ;;  %471 = vst [vmem:[#allocation2 + $0x84] sm:$0xf] %v4397_v2  ;;  %v4283_v40 = vld [vmem:[%s5801_s1] sm:$0xff]   ;;  %v429_v42 = vmax.f32 %v397_v34, 0.0  ;;  %v3507_v46 = vpack.c.bf16 %v428_v41, %v428_v41 }
  0x1d   : > { %472 = vst [vmem:[#allocation2 + $0x88] sm:$0xf] %v4397_v2  ;;  %473 = vst [vmem:[#allocation2 + $0x8c] sm:$0x1] %v4397_v2  ;;  %3732 = vmatpush3.bf16.msra.mxu0 %v4277_v10  ;;  %4255 = vmatpush3.bf16.msra.mxu1 %v4277_v10  ;;  %v4288_v43 = vld [vmem:[%s5801_s1 + $0xf8] sm:$0xff]   ;;  %v335_v44 = vmul.f32 %v3551_v38, %v4499_v19  ;;  %v336_v45 = vmul.f32 %v3552_v39, %v4499_v19  ;;  %vm912_vm4 = vcmask 1043456  }
  0x1e   : > { %474 = vst [vmem:[#allocation2 + $0x90] sm:$0xf] %v4397_v2  ;;  %475 = vst [vmem:[#allocation2 + $0x94] sm:$0xf] %v4397_v2  ;;  %3733 = vmatprep.subr.bf16.mxu0 %v4278_v11  ;;  %4248 = vmatprep.subr.bf16.mxu1 %v4278_v11  ;;  %v3508_v47 = vpack.c.bf16 %v429_v42, %v429_v42  ;;  %v4289_v48 = vld [vmem:[%s5801_s1 + $0x178] sm:$0xff]   ;;  %vm919_vm6 = vcmask 1040384  }
  0x1f   : > { %476 = vst [vmem:[#allocation2 + $0x98] sm:$0x1] %v4397_v2  ;;  %477 = vst [vmem:[#allocation2 + $0x9c] sm:$0xf] %v4397_v2  ;;  %vm913_vm5 = vsmask.f32 7938  ;;  %v374_v49 = vadd.f32 %v4507_v26, %v335_v44  ;;  %v375_v50 = vadd.f32 %v4507_v26, %v336_v45 }
  0x20   : > { %478 = vst [vmem:[#allocation2 + $0xa0] sm:$0xf] %v4397_v2  ;;  %479 = vst [vmem:[#allocation2 + $0xa4] sm:$0x1] %v4397_v2  ;;  %v3704_v51 = vld [vmem:[%s4486_s26 + $0x60] sm:$0xff]   ;;  %v779_v52 = vshrl.u32 %v3507_v46, 16 }
  0x21   : > { %480 = vst [vmem:[#allocation2 + $0xa8] sm:$0xf] %v4397_v2  ;;  %481 = vst [vmem:[#allocation2 + $0xac] sm:$0xf] %v4397_v2  ;;  %3734 = vmatpush3.bf16.msra.mxu0 %v4279_v15  ;;  %4256 = vmatpush3.bf16.msra.mxu1 %v4279_v15  ;;  %v782_v53 = vshll.u32 %v3507_v46, 16  ;;  %v787_v54 = vshrl.u32 %v3508_v47, 16  ;;  %v3599_v60 = vunpack.c.l.bf16 %v3704_v51  ;;  %v3600_v61 = vunpack.c.h.bf16 %v3704_v51 }
  0x22   : > { %482 = vst [vmem:[#allocation2 + $0xb0] sm:$0x1] %v4397_v2  ;;  %483 = vst [vmem:[#allocation2 + $0xb4] sm:$0xf] %v4397_v2  ;;  %3735 = vmatprep.subr.bf16.mxu0 %v4280_v20  ;;  %4249 = vmatprep.subr.bf16.mxu1 %v4280_v20  ;;  %v790_v55 = vshll.u32 %v3508_v47, 16  ;;  %v4293_v56 = vld [vmem:[%s5801_s1 + $0x138] sm:$0xff]  }
  0x23   : > { %484 = vst [vmem:[#allocation2 + $0xb8] sm:$0xf] %v4397_v2  ;;  %485 = vst [vmem:[#allocation2 + $0xbc] sm:$0x1] %v4397_v2  ;;  %v406_v58 = vmax.f32 %v374_v49, 0.0  ;;  %v407_v59 = vmax.f32 %v375_v50, 0.0  ;;  %v359_v6 = vmul.f32 %v3599_v60, %v4499_v19  ;;  %v360_v7 = vmul.f32 %v3600_v61, %v4499_v19 }
  0x24   : > { %486 = vst [vmem:[#allocation2 + $0xc0] sm:$0xf] %v4397_v2  ;;  %487 = vst [vmem:[#allocation2 + $0xc4] sm:$0xf] %v4397_v2  ;;  %v781_v62 = vrot.slane %v779_v52, 7  ;;  %v789_v63 = vrot.slane %v787_v54, 7 }
  0x25   : > { %488 = vst [vmem:[#allocation2 + $0xc8] sm:$0x1] %v4397_v2  ;;  %489 = vst [vmem:[#allocation2 + $0xcc] sm:$0xf] %v4397_v2  ;;  %3736 = vmatpush3.bf16.msra.mxu0 %v4281_v30  ;;  %4257 = vmatpush3.bf16.msra.mxu1 %v4281_v30  ;;  %v994_v1 = vld [vmem:[#allocation2 + $0x90] sm:$0xf]  ;;  %v3485_v4 = vpack.c.bf16 %v406_v58, %v406_v58  ;;  %v3486_v5 = vpack.c.bf16 %v407_v59, %v407_v59 }
  0x26   : > { %490 = vst [vmem:[#allocation2 + $0xd0] sm:$0xf] %v4397_v2  ;;  %491 = vst [vmem:[#allocation2 + $0xd4] sm:$0x1] %v4397_v2  ;;  %3737 = vmatprep.subr.bf16.mxu0 %v4282_v32  ;;  %4250 = vmatprep.subr.bf16.mxu1 %v4282_v32  ;;  %v998_v2 = vld [vmem:[#allocation2 + $0x98] sm:$0x1]  ;;  %v784_v8 = vor.u32 %v782_v53, %v781_v62  ;;  %v792_v10 = vor.u32 %v790_v55, %v789_v63 }
  0x27   : > { %v4285_v13 = vld [vmem:[#allocation2 + $0x8] ss:$0 sps:$4 sm:$0x11]   ;;  %vm4544_vm7 = vmor %vm588_vm2, %vm589_vm3  ;;  %v785_v9 = vrot.slane %v781_v62, 4  ;;  %v794_v11 = vrot.slane %v789_v63, 4  ;;  %v592_v14 = vshrl.u32 %v3485_v4, 16  ;;  %v398_v23 = vadd.f32 %v4507_v26, %v359_v6 }
  0x28   : > { %v1236_v18 = vshll.u32 %v4285_v13, 16  ;;  %v1438_v21 = vrot.slane %v4285_v13, 1  ;;  %vm4550_vm8 = vmand %vm912_vm4, %vm913_vm5  ;;  %v3693_v13 = vld [vmem:[%s4486_s26 + $0x8] sm:$0xff]   ;;  %v595_v15 = vshll.u32 %v3485_v4, 16  ;;  %v600_v16 = vshrl.u32 %v3486_v5, 16  ;;  %v4303_v24 = vld [vmem:[%s5801_s1 + $0x170] sm:$0xff]  }
  0x29   : > { %3738 = vmatpush3.bf16.msra.mxu0 %v4283_v40  ;;  %4258 = vmatpush3.bf16.msra.mxu1 %v4283_v40  ;;  %vm4556_vm9 = vmand %vm919_vm6, %vm588_vm2  ;;  %v603_v17 = vshll.u32 %v3486_v5, 16  ;;  %v995_v20 = vsel %vm4550_vm8, %v784_v8, %v994_v1  ;;  %v921_v22 = vld [vmem:[#allocation2 + $0x14] sm:$0x1]  ;;  %v399_v28 = vadd.f32 %v4507_v26, %v360_v7  ;;  %v430_v30 = vmax.f32 %v398_v23, 0.0  ;;  %v3705_v38 = vld [vmem:[%s4486_s26 + $0x68] sm:$0xff]   ;;  %s3305_s17 = sshll.u32 %s5842_s22, 1 }
  0x2a   : > { %v1238_v25 = vrot.slane %v1236_v18, 1  ;;  %v4522_v36 = vsel %vm1436_vm0, %v1437_v29, %v1438_v21  ;;  %3835 = vmatprep.subr.bf16.mxu1 %v4288_v43  ;;  %3947 = vmatprep.subr.bf16.mxu0 %v4289_v48  ;;  %v793_v18 = vsel %vm4544_vm7, %v785_v9, %v792_v10  ;;  %v999_v21 = vsel %vm4556_vm9, %v794_v11, %v998_v2  ;;  %v3694_v47 = vld [vmem:[%s4486_s26 + $0x10] sm:$0xff]  }
  0x2b   : > { %996 = vst [vmem:[#allocation2 + $0x90] sm:$0xf] %v995_v20  ;;  %997 = vst [vmem:[#allocation2 + $0x94] sm:$0xf] %v793_v18  ;;  %v602_v27 = vrot.slane %v600_v16, 7  ;;  %v3555_v29 = vunpack.c.l.bf16 %v3693_v13  ;;  %v431_v39 = vmax.f32 %v399_v28, 0.0  ;;  %v3509_v40 = vpack.c.bf16 %v430_v30, %v430_v30 }
  0x2c   : > { %v1239_v37 = vsel %vm1227_vm1, %v1234_v31, %v1238_v25  ;;  %1000 = vst [vmem:[#allocation2 + $0x98] sm:$0x1] %v999_v21  ;;  %v594_v25 = vrot.slane %v592_v14, 7  ;;  %v3556_v31 = vunpack.c.h.bf16 %v3693_v13  ;;  %v3603_v46 = vunpack.c.l.bf16 %v3705_v38  ;;  %v1005_v14 = vld [vmem:[#allocation2 + $0xa4] sm:$0x1]  ;;  %v4292_v30 = vld [vmem:[%s5801_s1 + $0xb8] sm:$0xff]  }
  0x2d   : > { %2168 = vmatprep.mubr.bf16.mxu0 %v1239_v37  ;;  %v605_v34 = vor.u32 %v603_v17, %v602_v27  ;;  %v607_v35 = vrot.slane %v602_v27, 4  ;;  %v4305_v37 = vld [vmem:[%s5801_s1 + $0x130] sm:$0xff]   ;;  %v337_v41 = vmul.f32 %v3555_v29, %v4499_v19  ;;  %v3510_v48 = vpack.c.bf16 %v431_v39, %v431_v39 }
  0x2e   : > { %2169 = vmatmul.mubr.bf16.vlgmr.msra.gmra.mxu0 %v4488_v12  ;;  %v915_v12 = vld [vmem:[#allocation2 + $0xc] sm:$0xf]  ;;  %v597_v32 = vor.u32 %v595_v15, %v594_v25  ;;  %v598_v33 = vrot.slane %v594_v25, 4  ;;  %v338_v42 = vmul.f32 %v3556_v31, %v4499_v19  ;;  %v796_v49 = vshrl.u32 %v3509_v40, 16  ;;  %v4595_v17 = vld [vmem:[%s4486_s26 + $0x70] sm:$0xff]  }
  0x2f   : > { %3948 = vmatpush3.bf16.msra.mxu0 %v4293_v56  ;;  %v922_v45 = vsel %vm4556_vm9, %v607_v35, %v921_v22  ;;  %v799_v50 = vshll.u32 %v3509_v40, 16  ;;  %v376_v51 = vadd.f32 %v4507_v26, %v337_v41  ;;  %v3604_v53 = vunpack.c.h.bf16 %v3705_v38  ;;  %v1001_v56 = vld [vmem:[#allocation2 + $0x9c] sm:$0xf]  ;;  %v4294_v39 = vld [vmem:[%s5801_s1 + $0xf0] sm:$0xff]   ;;  %v924_v41 = vld [vmem:[#allocation2 + $0x18] sm:$0xf] }
  0x30   : > { %3949 = vmatprep.subr.bf16.mxu0 %v4303_v24  ;;  %v606_v43 = vsel %vm4544_vm7, %v598_v33, %v605_v34  ;;  %v916_v44 = vsel %vm4550_vm8, %v597_v32, %v915_v12  ;;  %923 = vst [vmem:[#allocation2 + $0x14] sm:$0x1] %v922_v45  ;;  %v377_v52 = vadd.f32 %v4507_v26, %v338_v42  ;;  %v3559_v55 = vunpack.c.l.bf16 %v3694_v47  ;;  %v4317_v34 = vld [vmem:[%s5801_s1 + $0x168] sm:$0xff]   ;;  %v4360_v57 = vld [vmem:[%s5801_s1 + $0x230] sm:$0xff]  }
  0x31   : > { %917 = vst [vmem:[#allocation2 + $0xc] sm:$0xf] %v916_v44  ;;  %918 = vst [vmem:[#allocation2 + $0x10] sm:$0xf] %v606_v43  ;;  %v361_v54 = vmul.f32 %v3603_v46, %v4499_v19  ;;  %v3560_v58 = vunpack.c.h.bf16 %v3694_v47  ;;  %v798_v61 = vrot.slane %v796_v49, 7  ;;  %v804_v62 = vshrl.u32 %v3510_v48, 16 }
  0x32   : > { %v4286_v59 = vld [vmem:[#allocation2 + $0x90] sm:$0xff]   ;;  %v362_v63 = vmul.f32 %v3604_v53, %v4499_v19  ;;  %v807_v2 = vshll.u32 %v3510_v48, 16  ;;  %v408_v4 = vmax.f32 %v376_v51, 0.0  ;;  %v409_v5 = vmax.f32 %v377_v52, 0.0 }
  0x33   : > { %3950 = vmatpush3.bf16.msra.mxu0 %v4305_v37  ;;  %v4287_v60 = vld [vmem:[#allocation2 + $0x98] ss:$0 sps:$4 sm:$0x11]   ;;  %v400_v1 = vadd.f32 %v4507_v26, %v361_v54  ;;  %v339_v6 = vmul.f32 %v3559_v55, %v4499_v19  ;;  %v1373_v7 = vshrl.u32 %v4286_v59, 16  ;;  %v1375_v8 = vshll.u32 %v4286_v59, 16  ;;  %v4295_v55 = vld [vmem:[%s5801_s1 + $0xb0] sm:$0xff]  }
  0x34   : > { %v1380_v9 = vshll.u32 %v4287_v60, 16  ;;  %v801_v10 = vor.u32 %v799_v50, %v798_v61  ;;  %v802_v11 = vrot.slane %v798_v61, 4  ;;  %v806_v13 = vrot.slane %v804_v62, 7  ;;  %3951 = vmatprep.subr.bf16.mxu0 %v4317_v34  ;;  %v4298_v62 = vld [vmem:[%s5801_s1 + $0xe8] sm:$0xff]  }
  0x35   : > { %v3487_v15 = vpack.c.bf16 %v408_v4, %v408_v4  ;;  %v3488_v16 = vpack.c.bf16 %v409_v5, %v409_v5  ;;  %v1377_v18 = vrot.slane %v1375_v8, 1  ;;  %v401_v12 = vadd.f32 %v4507_v26, %v362_v63 }
  0x36   : > { %v1382_v20 = vrot.slane %v1380_v9, 1  ;;  %v1002_v21 = vsel %vm4550_vm8, %v801_v10, %v1001_v56  ;;  %v809_v24 = vor.u32 %v807_v2, %v806_v13  ;;  %v340_v25 = vmul.f32 %v3560_v58, %v4499_v19  ;;  %v928_v56 = vld [vmem:[#allocation2 + $0x20] sm:$0x1]  ;;  %v4649_v10 = vld [vmem:[%s4486_s26 + $0x18] sm:$0xff]  }
  0x37   : > { %v4602_v23 = vld [vmem:[#allocation2 + $0x14] ss:$0 sps:$4 sm:$0x11]   ;;  %1003 = vst [vmem:[#allocation2 + $0x9c] sm:$0xf] %v1002_v21  ;;  %v4606_v27 = vadd.f32 %v4507_v26, %v339_v6  ;;  %v3607_v28 = vunpack.c.l.bf16 %v4595_v17  ;;  %v1378_v29 = vor.u32 %v1377_v18, %v1373_v7  ;;  %v811_v31 = vrot.slane %v806_v13, 4 }
  0x38   : > { %v4600_v22 = vld [vmem:[#allocation2 + $0xc] sm:$0xff]   ;;  %v609_v32 = vshrl.u32 %v3487_v15, 16  ;;  %v612_v33 = vshll.u32 %v3487_v15, 16  ;;  %v1248_v38 = vshll.u32 %v4602_v23, 16  ;;  %v810_v40 = vsel %vm4544_vm7, %v802_v11, %v809_v24  ;;  %v1008_v18 = vld [vmem:[#allocation2 + $0xa8] sm:$0xf] }
  0x39   : > { %v1241_v35 = vshrl.u32 %v4600_v22, 16  ;;  %v1243_v37 = vshll.u32 %v4600_v22, 16  ;;  %v4624_v42 = vsel %vm1227_vm1, %v1378_v29, %v1382_v20  ;;  %1004 = vst [vmem:[#allocation2 + $0xa0] sm:$0xf] %v810_v40  ;;  %v1006_v43 = vsel %vm4556_vm9, %v811_v31, %v1005_v14  ;;  %v4301_v6 = vld [vmem:[%s5801_s1 + $0xa8] sm:$0xff]   ;;  %v4302_v14 = vld [vmem:[%s5801_s1 + $0xe0] sm:$0xff]  }
  0x3a   : > { %v611_v44 = vrot.slane %v609_v32, 7  ;;  %v617_v45 = vshrl.u32 %v3488_v16, 16  ;;  %2264 = vmatprep.mubr.bf16.mxu1 %v4624_v42  ;;  %v1250_v47 = vrot.slane %v1248_v38, 1  ;;  %1007 = vst [vmem:[#allocation2 + $0xa4] sm:$0x1] %v1006_v43  ;;  %v620_v48 = vshll.u32 %v3488_v16, 16 }
  0x3b   : > { %v1245_v46 = vrot.slane %v1243_v37, 1  ;;  %v432_v49 = vmax.f32 %v400_v1, 0.0  ;;  %2265 = vmatmul.mubr.bf16.vlgmr.msra.gmra.mxu1 %v4286_v59  ;;  %v433_v53 = vmax.f32 %v401_v12, 0.0  ;;  %v379_v60 = vadd.f32 %v4507_v26, %v340_v25  ;;  %v4321_v59 = vld [vmem:[%s5801_s1 + $0x128] sm:$0xff]   ;;  %v1012_v12 = vld [vmem:[#allocation2 + $0xb0] sm:$0x1] }
  0x3c   : > { %v614_v50 = vor.u32 %v612_v33, %v611_v44  ;;  %v615_v51 = vrot.slane %v611_v44, 4  ;;  %v619_v52 = vrot.slane %v617_v45, 7  ;;  %3836 = vmatpush3.bf16.msra.mxu1 %v4292_v30  ;;  %v410_v61 = vmax.f32 %v4606_v27, 0.0  ;;  %3952 = vmatpush3.bf16.msra.mxu0 %v4321_v59  ;;  %v4304_v40 = vld [vmem:[%s5801_s1 + $0xa0] sm:$0xff]   ;;  %v4308_v45 = vld [vmem:[%s5801_s1 + $0xd8] sm:$0xff]  }
  0x3d   : > { %v1246_v54 = vor.u32 %v1245_v46, %v1241_v35  ;;  %v3511_v58 = vpack.c.bf16 %v432_v49, %v432_v49  ;;  %3837 = vmatprep.subr.bf16.mxu1 %v4294_v39  ;;  %v3512_v4 = vpack.c.bf16 %v433_v53, %v433_v53  ;;  %v411_v9 = vmax.f32 %v379_v60, 0.0  ;;  %v935_v53 = vld [vmem:[#allocation2 + $0x2c] sm:$0x1] }
  0x3e   : > { %v622_v63 = vor.u32 %v620_v48, %v619_v52  ;;  %v624_v1 = vrot.slane %v619_v52, 4  ;;  %v925_v2 = vsel %vm4550_vm8, %v614_v50, %v924_v41  ;;  %v3489_v24 = vpack.c.bf16 %v410_v61, %v410_v61  ;;  %v931_v48 = vld [vmem:[#allocation2 + $0x24] sm:$0xf] }
  0x3f   : > { %v4643_v5 = vsel %vm1227_vm1, %v1246_v54, %v1250_v47  ;;  %926 = vst [vmem:[#allocation2 + $0x18] sm:$0xf] %v925_v2  ;;  %v813_v7 = vshrl.u32 %v3511_v58, 16  ;;  %v816_v8 = vshll.u32 %v3511_v58, 16  ;;  %v821_v15 = vshrl.u32 %v3512_v4, 16  ;;  %v4311_v58 = vld [vmem:[%s5801_s1 + $0x98] sm:$0xff]  }
  0x40   : > { %2176 = vmatprep.mubr.bf16.mxu0 %v4643_v5  ;;  %v623_v11 = vsel %vm4544_vm7, %v615_v51, %v622_v63  ;;  %v929_v13 = vsel %vm4556_vm9, %v624_v1, %v928_v56  ;;  %v824_v16 = vshll.u32 %v3512_v4, 16  ;;  %3838 = vmatpush3.bf16.msra.mxu1 %v4295_v55  ;;  %v4660_v20 = vld [vmem:[#allocation2 + $0x9c] sm:$0xff]   ;;  %v3490_v25 = vpack.c.bf16 %v411_v9, %v411_v9 }
  0x41   : > { %2177 = vmatmul.mubr.bf16.gmra.mxu0 %v4600_v22  ;;  %927 = vst [vmem:[#allocation2 + $0x1c] sm:$0xf] %v623_v11  ;;  %930 = vst [vmem:[#allocation2 + $0x20] sm:$0x1] %v929_v13  ;;  %v815_v21 = vrot.slane %v813_v7, 7  ;;  %v3608_v27 = vunpack.c.h.bf16 %v4595_v17  ;;  %3839 = vmatprep.subr.bf16.mxu1 %v4298_v62  ;;  %v823_v30 = vrot.slane %v821_v15, 7  ;;  %v363_v31 = vmul.f32 %v3607_v28, %v4499_v19 }
  0x42   : > { %v4297_v29 = vld [vmem:[#allocation2 + $0xa4] ss:$0 sps:$4 sm:$0x11]   ;;  %v3563_v32 = vunpack.c.l.bf16 %v4649_v10  ;;  %v3564_v33 = vunpack.c.h.bf16 %v4649_v10  ;;  %v1385_v34 = vshrl.u32 %v4660_v20, 16  ;;  %v1387_v35 = vshll.u32 %v4660_v20, 16 }
  0x43   : > { %v818_v37 = vor.u32 %v816_v8, %v815_v21  ;;  %v819_v38 = vrot.slane %v815_v21, 4  ;;  %v1392_v39 = vshll.u32 %v4297_v29, 16  ;;  %v826_v41 = vor.u32 %v824_v16, %v823_v30  ;;  %v4312_v8 = vld [vmem:[%s5801_s1 + $0xd0] sm:$0xff]   ;;  %v4700_v11 = vld [vmem:[%s4486_s26 + $0x20] sm:$0xff]  }
  0x44   : > { %v828_v43 = vrot.slane %v823_v30, 4  ;;  %v626_v44 = vshrl.u32 %v3489_v24, 16  ;;  %v1389_v17 = vrot.slane %v1387_v35, 1  ;;  %3840 = vmatpush3.bf16.msra.mxu1 %v4301_v6  ;;  %v629_v46 = vshll.u32 %v3489_v24, 16 }
  0x45   : > { %v1009_v28 = vsel %vm4550_vm8, %v818_v37, %v1008_v18  ;;  %v634_v47 = vshrl.u32 %v3490_v25, 16  ;;  %v1394_v49 = vrot.slane %v1392_v39, 1  ;;  %3841 = vmatprep.subr.bf16.mxu1 %v4302_v14  ;;  %v827_v50 = vsel %vm4544_vm7, %v819_v38, %v826_v41  ;;  %v4328_v18 = vld [vmem:[%s5801_s1 + $0x160] sm:$0xff]  }
  0x46   : > { %1010 = vst [vmem:[#allocation2 + $0xa8] sm:$0xf] %v1009_v28  ;;  %v1013_v51 = vsel %vm4556_vm9, %v828_v43, %v1012_v12  ;;  %v628_v52 = vrot.slane %v626_v44, 7  ;;  %v1390_v54 = vor.u32 %v1389_v17, %v1385_v34  ;;  %1011 = vst [vmem:[#allocation2 + $0xac] sm:$0xf] %v827_v50  ;;  %v637_v56 = vshll.u32 %v3490_v25, 16  ;;  %3953 = vmatprep.subr.bf16.mxu0 %v4328_v18 }
  0x47   : > { %1014 = vst [vmem:[#allocation2 + $0xb0] sm:$0x1] %v1013_v51  ;;  %v636_v55 = vrot.slane %v634_v47, 7  ;;  %v364_v60 = vmul.f32 %v3608_v27, %v4499_v19  ;;  %v402_v63 = vadd.f32 %v4507_v26, %v363_v31  ;;  %v341_v1 = vmul.f32 %v3563_v32, %v4499_v19  ;;  %v4313_v25 = vld [vmem:[%s5801_s1 + $0x90] sm:$0xff]   ;;  %v4329_v34 = vld [vmem:[%s5801_s1 + $0x120] sm:$0xff]  }
  0x48   : > { %v4686_v61 = vld [vmem:[#allocation2 + $0x18] sm:$0xff]   ;;  %v631_v59 = vor.u32 %v629_v46, %v628_v52  ;;  %v632_v62 = vrot.slane %v628_v52, 4  ;;  %v4691_v2 = vsel %vm1227_vm1, %v1390_v54, %v1394_v49  ;;  %v4693_v4 = vld [vmem:[#allocation2 + $0x20] ss:$0 sps:$4 sm:$0x11]   ;;  %3842 = vmatpush3.bf16.msra.mxu1 %v4304_v40  ;;  %v342_v31 = vmul.f32 %v3564_v33, %v4499_v19  ;;  %v4732_v40 = vld [vmem:[%s4486_s26 + $0x28] sm:$0xff]   ;;  %3954 = vmatpush3.bf16.msra.mxu0 %v4329_v34 }
  0x49   : > { %v639_v6 = vor.u32 %v637_v56, %v636_v55  ;;  %v641_v7 = vrot.slane %v636_v55, 4  ;;  %v403_v9 = vadd.f32 %v4507_v26, %v364_v60  ;;  %2272 = vmatprep.mubr.bf16.mxu1 %v4691_v2  ;;  %v1253_v13 = vshrl.u32 %v4686_v61, 16  ;;  %3843 = vmatprep.subr.bf16.mxu1 %v4308_v45  ;;  %v1015_v52 = vld [vmem:[#allocation2 + $0xb4] sm:$0xf]  ;;  %v1019_v56 = vld [vmem:[#allocation2 + $0xbc] sm:$0x1] }
  0x4a   : > { %v1255_v14 = vshll.u32 %v4686_v61, 16  ;;  %v932_v15 = vsel %vm4550_vm8, %v631_v59, %v931_v48  ;;  %v434_v16 = vmax.f32 %v402_v63, 0.0  ;;  %v1260_v21 = vshll.u32 %v4693_v4, 16  ;;  %2273 = vmatmul.mubr.bf16.gmra.mxu1 %v4660_v20  ;;  %v4316_v20 = vld [vmem:[%s5801_s1 + $0xc8] sm:$0xff]  }
  0x4b   : > { %v640_v12 = vsel %vm4544_vm7, %v632_v62, %v639_v6  ;;  %933 = vst [vmem:[#allocation2 + $0x24] sm:$0xf] %v932_v15  ;;  %v936_v24 = vsel %vm4556_vm9, %v641_v7, %v935_v53  ;;  %v435_v27 = vmax.f32 %v403_v9, 0.0  ;;  %v380_v32 = vadd.f32 %v4507_v26, %v341_v1  ;;  %v4332_v53 = vld [vmem:[%s5801_s1 + $0x158] sm:$0xff]   ;;  %v4320_v59 = vld [vmem:[%s5801_s1 + $0x88] sm:$0xff]   ;;  %v4322_v62 = vld [vmem:[%s5801_s1 + $0xc0] sm:$0xff]  }
  0x4c   : > { %v1257_v29 = vrot.slane %v1255_v14, 1  ;;  %934 = vst [vmem:[#allocation2 + $0x28] sm:$0xf] %v640_v12  ;;  %937 = vst [vmem:[#allocation2 + $0x2c] sm:$0x1] %v936_v24  ;;  %v3513_v30 = vpack.c.bf16 %v434_v16, %v434_v16  ;;  %v1262_v35 = vrot.slane %v1260_v21, 1  ;;  %3844 = vmatpush3.bf16.msra.mxu1 %v4311_v58  ;;  %v3567_v38 = vunpack.c.l.bf16 %v4700_v11  ;;  %3955 = vmatprep.subr.bf16.mxu0 %v4332_v53 }
  0x4d   : > { %v3514_v37 = vpack.c.bf16 %v435_v27, %v435_v27  ;;  %v3568_v39 = vunpack.c.h.bf16 %v4700_v11  ;;  %v4734_v43 = vld [vmem:[#allocation2 + $0xa8] sm:$0xff]   ;;  %3845 = vmatprep.subr.bf16.mxu1 %v4312_v8  ;;  %v381_v33 = vadd.f32 %v4507_v26, %v342_v31  ;;  %v3571_v44 = vunpack.c.l.bf16 %v4732_v40 }
  0x4e   : > { %v1258_v41 = vor.u32 %v1257_v29, %v1253_v13  ;;  %v830_v10 = vshrl.u32 %v3513_v30, 16  ;;  %v4307_v17 = vld [vmem:[#allocation2 + $0xb0] ss:$0 sps:$4 sm:$0x11]   ;;  %v833_v28 = vshll.u32 %v3513_v30, 16  ;;  %v343_v47 = vmul.f32 %v3567_v38, %v4499_v19  ;;  %v4323_v30 = vld [vmem:[%s5801_s1 + $0x80] sm:$0xff]  }
  0x4f   : > { %v838_v45 = vshrl.u32 %v3514_v37, 16  ;;  %v841_v46 = vshll.u32 %v3514_v37, 16  ;;  %v1397_v49 = vshrl.u32 %v4734_v43, 16  ;;  %v1399_v50 = vshll.u32 %v4734_v43, 16  ;;  %v4336_v37 = vld [vmem:[%s5801_s1 + $0x118] sm:$0xff]  }
  0x50   : > { %v4740_v48 = vsel %vm1227_vm1, %v1258_v41, %v1262_v35  ;;  %v832_v51 = vrot.slane %v830_v10, 7  ;;  %v1404_v54 = vshll.u32 %v4307_v17, 16  ;;  %3846 = vmatpush3.bf16.msra.mxu1 %v4313_v25  ;;  %v412_v58 = vmax.f32 %v380_v32, 0.0  ;;  %v4324_v35 = vld [vmem:[%s5801_s1 + $0x1f8] sm:$0xff]   ;;  %v938_v17 = vld [vmem:[#allocation2 + $0x30] sm:$0xf]  ;;  %3956 = vmatpush3.bf16.msra.mxu0 %v4336_v37 }
  0x51   : > { %2184 = vmatprep.mubr.bf16.mxu0 %v4740_v48  ;;  %v840_v55 = vrot.slane %v838_v45, 7  ;;  %v413_v60 = vmax.f32 %v381_v33, 0.0  ;;  %v1401_v63 = vrot.slane %v1399_v50, 1  ;;  %3847 = vmatprep.subr.bf16.mxu1 %v4316_v20  ;;  %v344_v7 = vmul.f32 %v3568_v39, %v4499_v19 }
  0x52   : > { %2185 = vmatmul.mubr.bf16.gmra.mxu0 %v4686_v61  ;;  %v835_v1 = vor.u32 %v833_v28, %v832_v51  ;;  %v836_v6 = vrot.slane %v832_v51, 4  ;;  %v1406_v8 = vrot.slane %v1404_v54, 1  ;;  %v3491_v13 = vpack.c.bf16 %v412_v58, %v412_v58 }
  0x53   : > { %v4756_v9 = vld [vmem:[#allocation2 + $0x24] sm:$0xff]   ;;  %v843_v11 = vor.u32 %v841_v46, %v840_v55  ;;  %v3492_v14 = vpack.c.bf16 %v413_v60, %v413_v60  ;;  %v1402_v15 = vor.u32 %v1401_v63, %v1397_v49  ;;  %v4758_v16 = vld [vmem:[#allocation2 + $0x2c] ss:$0 sps:$4 sm:$0x11]   ;;  %v845_v18 = vrot.slane %v840_v55, 4  ;;  %v4797_v63 = vld [vmem:[%s4486_s26 + $0x38] sm:$0xff]  }
  0x54   : > { %v1016_v21 = vsel %vm4550_vm8, %v835_v1, %v1015_v52  ;;  %v382_v12 = vadd.f32 %v4507_v26, %v343_v47  ;;  %v1265_v24 = vshrl.u32 %v4756_v9, 16  ;;  %v1267_v25 = vshll.u32 %v4756_v9, 16  ;;  %3848 = vmatpush3.bf16.msra.mxu1 %v4320_v59  ;;  %v942_v52 = vld [vmem:[#allocation2 + $0x38] sm:$0x1]  ;;  %v4340_v1 = vld [vmem:[%s5801_s1 + $0x150] sm:$0xff]  }
  0x55   : > { %v844_v27 = vsel %vm4544_vm7, %v836_v6, %v843_v11  ;;  %1017 = vst [vmem:[#allocation2 + $0xb4] sm:$0xf] %v1016_v21  ;;  %v643_v29 = vshrl.u32 %v3491_v13, 16  ;;  %v4771_v20 = vsel %vm1227_vm1, %v1402_v15, %v1406_v8  ;;  %v1272_v31 = vshll.u32 %v4758_v16, 16  ;;  %3849 = vmatprep.subr.bf16.mxu1 %v4322_v62  ;;  %v3698_v62 = vld [vmem:[%s4486_s26 + $0x30] sm:$0xff]   ;;  %3957 = vmatprep.subr.bf16.mxu0 %v4340_v1 }
  0x56   : > { %1018 = vst [vmem:[#allocation2 + $0xb8] sm:$0xf] %v844_v27  ;;  %v1020_v32 = vsel %vm4556_vm9, %v845_v18, %v1019_v56  ;;  %v646_v34 = vshll.u32 %v3491_v13, 16  ;;  %2280 = vmatprep.mubr.bf16.mxu1 %v4771_v20  ;;  %v1269_v38 = vrot.slane %v1267_v25, 1  ;;  %v651_v41 = vshrl.u32 %v3492_v14, 16 }
  0x57   : > { %1021 = vst [vmem:[#allocation2 + $0xbc] sm:$0x1] %v1020_v32  ;;  %v645_v39 = vrot.slane %v643_v29, 7  ;;  %v654_v10 = vshll.u32 %v3492_v14, 16  ;;  %v1274_v33 = vrot.slane %v1272_v31, 1  ;;  %2281 = vmatmul.mubr.bf16.gmra.mxu1 %v4734_v43  ;;  %v383_v28 = vadd.f32 %v4507_v26, %v344_v7 }
  0x58   : > { %v414_v45 = vmax.f32 %v382_v12, 0.0  ;;  %v3572_v46 = vunpack.c.h.bf16 %v4732_v40  ;;  %v1270_v47 = vor.u32 %v1269_v38, %v1265_v24  ;;  %v653_v51 = vrot.slane %v651_v41, 7  ;;  %3850 = vmatpush3.bf16.msra.mxu1 %v4323_v30  ;;  %v945_v13 = vld [vmem:[#allocation2 + $0x3c] sm:$0xf]  ;;  %v952_v1 = vld [vmem:[#allocation2 + $0x48] sm:$0xf] }
  0x59   : > { %v648_v49 = vor.u32 %v646_v34, %v645_v39  ;;  %v649_v50 = vrot.slane %v645_v39, 4  ;;  %4059 = vmatprep.subr.bf16.mxu1 %v4324_v35  ;;  %v415_v53 = vmax.f32 %v383_v28, 0.0  ;;  %v345_v43 = vmul.f32 %v3571_v44, %v4499_v19 }
  0x5a   : > { %v3493_v54 = vpack.c.bf16 %v414_v45, %v414_v45  ;;  %v346_v55 = vmul.f32 %v3572_v46, %v4499_v19  ;;  %v4791_v56 = vsel %vm1227_vm1, %v1270_v47, %v1274_v33  ;;  %v656_v58 = vor.u32 %v654_v10, %v653_v51  ;;  %v4820_v45 = vld [vmem:[%s5803_s3] ss:$0 sm:$0xff] }
  0x5b   : > { %v658_v60 = vrot.slane %v653_v51, 4  ;;  %v939_v59 = vsel %vm4550_vm8, %v648_v49, %v938_v17  ;;  %2192 = vmatprep.mubr.bf16.mxu0 %v4791_v56  ;;  %v3494_v40 = vpack.c.bf16 %v415_v53, %v415_v53  ;;  %v384_v6 = vadd.f32 %v4507_v26, %v345_v43  ;;  %v949_v17 = vld [vmem:[#allocation2 + $0x44] sm:$0x1] }
  0x5c   : > { %940 = vst [vmem:[#allocation2 + $0x30] sm:$0xf] %v939_v59  ;;  %v660_v19 = vshrl.u32 %v3493_v54, 16  ;;  %v663_v44 = vshll.u32 %v3493_v54, 16  ;;  %2193 = vmatmul.mubr.bf16.gmra.mxu0 %v4756_v9  ;;  %v657_v8 = vsel %vm4544_vm7, %v649_v50, %v656_v58  ;;  %v385_v14 = vadd.f32 %v4507_v26, %v346_v55  ;;  %v4341_v26 = vld [vmem:[%s5801_s1 + $0x110] sm:$0xff]  }
  0x5d   : > { %v4314_v7 = vld [vmem:[#allocation2 + $0xb4] sm:$0xff]   ;;  %v943_v11 = vsel %vm4556_vm9, %v658_v60, %v942_v52  ;;  %v1440_v15 = vrot.slane %v4600_v22, 1  ;;  %941 = vst [vmem:[#allocation2 + $0x34] sm:$0xf] %v657_v8  ;;  %v3575_v12 = vunpack.c.l.bf16 %v3698_v62  ;;  %v3576_v24 = vunpack.c.h.bf16 %v3698_v62  ;;  %3958 = vmatpush3.bf16.msra.mxu0 %v4341_v26  ;;  %v4840_v8 = vld [vmem:[%s5804_s4] ss:$0 sm:$0xff] }
  0x5e   : > { %v4315_v18 = vld [vmem:[#allocation2 + $0xbc] ss:$0 sps:$4 sm:$0x11]   ;;  %944 = vst [vmem:[#allocation2 + $0x38] sm:$0x1] %v943_v11  ;;  %v662_v21 = vrot.slane %v660_v19, 7  ;;  %v3579_v35 = vunpack.c.l.bf16 %v4797_v63 }
  0x5f   : > { %v1409_v25 = vshrl.u32 %v4314_v7, 16  ;;  %v1411_v27 = vshll.u32 %v4314_v7, 16  ;;  %v668_v29 = vshrl.u32 %v3494_v40, 16  ;;  %v671_v30 = vshll.u32 %v3494_v40, 16 }
  0x60   : > { %v1416_v31 = vshll.u32 %v4315_v18, 16  ;;  %v665_v32 = vor.u32 %v663_v44, %v662_v21  ;;  %v416_v34 = vmax.f32 %v384_v6, 0.0  ;;  %v666_v38 = vrot.slane %v662_v21, 4  ;;  %v956_v6 = vld [vmem:[#allocation2 + $0x50] sm:$0x1] }
  0x61   : > { %v1413_v37 = vrot.slane %v1411_v27, 1  ;;  %v670_v39 = vrot.slane %v668_v29, 7  ;;  %v417_v41 = vmax.f32 %v385_v14, 0.0  ;;  %v347_v46 = vmul.f32 %v4820_v45, %v3575_v12  ;;  %v4346_v14 = vld [vmem:[%s5801_s1 + $0x148] sm:$0xff]  }
  0x62   : > { %v1418_v10 = vrot.slane %v1416_v31, 1  ;;  %v946_v33 = vsel %vm4550_vm8, %v665_v32, %v945_v13  ;;  %v3495_v28 = vpack.c.bf16 %v416_v34, %v416_v34  ;;  %v1441_v54 = vrot.slane %v4602_v23, 1  ;;  %3959 = vmatprep.subr.bf16.mxu0 %v4346_v14 }
  0x63   : > { %v1414_v47 = vor.u32 %v1413_v37, %v1409_v25  ;;  %v673_v49 = vor.u32 %v671_v30, %v670_v39  ;;  %v675_v50 = vrot.slane %v670_v39, 4  ;;  %947 = vst [vmem:[#allocation2 + $0x3c] sm:$0xf] %v946_v33  ;;  %v3496_v51 = vpack.c.bf16 %v417_v41, %v417_v41 }
  0x64   : > { %v677_v52 = vshrl.u32 %v3495_v28, 16  ;;  %v680_v53 = vshll.u32 %v3495_v28, 16  ;;  %v348_v43 = vmul.f32 %v4820_v45, %v3576_v24  ;;  %v4828_v58 = vld [vmem:[#allocation2 + $0x30] sm:$0xff]   ;;  %v386_v11 = vadd.f32 %v4840_v8, %v347_v46 }
  0x65   : > { %v4826_v55 = vsel %vm1227_vm1, %v1414_v47, %v1418_v10  ;;  %v674_v60 = vsel %vm4544_vm7, %v666_v38, %v673_v49  ;;  %v950_v59 = vsel %vm4556_vm9, %v675_v50, %v949_v17  ;;  %v685_v62 = vshrl.u32 %v3496_v51, 16  ;;  %v4835_v40 = vld [vmem:[#allocation2 + $0x38] ss:$0 sps:$4 sm:$0x11]   ;;  %v4333_v46 = vld [vmem:[%s5801_s1 + $0x1f0] sm:$0xff]   ;;  %v4869_v49 = vld [vmem:[%s4486_s26 + $0x40] sm:$0xff]  }
  0x66   : > { %2288 = vmatprep.mubr.bf16.mxu1 %v4826_v55  ;;  %948 = vst [vmem:[#allocation2 + $0x40] sm:$0xf] %v674_v60  ;;  %951 = vst [vmem:[#allocation2 + $0x44] sm:$0x1] %v950_v59  ;;  %v679_v19 = vrot.slane %v677_v52, 7  ;;  %v688_v44 = vshll.u32 %v3496_v51, 16  ;;  %v387_v13 = vadd.f32 %v4840_v8, %v348_v43  ;;  %v3580_v52 = vunpack.c.h.bf16 %v4797_v63 }
  0x67   : > { %v1277_v18 = vshrl.u32 %v4828_v58, 16  ;;  %v1279_v21 = vshll.u32 %v4828_v58, 16  ;;  %2289 = vmatmul.mubr.bf16.gmra.mxu1 %v4314_v7  ;;  %v687_v12 = vrot.slane %v685_v62, 7  ;;  %v1443_v24 = vrot.slane %v4686_v61, 1  ;;  %v4349_v7 = vld [vmem:[%s5801_s1 + $0x108] sm:$0xff]   ;;  %v4327_v38 = vld [vmem:[%s5801_s1 + $0x1b8] sm:$0xff]  }
  0x68   : > { %v1284_v25 = vshll.u32 %v4835_v40, 16  ;;  %2329 = vmatprep.mubr.bf16.mxu1 %v4600_v22  ;;  %v682_v27 = vor.u32 %v680_v53, %v679_v19  ;;  %v683_v29 = vrot.slane %v679_v19, 4  ;;  %v418_v30 = vmax.f32 %v386_v11, 0.0  ;;  %3960 = vmatpush3.bf16.msra.mxu0 %v4349_v7 }
  0x69   : > { %v1281_v31 = vrot.slane %v1279_v21, 1  ;;  %v690_v32 = vor.u32 %v688_v44, %v687_v12  ;;  %v692_v34 = vrot.slane %v687_v12, 4  ;;  %v419_v26 = vmax.f32 %v387_v13, 0.0 }
  0x6a   : > { %v1286_v37 = vrot.slane %v1284_v25, 1  ;;  %v953_v39 = vsel %vm4550_vm8, %v682_v27, %v952_v1  ;;  %v3497_v41 = vpack.c.bf16 %v418_v30, %v418_v30  ;;  %v1444_v10 = vrot.slane %v4693_v4, 1  ;;  %v963_v25 = vld [vmem:[#allocation2 + $0x5c] sm:$0x1]  ;;  %v4337_v27 = vld [vmem:[%s5801_s1 + $0x1b0] sm:$0xff]  }
  0x6b   : > { %v1282_v33 = vor.u32 %v1281_v31, %v1277_v18  ;;  %v691_v17 = vsel %vm4544_vm7, %v683_v29, %v690_v32  ;;  %954 = vst [vmem:[#allocation2 + $0x48] sm:$0xf] %v953_v39  ;;  %v957_v28 = vsel %vm4556_vm9, %v692_v34, %v956_v6  ;;  %v3498_v47 = vpack.c.bf16 %v419_v26, %v419_v26  ;;  %v4354_v26 = vld [vmem:[%s5801_s1 + $0x140] sm:$0xff]  }
  0x6c   : > { %955 = vst [vmem:[#allocation2 + $0x4c] sm:$0xf] %v691_v17  ;;  %958 = vst [vmem:[#allocation2 + $0x50] sm:$0x1] %v957_v28  ;;  %v694_v50 = vshrl.u32 %v3497_v41, 16  ;;  %v697_v51 = vshll.u32 %v3497_v41, 16  ;;  %v349_v59 = vmul.f32 %v4820_v45, %v3579_v35  ;;  %v350_v44 = vmul.f32 %v4820_v45, %v3580_v52  ;;  %3961 = vmatprep.subr.bf16.mxu0 %v4354_v26 }
  0x6d   : > { %v4873_v53 = vsel %vm1227_vm1, %v1282_v33, %v1286_v37  ;;  %v4875_v43 = vld [vmem:[#allocation2 + $0x3c] sm:$0xff]   ;;  %v702_v60 = vshrl.u32 %v3498_v47, 16  ;;  %v4881_v62 = vld [vmem:[#allocation2 + $0x44] ss:$0 sps:$4 sm:$0x11]   ;;  %v705_v19 = vshll.u32 %v3498_v47, 16  ;;  %v3583_v6 = vunpack.c.l.bf16 %v4869_v49 }
  0x6e   : > { %2200 = vmatprep.mubr.bf16.mxu0 %v4873_v53  ;;  %v696_v1 = vrot.slane %v694_v50, 7  ;;  %v1289_v11 = vshrl.u32 %v4875_v43, 16  ;;  %v1291_v13 = vshll.u32 %v4875_v43, 16  ;;  %v959_v35 = vld [vmem:[#allocation2 + $0x54] sm:$0xf]  ;;  %v388_v14 = vadd.f32 %v4840_v8, %v349_v59  ;;  %v4345_v41 = vld [vmem:[%s5801_s1 + $0x1a8] sm:$0xff]  }
  0x6f   : > { %2201 = vmatmul.mubr.bf16.gmra.mxu0 %v4828_v58  ;;  %2330 = vmatmul.mubr.bf16.vlgmr.msra.gmra.mxu1 %v4522_v36  ;;  %v704_v63 = vrot.slane %v702_v60, 7  ;;  %v1296_v18 = vshll.u32 %v4881_v62, 16  ;;  %v389_v29 = vadd.f32 %v4840_v8, %v350_v44  ;;  %v4342_v36 = vld [vmem:[%s5801_s1 + $0x1e8] sm:$0xff]   ;;  %v1446_v39 = vrot.slane %v4756_v9, 1  ;;  %v4355_v33 = vld [vmem:[%s5801_s1 + $0x100] sm:$0xff]  }
  0x70   : > { %4060 = vmatpush3.bf16.msra.mxu1 %v4327_v38  ;;  %2337 = vmatprep.mubr.bf16.mxu1 %v4686_v61  ;;  %v699_v21 = vor.u32 %v697_v51, %v696_v1  ;;  %v700_v12 = vrot.slane %v696_v1, 4  ;;  %v1293_v30 = vrot.slane %v1291_v13, 1  ;;  %v420_v34 = vmax.f32 %v388_v14, 0.0 }
  0x71   : > { %4061 = vmatprep.subr.bf16.mxu1 %v4333_v46  ;;  %v707_v31 = vor.u32 %v705_v19, %v704_v63  ;;  %v709_v32 = vrot.slane %v704_v63, 4  ;;  %v1298_v7 = vrot.slane %v1296_v18, 1  ;;  %v421_v38 = vmax.f32 %v389_v29, 0.0  ;;  %v4350_v19 = vld [vmem:[%s5801_s1 + $0x1e0] sm:$0xff]   ;;  %3962 = vmatpush3.bf16.msra.mxu0 %v4355_v33  ;;  %v4358_v33 = vld [vmem:[%s5801_s1 + $0x198] sm:$0xff]  }
  0x72   : > { %v960_v37 = vsel %vm4550_vm8, %v699_v21, %v959_v35  ;;  %v1294_v17 = vor.u32 %v1293_v30, %v1289_v11  ;;  %v3499_v50 = vpack.c.bf16 %v420_v34, %v420_v34  ;;  %v4924_v52 = vsel %vm1436_vm0, %v1440_v15, %v1441_v54  ;;  %v966_v63 = vld [vmem:[#allocation2 + $0x60] sm:$0xf]  ;;  %v3701_v35 = vld [vmem:[%s4486_s26 + $0x48] sm:$0xff]  }
  0x73   : > { %v4911_v28 = vld [vmem:[#allocation2 + $0x48] sm:$0xff]   ;;  %v708_v46 = vsel %vm4544_vm7, %v700_v12, %v707_v31  ;;  %961 = vst [vmem:[#allocation2 + $0x54] sm:$0xf] %v960_v37  ;;  %v964_v47 = vsel %vm4556_vm9, %v709_v32, %v963_v25  ;;  %v4917_v51 = vld [vmem:[#allocation2 + $0x50] ss:$0 sps:$4 sm:$0x11]   ;;  %v3500_v60 = vpack.c.bf16 %v421_v38, %v421_v38  ;;  %v3584_v59 = vunpack.c.h.bf16 %v4869_v49 }
  0x74   : > { %962 = vst [vmem:[#allocation2 + $0x58] sm:$0xf] %v708_v46  ;;  %965 = vst [vmem:[#allocation2 + $0x5c] sm:$0x1] %v964_v47  ;;  %4062 = vmatpush3.bf16.msra.mxu1 %v4337_v27  ;;  %v351_v1 = vmul.f32 %v4820_v45, %v3583_v6  ;;  %v4932_v23 = vsel %vm1227_vm1, %v1294_v17, %v1298_v7  ;;  %v1301_v22 = vshrl.u32 %v4911_v28, 16  ;;  %v1303_v15 = vshll.u32 %v4911_v28, 16 }
  0x75   : > { %v711_v54 = vshrl.u32 %v3499_v50, 16  ;;  %4063 = vmatprep.subr.bf16.mxu1 %v4342_v36  ;;  %v4939_v49 = vld [vmem:[%s5801_s1 + $0x238] sm:$0xff]   ;;  %2208 = vmatprep.mubr.bf16.mxu0 %v4932_v23  ;;  %v1308_v44 = vshll.u32 %v4917_v51, 16  ;;  %v714_v6 = vshll.u32 %v3499_v50, 16  ;;  %v719_v11 = vshrl.u32 %v3500_v60, 16  ;;  %v4353_v30 = vld [vmem:[%s5801_s1 + $0x1a0] sm:$0xff]  }
  0x76   : > { %v722_v13 = vshll.u32 %v3500_v60, 16  ;;  %v1305_v14 = vrot.slane %v1303_v15, 1  ;;  %v970_v21 = vld [vmem:[#allocation2 + $0x68] sm:$0x1]  ;;  %v352_v12 = vmul.f32 %v4820_v45, %v3584_v59  ;;  %v390_v25 = vadd.f32 %v4840_v8, %v351_v1  ;;  %v4356_v7 = vld [vmem:[%s5801_s1 + $0x1d8] sm:$0xff]   ;;  %4195 = vmatprep.subr.bf16.mxu0 %v4939_v49  ;;  %v4359_v1 = vld [vmem:[%s5801_s1 + $0x1d0] sm:$0xff]  }
  0x77   : > { %2209 = vmatmul.mubr.bf16.gmra.mxu0 %v4875_v43  ;;  %2338 = vmatmul.mubr.bf16.gmra.mxu1 %v4924_v52  ;;  %v713_v18 = vrot.slane %v711_v54, 7  ;;  %v1310_v27 = vrot.slane %v1308_v44, 1  ;;  %v721_v29 = vrot.slane %v719_v11, 7  ;;  %v1447_v36 = vrot.slane %v4758_v16, 1 }
  0x78   : > { %2345 = vmatprep.mubr.bf16.mxu1 %v4756_v9  ;;  %4064 = vmatpush3.bf16.msra.mxu1 %v4345_v41  ;;  %v1306_v31 = vor.u32 %v1305_v14, %v1301_v22  ;;  %v391_v26 = vadd.f32 %v4840_v8, %v352_v12  ;;  %v4963_v16 = vsel %vm1436_vm0, %v1443_v24, %v1444_v10  ;;  %v422_v41 = vmax.f32 %v390_v25, 0.0  ;;  %v3702_v12 = vld [vmem:[%s4486_s26 + $0x50] sm:$0xff]   ;;  %v4362_v9 = vld [vmem:[%s5801_s1 + $0x1c8] sm:$0xff]  }
  0x79   : > { %v716_v32 = vor.u32 %v714_v6, %v713_v18  ;;  %v717_v34 = vrot.slane %v713_v18, 4  ;;  %4065 = vmatprep.subr.bf16.mxu1 %v4350_v19  ;;  %v724_v37 = vor.u32 %v722_v13, %v721_v29  ;;  %v726_v38 = vrot.slane %v721_v29, 4  ;;  %v973_v18 = vld [vmem:[#allocation2 + $0x6c] sm:$0xf] }
  0x7a   : > { %v4969_v17 = vsel %vm1227_vm1, %v1306_v31, %v1310_v27  ;;  %v423_v47 = vmax.f32 %v391_v26, 0.0  ;;  %v3587_v61 = vunpack.c.l.bf16 %v3701_v35  ;;  %v3501_v60 = vpack.c.bf16 %v422_v41, %v422_v41 }
  0x7b   : > { %v4971_v46 = vld [vmem:[#allocation2 + $0x54] sm:$0xff]   ;;  %v967_v4 = vsel %vm4550_vm8, %v716_v32, %v966_v63  ;;  %2216 = vmatprep.mubr.bf16.mxu0 %v4969_v17  ;;  %v4976_v24 = vld [vmem:[#allocation2 + $0x5c] ss:$0 sps:$4 sm:$0x11]   ;;  %v725_v10 = vsel %vm4544_vm7, %v717_v34, %v724_v37  ;;  %v971_v50 = vsel %vm4556_vm9, %v726_v38, %v970_v21  ;;  %v3588_v59 = vunpack.c.h.bf16 %v3701_v35 }
  0x7c   : > { %968 = vst [vmem:[#allocation2 + $0x60] sm:$0xf] %v967_v4  ;;  %4066 = vmatpush3.bf16.msra.mxu1 %v4353_v30  ;;  %v1313_v19 = vshrl.u32 %v4971_v46, 16  ;;  %v1315_v22 = vshll.u32 %v4971_v46, 16  ;;  %969 = vst [vmem:[#allocation2 + $0x64] sm:$0xf] %v725_v10  ;;  %v3502_v15 = vpack.c.bf16 %v423_v47, %v423_v47  ;;  %v353_v54 = vmul.f32 %v4820_v45, %v3587_v61 }
  0x7d   : > { %972 = vst [vmem:[#allocation2 + $0x68] sm:$0x1] %v971_v50  ;;  %4067 = vmatprep.subr.bf16.mxu1 %v4356_v7  ;;  %v1320_v44 = vshll.u32 %v4976_v24, 16  ;;  %v728_v6 = vshrl.u32 %v3501_v60, 16  ;;  %v731_v11 = vshll.u32 %v3501_v60, 16  ;;  %v354_v13 = vmul.f32 %v4820_v45, %v3588_v59  ;;  %v4361_v32 = vld [vmem:[%s5801_s1 + $0x190] sm:$0xff]  }
  0x7e   : > { %v1317_v63 = vrot.slane %v1315_v22, 1  ;;  %v736_v35 = vshrl.u32 %v3502_v15, 16  ;;  %v739_v14 = vshll.u32 %v3502_v15, 16  ;;  %v392_v21 = vadd.f32 %v4840_v8, %v353_v54  ;;  %v977_v30 = vld [vmem:[#allocation2 + $0x74] sm:$0x1] }
  0x7f   : > { %2217 = vmatmul.mubr.bf16.gmra.mxu0 %v4911_v28  ;;  %2346 = vmatmul.mubr.bf16.gmra.mxu1 %v4963_v16  ;;  %v1322_v25 = vrot.slane %v1320_v44, 1  ;;  %v4998_v27 = vsel %vm1436_vm0, %v1446_v39, %v1447_v36  ;;  %v730_v29 = vrot.slane %v728_v6, 7  ;;  %v393_v31 = vadd.f32 %v4840_v8, %v354_v13  ;;  %v4365_v6 = vld [vmem:[%s5801_s1 + $0x1c0] sm:$0xff]  }
  0x80   : > { %2353 = vmatprep.mubr.bf16.mxu1 %v4828_v58  ;;  %4068 = vmatpush3.bf16.msra.mxu1 %v4358_v33  ;;  %v1318_v34 = vor.u32 %v1317_v63, %v1313_v19  ;;  %v738_v26 = vrot.slane %v736_v35, 7  ;;  %v1449_v7 = vrot.slane %v4828_v58, 1  ;;  %v424_v37 = vmax.f32 %v392_v21, 0.0  ;;  %v4364_v58 = vld [vmem:[%s5801_s1 + $0x188] sm:$0xff]   ;;  %v980_v35 = vld [vmem:[#allocation2 + $0x78] sm:$0xf] }
  0x81   : > { %4069 = vmatprep.subr.bf16.mxu1 %v4359_v1  ;;  %v733_v39 = vor.u32 %v731_v11, %v730_v29  ;;  %v734_v36 = vrot.slane %v730_v29, 4  ;;  %v425_v38 = vmax.f32 %v393_v31, 0.0  ;;  %v3591_v41 = vunpack.c.l.bf16 %v3702_v12 }
  0x82   : > { %v5009_v33 = vsel %vm1227_vm1, %v1318_v34, %v1322_v25  ;;  %v741_v4 = vor.u32 %v739_v14, %v738_v26  ;;  %v743_v47 = vrot.slane %v738_v26, 4  ;;  %v3503_v61 = vpack.c.bf16 %v424_v37, %v424_v37 }
  0x83   : > { %2224 = vmatprep.mubr.bf16.mxu0 %v5009_v33  ;;  %v5015_v10 = vld [vmem:[#allocation2 + $0x60] sm:$0xff]   ;;  %v974_v50 = vsel %vm4550_vm8, %v733_v39, %v973_v18  ;;  %v1450_v60 = vrot.slane %v4835_v40, 1  ;;  %v3504_v59 = vpack.c.bf16 %v425_v38, %v425_v38  ;;  %v3592_v1 = vunpack.c.h.bf16 %v3702_v12 }
  0x84   : > { %4070 = vmatpush3.bf16.msra.mxu1 %v4361_v32  ;;  %v5020_v19 = vld [vmem:[#allocation2 + $0x68] ss:$0 sps:$4 sm:$0x11]   ;;  %v742_v22 = vsel %vm4544_vm7, %v734_v36, %v741_v4  ;;  %975 = vst [vmem:[#allocation2 + $0x6c] sm:$0xf] %v974_v50  ;;  %v978_v15 = vsel %vm4556_vm9, %v743_v47, %v977_v30  ;;  %v745_v54 = vshrl.u32 %v3503_v61, 16  ;;  %v355_v21 = vmul.f32 %v4820_v45, %v3591_v41 }
  0x85   : > { %v748_v44 = vshll.u32 %v3503_v61, 16  ;;  %4071 = vmatprep.subr.bf16.mxu1 %v4362_v9  ;;  %v1325_v40 = vshrl.u32 %v5015_v10, 16  ;;  %v1327_v11 = vshll.u32 %v5015_v10, 16  ;;  %976 = vst [vmem:[#allocation2 + $0x70] sm:$0xf] %v742_v22  ;;  %v753_v13 = vshrl.u32 %v3504_v59, 16 }
  0x86   : > { %979 = vst [vmem:[#allocation2 + $0x74] sm:$0x1] %v978_v15  ;;  %v756_v63 = vshll.u32 %v3504_v59, 16  ;;  %v1332_v14 = vshll.u32 %v5020_v19, 16  ;;  %v747_v18 = vrot.slane %v745_v54, 7  ;;  %v356_v12 = vmul.f32 %v4820_v45, %v3592_v1 }
  0x87   : > { %2225 = vmatmul.mubr.bf16.gmra.mxu0 %v4971_v46  ;;  %2354 = vmatmul.mubr.bf16.gmra.mxu1 %v4998_v27  ;;  %v1329_v25 = vrot.slane %v1327_v11, 1  ;;  %v755_v29 = vrot.slane %v753_v13, 7  ;;  %v984_v30 = vld [vmem:[#allocation2 + $0x80] sm:$0x1]  ;;  %v394_v26 = vadd.f32 %v4840_v8, %v355_v21  ;;  %v5040_v38 = vsel %vm1436_vm0, %v1449_v7, %v1450_v60  ;;  %v3707_v21 = vld [vmem:[%s4486_s26 + $0x78] sm:$0xff]   ;;  %s262_s26 = scalar_lea.vmem %s5806_s6, %s3305_s17 }
  0x88   : > { %2361 = vmatprep.mubr.bf16.mxu1 %v4875_v43  ;;  %4072 = vmatpush3.bf16.msra.mxu1 %v4364_v58  ;;  %v1334_v31 = vrot.slane %v1332_v14, 1  ;;  %v750_v32 = vor.u32 %v748_v44, %v747_v18  ;;  %v751_v34 = vrot.slane %v747_v18, 4  ;;  %v395_v36 = vadd.f32 %v4840_v8, %v356_v12  ;;  %v4367_v7 = vld [vmem:[%s5801_s1 + $0x180] sm:$0xff]  }
  0x89   : > { %4073 = vmatprep.subr.bf16.mxu1 %v4365_v6  ;;  %v1330_v37 = vor.u32 %v1329_v25, %v1325_v40  ;;  %v758_v9 = vor.u32 %v756_v63, %v755_v29  ;;  %v760_v39 = vrot.slane %v755_v29, 4  ;;  %v426_v4 = vmax.f32 %v394_v26, 0.0  ;;  %v991_v29 = vld [vmem:[#allocation2 + $0x8c] sm:$0x1] }
  0x8a   : > { %v981_v41 = vsel %vm4550_vm8, %v750_v32, %v980_v35  ;;  %v427_v50 = vmax.f32 %v395_v36, 0.0  ;;  %v1452_v22 = vrot.slane %v4875_v43, 1  ;;  %v1453_v15 = vrot.slane %v4881_v62, 1  ;;  %v987_v62 = vld [vmem:[#allocation2 + $0x84] sm:$0xf] }
  0x8b   : > { %v5045_v47 = vsel %vm1227_vm1, %v1330_v37, %v1334_v31  ;;  %v759_v61 = vsel %vm4544_vm7, %v751_v34, %v758_v9  ;;  %982 = vst [vmem:[#allocation2 + $0x78] sm:$0xf] %v981_v41  ;;  %v985_v58 = vsel %vm4556_vm9, %v760_v39, %v984_v30  ;;  %v3505_v59 = vpack.c.bf16 %v426_v4, %v426_v4 }
  0x8c   : > { %2232 = vmatprep.mubr.bf16.mxu0 %v5045_v47  ;;  %v5055_v60 = vld [vmem:[#allocation2 + $0x6c] sm:$0xff]   ;;  %983 = vst [vmem:[#allocation2 + $0x7c] sm:$0xf] %v759_v61  ;;  %986 = vst [vmem:[#allocation2 + $0x80] sm:$0x1] %v985_v58  ;;  %v3506_v54 = vpack.c.bf16 %v427_v50, %v427_v50  ;;  %4074 = vmatpush3.bf16.msra.mxu1 %v4367_v7  ;;  %v5069_v31 = vsel %vm1436_vm0, %v1452_v22, %v1453_v15  ;;  %v3611_v39 = vunpack.c.l.bf16 %v3707_v21 }
  0x8d   : > { %v5057_v1 = vld [vmem:[#allocation2 + $0x74] ss:$0 sps:$4 sm:$0x11]   ;;  %v1337_v44 = vshrl.u32 %v5055_v60, 16  ;;  %v1339_v6 = vshll.u32 %v5055_v60, 16  ;;  %v762_v40 = vshrl.u32 %v3505_v59, 16  ;;  %v3612_v36 = vunpack.c.h.bf16 %v3707_v21 }
  0x8e   : > { %v765_v11 = vshll.u32 %v3505_v59, 16  ;;  %v1344_v13 = vshll.u32 %v5057_v1, 16  ;;  %v770_v63 = vshrl.u32 %v3506_v54, 16  ;;  %v773_v35 = vshll.u32 %v3506_v54, 16 }
  0x8f   : > { %2233 = vmatmul.mubr.bf16.gmra.mxu0 %v5015_v10  ;;  %2362 = vmatmul.mubr.bf16.gmra.mxu1 %v5040_v38  ;;  %v1341_v14 = vrot.slane %v1339_v6, 1  ;;  %v764_v18 = vrot.slane %v762_v40, 7  ;;  %v1455_v15 = vrot.slane %v4911_v28, 1  ;;  %v365_v6 = vmul.f32 %v4820_v45, %v3611_v39 }
  0x90   : > { %2369 = vmatprep.mubr.bf16.mxu1 %v4911_v28  ;;  %v1346_v12 = vrot.slane %v1344_v13, 1  ;;  %v772_v25 = vrot.slane %v770_v63, 7  ;;  %v366_v40 = vmul.f32 %v4820_v45, %v3612_v36  ;;  %v1462_v0 = vrot.slane %v5020_v19, 1 }
  0x91   : > { %v1342_v30 = vor.u32 %v1341_v14, %v1337_v44  ;;  %v767_v32 = vor.u32 %v765_v11, %v764_v18  ;;  %v768_v34 = vrot.slane %v764_v18, 4  ;;  %v1456_v44 = vrot.slane %v4917_v51, 1 }
  0x92   : > { %v775_v37 = vor.u32 %v773_v35, %v772_v25  ;;  %v777_v9 = vrot.slane %v772_v25, 4  ;;  %v404_v63 = vadd.f32 %v4840_v8, %v365_v6  ;;  %v405_v35 = vadd.f32 %v4840_v8, %v366_v40  ;;  %v1026_v6 = vld [vmem:[#allocation2 + $0xc8] sm:$0x1] }
  0x93   : > { %v5071_v26 = vld [vmem:[#allocation2 + $0x78] sm:$0xff]   ;;  %v5074_v41 = vsel %vm1227_vm1, %v1342_v30, %v1346_v12  ;;  %v5076_v4 = vld [vmem:[#allocation2 + $0x80] ss:$0 sps:$4 sm:$0x11]   ;;  %v988_v61 = vsel %vm4550_vm8, %v767_v32, %v987_v62  ;;  %v5101_v14 = vsel %vm1436_vm0, %v1455_v15, %v1456_v44  ;;  %v1458_v8 = vrot.slane %v4971_v46, 1 }
  0x94   : > { %2240 = vmatprep.mubr.bf16.mxu0 %v5074_v41  ;;  %v1349_v58 = vshrl.u32 %v5071_v26, 16  ;;  %v1351_v50 = vshll.u32 %v5071_v26, 16  ;;  %v776_v7 = vsel %vm4544_vm7, %v768_v34, %v775_v37  ;;  %989 = vst [vmem:[#allocation2 + $0x84] sm:$0xf] %v988_v61  ;;  %v992_v59 = vsel %vm4556_vm9, %v777_v9, %v991_v29 }
  0x95   : > { %v1356_v22 = vshll.u32 %v5076_v4, 16  ;;  %990 = vst [vmem:[#allocation2 + $0x88] sm:$0xf] %v776_v7  ;;  %993 = vst [vmem:[#allocation2 + $0x8c] sm:$0x1] %v992_v59  ;;  %v436_v18 = vmax.f32 %v404_v63, 0.0 }
  0x96   : > { %v1353_v54 = vrot.slane %v1351_v50, 1  ;;  %v437_v21 = vmax.f32 %v405_v35, 0.0  ;;  %v1459_v32 = vrot.slane %v4976_v24, 1  ;;  %v1022_v59 = vld [vmem:[#allocation2 + $0xc0] sm:$0xf]  ;;  %v1464_v3 = vrot.slane %v5055_v60, 1 }
  0x97   : > { %2241 = vmatmul.mubr.bf16.gmra.mxu0 %v5055_v60  ;;  %2370 = vmatmul.mubr.bf16.gmra.mxu1 %v5069_v31  ;;  %v1358_v11 = vrot.slane %v1356_v22, 1  ;;  %v3515_v12 = vpack.c.bf16 %v436_v18, %v436_v18  ;;  %v1461_v18 = vrot.slane %v5015_v10, 1  ;;  %v1465_v19 = vrot.slane %v5057_v1, 1 }
  0x98   : > { %2377 = vmatprep.mubr.bf16.mxu1 %v4971_v46  ;;  %v1354_v13 = vor.u32 %v1353_v54, %v1349_v58  ;;  %v3516_v45 = vpack.c.bf16 %v437_v21, %v437_v21  ;;  %v5117_v15 = vsel %vm1436_vm0, %v1458_v8, %v1459_v32  ;;  %v1468_v1 = vrot.slane %v5076_v4, 1  ;;  %v5174_v4 = vld [vmem:[#allocation2 + $0x90] sm:$0xff]  }
  0x99   : > { %v847_v34 = vshrl.u32 %v3515_v12, 16  ;;  %v850_v9 = vshll.u32 %v3515_v12, 16  ;;  %v5136_v21 = vsel %vm1436_vm0, %v1461_v18, %v1462_v0  ;;  %v5152_v12 = vsel %vm1436_vm0, %v1464_v3, %v1465_v19  ;;  %v4385_v18 = vld [vmem:[#allocation2 + $0xbc] ss:$0 sps:$4 sm:$0x11]  }
  0x9a   : > { %v5098_v62 = vsel %vm1227_vm1, %v1354_v13, %v1358_v11  ;;  %v855_v39 = vshrl.u32 %v3516_v45, 16  ;;  %v858_v58 = vshll.u32 %v3516_v45, 16  ;;  %v4369_v45 = vld [vmem:[%s5801_s1 + $0x218] sm:$0xff]   ;;  %v1483_v0 = vrot.slane %v4385_v18, 1 }
  0x9b   : > { %2248 = vmatprep.mubr.bf16.mxu0 %v5098_v62  ;;  %v849_v61 = vrot.slane %v847_v34, 7  ;;  %v4371_v34 = vld [vmem:[%s5801_s1 + $0x208] sm:$0xff]  }
  0x9c   : > { %v5104_v51 = vld [vmem:[#allocation2 + $0x84] sm:$0xff]   ;;  %v5107_v25 = vld [vmem:[#allocation2 + $0x8c] ss:$0 sps:$4 sm:$0x11]   ;;  %v857_v7 = vrot.slane %v855_v39, 7  ;;  %v1473_v39 = vrot.slane %v5174_v4, 1 }
  0x9d   : > { %v1361_v29 = vshrl.u32 %v5104_v51, 16  ;;  %v1363_v30 = vshll.u32 %v5104_v51, 16  ;;  %v1368_v37 = vshll.u32 %v5107_v25, 16  ;;  %v852_v54 = vor.u32 %v850_v9, %v849_v61  ;;  %v4372_v9 = vld [vmem:[%s5801_s1 + $0x200] sm:$0xff]  }
  0x9e   : > { %v853_v44 = vrot.slane %v849_v61, 4  ;;  %v860_v40 = vor.u32 %v858_v58, %v857_v7  ;;  %v862_v24 = vrot.slane %v857_v7, 4  ;;  %v1471_v32 = vrot.slane %v5107_v25, 1  ;;  %v5191_v25 = vld [vmem:[#allocation2 + $0x9c] sm:$0xff]  }
  0x9f   : > { %2249 = vmatmul.mubr.bf16.gmra.mxu0 %v5071_v26  ;;  %2378 = vmatmul.mubr.bf16.gmra.mxu1 %v5101_v14  ;;  %v1365_v36 = vrot.slane %v1363_v30, 1  ;;  %v1370_v50 = vrot.slane %v1368_v37, 1  ;;  %v1023_v13 = vsel %vm4550_vm8, %v852_v54, %v1022_v59  ;;  %v1470_v30 = vrot.slane %v5104_v51, 1  ;;  %v4382_v59 = vld [vmem:[#allocation2 + $0xa4] ss:$0 sps:$4 sm:$0x11]  }
  0xa0   : > { %2385 = vmatprep.mubr.bf16.mxu1 %v5015_v10  ;;  %v861_v63 = vsel %vm4544_vm7, %v853_v44, %v860_v40  ;;  %1024 = vst [vmem:[#allocation2 + $0xc0] sm:$0xf] %v1023_v13  ;;  %v1027_v35 = vsel %vm4556_vm9, %v862_v24, %v1026_v6  ;;  %v1476_v7 = vrot.slane %v5191_v25, 1  ;;  %v5211_v44 = vld [vmem:[#allocation2 + $0xb4] sm:$0xff]  }
  0xa1   : > { %v1366_v22 = vor.u32 %v1365_v36, %v1361_v29  ;;  %1025 = vst [vmem:[#allocation2 + $0xc4] sm:$0xf] %v861_v63  ;;  %1028 = vst [vmem:[#allocation2 + $0xc8] sm:$0x1] %v1027_v35  ;;  %v4370_v29 = vld [vmem:[%s5801_s1 + $0x210] sm:$0xff]   ;;  %v5184_v37 = vsel %vm1436_vm0, %v1470_v30, %v1471_v32  ;;  %v1482_v35 = vrot.slane %v5211_v44, 1 }
  0xa2   : > { %v4380_v36 = vld [vmem:[#allocation2 + $0x98] ss:$0 sps:$4 sm:$0x11]   ;;  %v4384_v40 = vld [vmem:[#allocation2 + $0xb0] ss:$0 sps:$4 sm:$0x11]  }
  0xa3   : > { %v5120_v11 = vsel %vm1227_vm1, %v1366_v22, %v1370_v50  ;;  %v1474_v61 = vrot.slane %v4380_v36, 1  ;;  %v5201_v50 = vld [vmem:[#allocation2 + $0xa8] sm:$0xff]   ;;  %v1477_v22 = vrot.slane %v4382_v59, 1  ;;  %v1480_v24 = vrot.slane %v4384_v40, 1  ;;  %v4388_v30 = vld [vmem:[#allocation2 + $0x30] sm:$0xff]  }
  0xa4   : > { %2256 = vmatprep.mubr.bf16.mxu0 %v5120_v11  ;;  %v1479_v6 = vrot.slane %v5201_v50, 1 }
  0xa5   : > { %v5197_v58 = vsel %vm1436_vm0, %v1473_v39, %v1474_v61  ;;  %v5207_v54 = vsel %vm1436_vm0, %v1476_v7, %v1477_v22 }
  0xa6   : > { %v5217_v13 = vsel %vm1436_vm0, %v1479_v6, %v1480_v24 }
  0xa7   : > { %2386 = vmatmul.mubr.bf16.gmra.mxu1 %v5117_v15  ;;  %2257 = vmatmul.mubr.bf16.gmra.mxu0 %v5104_v51 }
  0xa8   : > { %2393 = vmatprep.mubr.bf16.mxu1 %v5055_v60  ;;  %2490 = vmatprep.mubr.bf16.mxu0 %v4924_v52  ;;  %v4363_v52 = vld [vmem:[%s5801_s1 + $0x228] sm:$0xff]   ;;  %v5219_v63 = vld [vmem:[#allocation2 + $0xc0] sm:$0xff]  }
  0xaf   : > { %2394 = vmatmul.mubr.bf16.gmra.mxu1 %v5136_v21  ;;  %2491 = vmatmul.mubr.bf16.vlgmr.msra.gmra.mxu0 %v4643_v5  ;;  %v4366_v5 = vld [vmem:[%s5801_s1 + $0x220] sm:$0xff]  }
  0xb0   : > { %2401 = vmatprep.mubr.bf16.mxu1 %v5071_v26  ;;  %2498 = vmatprep.mubr.bf16.mxu0 %v4963_v16 }
  0xb1   : > { %4196 = vmatpush3.bf16.msra.mxu0 %v4939_v49  ;;  %v1467_v49 = vrot.slane %v5071_v26, 1 }
  0xb2   : > { %4197 = vmatprep.subr.bf16.mxu0 %v4360_v57 }
  0xb3   : > { %v5167_v8 = vsel %vm1436_vm0, %v1467_v49, %v1468_v1  ;;  %v4387_v49 = vld [vmem:[#allocation2 + $0x24] sm:$0xff]  }
  0xb5   : > { %4198 = vmatpush3.bf16.msra.mxu0 %v4360_v57  ;;  %v5227_v57 = vsel %vm1436_vm0, %v1482_v35, %v1483_v0 }
  0xb6   : > { %4199 = vmatprep.subr.bf16.mxu0 %v4363_v52 }
  0xb7   : > { %2402 = vmatmul.mubr.bf16.gmra.mxu1 %v5152_v12  ;;  %2499 = vmatmul.mubr.bf16.gmra.mxu0 %v4740_v48 }
  0xb8   : > { %2409 = vmatprep.mubr.bf16.mxu1 %v5104_v51  ;;  %2506 = vmatprep.mubr.bf16.mxu0 %v4998_v27 }
  0xb9   : > { %4200 = vmatpush3.bf16.msra.mxu0 %v4363_v52 }
  0xba   : > { %4201 = vmatprep.subr.bf16.mxu0 %v4366_v5 }
  0xbd   : > { %4202 = vmatpush3.bf16.msra.mxu0 %v4366_v5  ;;  %v4386_v5 = vld [vmem:[#allocation2 + $0x18] sm:$0xff]  }
  0xbe   : > { %4203 = vmatprep.subr.bf16.mxu0 %v4369_v45 }
  0xbf   : > { %2410 = vmatmul.mubr.bf16.gmra.mxu1 %v5167_v8  ;;  %2507 = vmatmul.mubr.bf16.gmra.mxu0 %v4791_v56 }
  0xc0   : > { %2417 = vmatprep.mubr.bf16.mxu1 %v5174_v4  ;;  %2514 = vmatprep.mubr.bf16.mxu0 %v5040_v38 }
  0xc1   : > { %4204 = vmatpush3.bf16.msra.mxu0 %v4369_v45 }
  0xc2   : > { %4205 = vmatprep.subr.bf16.mxu0 %v4370_v29 }
  0xc5   : > { %4206 = vmatpush3.bf16.msra.mxu0 %v4370_v29 }
  0xc6   : > { %4207 = vmatprep.subr.bf16.mxu0 %v4371_v34 }
  0xc7   : > { %2418 = vmatmul.mubr.bf16.gmra.mxu1 %v5184_v37  ;;  %2515 = vmatmul.mubr.bf16.gmra.mxu0 %v4873_v53 }
  0xc8   : > { %2425 = vmatprep.mubr.bf16.mxu1 %v5191_v25  ;;  %2522 = vmatprep.mubr.bf16.mxu0 %v5069_v31 }
  0xc9   : > { %4208 = vmatpush3.bf16.msra.mxu0 %v4371_v34 }
  0xca   : > { %4209 = vmatprep.subr.bf16.mxu0 %v4372_v9 }
  0xcd   : > { %4210 = vmatpush3.bf16.msra.mxu0 %v4372_v9 }
  0xcf   : > { %2426 = vmatmul.mubr.bf16.gmra.mxu1 %v5197_v58  ;;  %2523 = vmatmul.mubr.bf16.gmra.mxu0 %v4932_v23 }
  0xd0   : > { %2433 = vmatprep.mubr.bf16.mxu1 %v5201_v50  ;;  %2530 = vmatprep.mubr.bf16.mxu0 %v5101_v14 }
  0xd7   : > { %2434 = vmatmul.mubr.bf16.gmra.mxu1 %v5207_v54  ;;  %2531 = vmatmul.mubr.bf16.gmra.mxu0 %v4969_v17 }
  0xd8   : > { %2441 = vmatprep.mubr.bf16.mxu1 %v5211_v44  ;;  %2538 = vmatprep.mubr.bf16.mxu0 %v5117_v15 }
  0xdf   : > { %2442 = vmatmul.mubr.bf16.gmra.mxu1 %v5217_v13  ;;  %2539 = vmatmul.mubr.bf16.gmra.mxu0 %v5009_v33 }
  0xe0   : > { %2449 = vmatprep.mubr.bf16.mxu1 %v5219_v63  ;;  %2546 = vmatprep.mubr.bf16.mxu0 %v5136_v21 }
  0xe7   : > { %2450 = vmatmul.mubr.bf16.gmra.mxu1 %v5227_v57  ;;  %2547 = vmatmul.mubr.bf16.gmra.mxu0 %v5045_v47 }
  0xe8   : > { %2651 = vmatprep.mubr.bf16.mxu1 %v4740_v48  ;;  %2554 = vmatprep.mubr.bf16.mxu0 %v5152_v12 }
  0xee   : > { %v3739_v3 = vpop.f32.mrf.mxu0 }
  0xef   : > { %2652 = vmatmul.mubr.bf16.vlgmr.msra.gmra.mxu1 %v4386_v5  ;;  %2555 = vmatmul.mubr.bf16.gmra.mxu0 %v5074_v41  ;;  %v1513_v5 = vshll.u32 %v5219_v63, 16 }
  0xf0   : > { %v3740_v19 = vpop.f32.mrf.mxu0  ;;  %2659 = vmatprep.mubr.bf16.mxu1 %v4791_v56  ;;  %2562 = vmatprep.mubr.bf16.mxu0 %v5167_v8 }
  0xf1   : > { %v5233_v52 = vadd.f32 %v3740_v19, %v3739_v3  ;;  %v4373_v3 = vld [vmem:[#allocation2 + $0xc8] ss:$0 sps:$4 sm:$0x11]  }
  0xf2   : > { %v5241_v48 = vpop.f32.mrf.mxu0 }
  0xf4   : > { %v5243_v45 = vpop.f32.mrf.mxu0 }
  0xf7   : > { %2660 = vmatmul.mubr.bf16.gmra.mxu1 %v4387_v49  ;;  %2563 = vmatmul.mubr.bf16.gmra.mxu0 %v5098_v62  ;;  %v1523_v49 = vrot.slane %v5219_v63, 1 }
  0xf8   : > { %2667 = vmatprep.mubr.bf16.mxu1 %v4873_v53  ;;  %2570 = vmatprep.mubr.bf16.mxu0 %v5184_v37 }
  0xfb   : > { %v3811_v1 = vpop.f32.mrf.mxu1 }
  0xfd   : > { %v3812_v29 = vpop.f32.mrf.mxu1 }
  0xfe   : > { %v5245_v32 = vadd.f32 %v3812_v29, %v3811_v1  ;;  %v1524_v1 = vrot.slane %v4373_v3, 1 }
  0xff   : > { %2668 = vmatmul.mubr.bf16.gmra.mxu1 %v4388_v30  ;;  %2571 = vmatmul.mubr.bf16.gmra.mxu0 %v5120_v11  ;;  %v3814_v56 = vpop.f32.mrf.mxu1 }
 0x100   : > { %2675 = vmatprep.mubr.bf16.mxu1 %v4932_v23  ;;  %2578 = vmatprep.mubr.bf16.mxu0 %v5197_v58 }
 0x101   : > { %v3745_v53 = vpop.f32.mrf.mxu0  ;;  %v3815_v34 = vpop.f32.mrf.mxu1 }
 0x102   : > { %v5250_v39 = vadd.f32 %v3815_v34, %v3814_v56  ;;  %v1515_v34 = vrot.slane %v1513_v5, 1 }
 0x103   : > { %v3746_v9 = vpop.f32.mrf.mxu0 }
 0x104   : > { %v5252_v36 = vadd.f32 %v3746_v9, %v3745_v53  ;;  %v1511_v53 = vshrl.u32 %v5219_v63, 16  ;;  %v1518_v9 = vshll.u32 %v4373_v3, 16 }
 0x105   : > { %v3748_v61 = vpop.f32.mrf.mxu0 }
 0x107   : > { %2676 = vmatmul.mubr.bf16.gmra.mxu1 %v4875_v43  ;;  %v3749_v7 = vpop.f32.mrf.mxu0  ;;  %2579 = vmatmul.mubr.bf16.gmra.mxu0 %v4624_v42 }
 0x108   : > { %2683 = vmatprep.mubr.bf16.mxu1 %v4969_v17  ;;  %v5257_v59 = vadd.f32 %v3749_v7, %v3748_v61  ;;  %2586 = vmatprep.mubr.bf16.mxu0 %v5207_v54 }
 0x10a   : > { %v3817_v23 = vpop.f32.mrf.mxu1 }
 0x10c   : > { %v3818_v22 = vpop.f32.mrf.mxu1 }
 0x10d   : > { %v5260_v6 = vadd.f32 %v3818_v22, %v3817_v23 }
 0x10e   : > { %v3820_v40 = vpop.f32.mrf.mxu1 }
 0x10f   : > { %2684 = vmatmul.mubr.bf16.gmra.mxu1 %v4911_v28  ;;  %2587 = vmatmul.mubr.bf16.gmra.mxu0 %v4691_v2 }
 0x110   : > { %2691 = vmatprep.mubr.bf16.mxu1 %v5009_v33  ;;  %2594 = vmatprep.mubr.bf16.mxu0 %v5217_v13  ;;  %v3821_v43 = vpop.f32.mrf.mxu1 }
 0x111   : > { %v5266_v17 = vadd.f32 %v3821_v43, %v3820_v40  ;;  %v1516_v40 = vor.u32 %v1515_v34, %v1511_v53  ;;  %v1520_v43 = vrot.slane %v1518_v9, 1 }
 0x112   : > { %v3751_v24 = vpop.f32.mrf.mxu0 }
 0x113   : > { %v5295_v3 = vsel %vm1227_vm1, %v1516_v40, %v1520_v43 }
 0x114   : > { %v3752_v35 = vpop.f32.mrf.mxu0 }
 0x115   : > { %v5268_v18 = vadd.f32 %v3752_v35, %v3751_v24 }
 0x116   : > { %v3754_v0 = vpop.f32.mrf.mxu0 }
 0x117   : > { %2692 = vmatmul.mubr.bf16.gmra.mxu1 %v4971_v46  ;;  %2595 = vmatmul.mubr.bf16.gmra.mxu0 %v4771_v20  ;;  %v3823_v19 = vpop.f32.mrf.mxu1 }
 0x118   : > { %v3755_v28 = vpop.f32.mrf.mxu0  ;;  %2699 = vmatprep.mubr.bf16.mxu1 %v5045_v47  ;;  %2602 = vmatprep.mubr.bf16.mxu0 %v5227_v57  ;;  %v5282_v47 = vsel %vm1436_vm0, %v1523_v49, %v1524_v1  ;;  %v5308_v1 = vld [vmem:[%s5802_s2] ss:$0 sm:$0xff] }
 0x119   : > { %v5274_v33 = vadd.f32 %v3755_v28, %v3754_v0  ;;  %v3824_v29 = vpop.f32.mrf.mxu1 }
 0x11a   : > { %v5278_v30 = vadd.f32 %v3824_v29, %v3823_v19 }
 0x11b   : > { %v3826_v56 = vpop.f32.mrf.mxu1 }
 0x11c   : > { %v3757_v46 = vpop.f32.mrf.mxu0 }
 0x11d   : > { %v3827_v61 = vpop.f32.mrf.mxu1 }
 0x11e   : > { %v3758_v7 = vpop.f32.mrf.mxu0  ;;  %v5285_v23 = vadd.f32 %v3827_v61, %v3826_v56  ;;  %v2171_v56 = vadd.f32 %v5233_v52, %v5308_v1 }
 0x11f   : > { %2700 = vmatmul.mubr.bf16.gmra.mxu1 %v5015_v10  ;;  %2603 = vmatmul.mubr.bf16.gmra.mxu0 %v4826_v55  ;;  %v5288_v22 = vadd.f32 %v3758_v7, %v3757_v46  ;;  %v3744_v46 = vadd.f32 %v5243_v45, %v5241_v48 }
 0x120   : > { %2707 = vmatprep.mubr.bf16.mxu1 %v5074_v41  ;;  %2610 = vmatprep.mubr.bf16.mxu0 %v5282_v47  ;;  %v3760_v24 = vpop.f32.mrf.mxu0 }
 0x122   : > { %v3761_v35 = vpop.f32.mrf.mxu0 }
 0x123   : > { %v5292_v0 = vadd.f32 %v3761_v35, %v3760_v24  ;;  %v2179_v35 = vadd.f32 %v5252_v36, %v5308_v1 }
 0x127   : > { %v3829_v10 = vpop.f32.mrf.mxu1  ;;  %2708 = vmatmul.mubr.bf16.gmra.mxu1 %v5055_v60  ;;  %2611 = vmatmul.mubr.bf16.gmra.mxu0 %v5295_v3 }
 0x128   : > { %2715 = vmatprep.mubr.bf16.mxu1 %v5098_v62  ;;  %4211 = vmatprep.mubr.bf16.mxu0 %v4963_v16 }
 0x129   : > { %v3830_v41 = vpop.f32.mrf.mxu1 }
 0x12a   : > { %v5301_v28 = vadd.f32 %v3830_v41, %v3829_v10 }
 0x12b   : > { %v3832_v19 = vpop.f32.mrf.mxu1 }
 0x12d   : > { %v3833_v5 = vpop.f32.mrf.mxu1 }
 0x12e   : > { %v5303_v49 = vadd.f32 %v3833_v5, %v3832_v19 }
 0x12f   : > { %v3763_v29 = vpop.f32.mrf.mxu0  ;;  %v3851_v60 = vpop.f32.mrf.mxu1  ;;  %2716 = vmatmul.mubr.bf16.gmra.mxu1 %v5071_v26  ;;  %4212 = vmatmul.mubr.bf16.vlgmr.msra.gmra.mxu0 %v4998_v27 }
 0x130   : > { %2723 = vmatprep.mubr.bf16.mxu1 %v5120_v11  ;;  %4215 = vmatprep.mubr.bf16.mxu0 %v5040_v38  ;;  %v2174_v11 = vadd.f32 %v3744_v46, %v5308_v1 }
 0x131   : > { %v3764_v16 = vpop.f32.mrf.mxu0  ;;  %v3852_v62 = vpop.f32.mrf.mxu1 }
 0x132   : > { %v5318_v53 = vadd.f32 %v3764_v16, %v3763_v29  ;;  %v3853_v34 = vadd.f32 %v3852_v62, %v3851_v60  ;;  %v2182_v60 = vadd.f32 %v5257_v59, %v5308_v1  ;;  %v2187_v59 = vadd.f32 %v5268_v18, %v5308_v1 }
 0x133   : > { %v3766_v9 = vpop.f32.mrf.mxu0  ;;  %v3854_v61 = vpop.f32.mrf.mxu1 }
 0x134   : > { %v5320_v26 = vadd.f32 %v3853_v34, %v2171_v56 }
 0x135   : > { %v3767_v27 = vpop.f32.mrf.mxu0  ;;  %v3855_v7 = vpop.f32.mrf.mxu1 }
 0x136   : > { %v5323_v40 = vadd.f32 %v3767_v27, %v3766_v9  ;;  %v3856_v38 = vadd.f32 %v3855_v7, %v3854_v61 }
 0x137   : > { %v3769_v43 = vpop.f32.mrf.mxu0  ;;  %v3857_v24 = vpop.f32.mrf.mxu1  ;;  %2724 = vmatmul.mubr.bf16.gmra.mxu1 %v5104_v51  ;;  %4216 = vmatmul.mubr.bf16.gmra.mxu0 %v5069_v31 }
 0x138   : > { %v5327_v52 = vadd.f32 %v3856_v38, %v2174_v11  ;;  %2731 = vmatprep.mubr.bf16.mxu1 %v4624_v42  ;;  %4219 = vmatprep.mubr.bf16.mxu0 %v5101_v14  ;;  %v2190_v11 = vadd.f32 %v5274_v33, %v5308_v1  ;;  %v2195_v33 = vadd.f32 %v5288_v22, %v5308_v1 }
 0x139   : > { %v3770_v48 = vpop.f32.mrf.mxu0  ;;  %v3858_v45 = vpop.f32.mrf.mxu1 }
 0x13a   : > { %v5333_v10 = vadd.f32 %v3770_v48, %v3769_v43  ;;  %v3859_v41 = vadd.f32 %v3858_v45, %v3857_v24 }
 0x13b   : > { %v3772_v19 = vpop.f32.mrf.mxu0  ;;  %v3860_v5 = vpop.f32.mrf.mxu1 }
 0x13c   : > { %v5335_v29 = vadd.f32 %v3859_v41, %v2179_v35 }
 0x13d   : > { %v3773_v51 = vpop.f32.mrf.mxu0  ;;  %v3861_v31 = vpop.f32.mrf.mxu1 }
 0x13e   : > { %v5339_v42 = vadd.f32 %v3773_v51, %v3772_v19  ;;  %v3862_v16 = vadd.f32 %v3861_v31, %v3860_v5  ;;  %v5369_v51 = vld [vmem:[#allocation2 + $0xcc] sm:$0xff]  }
 0x13f   : > { %v3775_v14 = vpop.f32.mrf.mxu0  ;;  %v3863_v62 = vpop.f32.mrf.mxu1  ;;  %2732 = vmatmul.mubr.bf16.gmra.mxu1 %v5174_v4  ;;  %4220 = vmatmul.mubr.bf16.gmra.mxu0 %v5117_v15 }
 0x140   : > { %v5343_v36 = vadd.f32 %v3862_v16, %v2182_v60  ;;  %2739 = vmatprep.mubr.bf16.mxu1 %v4691_v2  ;;  %4223 = vmatprep.mubr.bf16.mxu0 %v5136_v21 }
 0x141   : > { %v3776_v56 = vpop.f32.mrf.mxu0  ;;  %v3864_v46 = vpop.f32.mrf.mxu1 }
 0x142   : > { %v5349_v34 = vadd.f32 %v3776_v56, %v3775_v14  ;;  %v3865_v9 = vadd.f32 %v3864_v46, %v3863_v62  ;;  %v1539_v56 = vshll.u32 %v5369_v51, 16 }
 0x143   : > { %v3778_v61 = vpop.f32.mrf.mxu0  ;;  %v3866_v27 = vpop.f32.mrf.mxu1 }
 0x144   : > { %v5351_v7 = vadd.f32 %v3865_v9, %v2187_v59 }
 0x145   : > { %v3779_v4 = vpop.f32.mrf.mxu0  ;;  %v3867_v15 = vpop.f32.mrf.mxu1 }
 0x146   : > { %v5355_v2 = vadd.f32 %v3779_v4, %v3778_v61  ;;  %v3868_v38 = vadd.f32 %v3867_v15, %v3866_v27  ;;  %v4375_v61 = vld [vmem:[#allocation2 + $0xd4] ss:$0 sps:$4 sm:$0x11]   ;;  %v1541_v15 = vrot.slane %v1539_v56, 1 }
 0x147   : > { %v3781_v21 = vpop.f32.mrf.mxu0  ;;  %v3869_v43 = vpop.f32.mrf.mxu1  ;;  %2740 = vmatmul.mubr.bf16.gmra.mxu1 %v5191_v25  ;;  %4224 = vmatmul.mubr.bf16.gmra.mxu0 %v5152_v12 }
 0x148   : > { %v5359_v18 = vadd.f32 %v3868_v38, %v2190_v11  ;;  %2747 = vmatprep.mubr.bf16.mxu1 %v4771_v20  ;;  %4227 = vmatprep.mubr.bf16.mxu0 %v5167_v8  ;;  %v2198_v20 = vadd.f32 %v5292_v0, %v5308_v1  ;;  %v2203_v0 = vadd.f32 %v5318_v53, %v5308_v1 }
 0x149   : > { %v3782_v24 = vpop.f32.mrf.mxu0  ;;  %v3870_v48 = vpop.f32.mrf.mxu1  ;;  %v2206_v11 = vadd.f32 %v5323_v40, %v5308_v1  ;;  %v2211_v40 = vadd.f32 %v5333_v10, %v5308_v1 }
 0x14a   : > { %v5365_v45 = vadd.f32 %v3782_v24, %v3781_v21  ;;  %v3871_v35 = vadd.f32 %v3870_v48, %v3869_v43 }
 0x14b   : > { %v3784_v41 = vpop.f32.mrf.mxu0  ;;  %v3872_v19 = vpop.f32.mrf.mxu1 }
 0x14c   : > { %v5367_v5 = vadd.f32 %v3871_v35, %v2195_v33 }
 0x14d   : > { %v3785_v25 = vpop.f32.mrf.mxu0  ;;  %v3873_v12 = vpop.f32.mrf.mxu1 }
 0x14e   : > { %v5373_v31 = vadd.f32 %v3785_v25, %v3784_v41  ;;  %v3874_v8 = vadd.f32 %v3873_v12, %v3872_v19 }
 0x14f   : > { %v3787_v60 = vpop.f32.mrf.mxu0  ;;  %v3875_v16 = vpop.f32.mrf.mxu1  ;;  %2748 = vmatmul.mubr.bf16.gmra.mxu1 %v5201_v50  ;;  %4228 = vmatmul.mubr.bf16.gmra.mxu0 %v5184_v37 }
 0x150   : > { %v5377_v22 = vadd.f32 %v3874_v8, %v2198_v20  ;;  %2755 = vmatprep.mubr.bf16.mxu1 %v4826_v55  ;;  %4231 = vmatprep.mubr.bf16.mxu0 %v5197_v58  ;;  %v1537_v55 = vshrl.u32 %v5369_v51, 16  ;;  %v1544_v58 = vshll.u32 %v4375_v61, 16 }
 0x151   : > { %v3788_v14 = vpop.f32.mrf.mxu0  ;;  %v3876_v62 = vpop.f32.mrf.mxu1 }
 0x152   : > { %v5384_v46 = vadd.f32 %v3788_v14, %v3787_v60  ;;  %v3877_v59 = vadd.f32 %v3876_v62, %v3875_v16  ;;  %v1542_v35 = vor.u32 %v1541_v15, %v1537_v55  ;;  %v1546_v41 = vrot.slane %v1544_v58, 1 }
 0x153   : > { %v3790_v9 = vpop.f32.mrf.mxu0  ;;  %v3878_v50 = vpop.f32.mrf.mxu1 }
 0x154   : > { %v5386_v37 = vadd.f32 %v3877_v59, %v2203_v0  ;;  %v1549_v59 = vrot.slane %v5369_v51, 1 }
 0x155   : > { %v3791_v27 = vpop.f32.mrf.mxu0  ;;  %v3879_v4 = vpop.f32.mrf.mxu1 }
 0x156   : > { %v5391_v38 = vadd.f32 %v3791_v27, %v3790_v9  ;;  %v3880_v53 = vadd.f32 %v3879_v4, %v3878_v50  ;;  %v1550_v9 = vrot.slane %v4375_v61, 1 }
 0x157   : > { %v3793_v21 = vpop.f32.mrf.mxu0  ;;  %v3881_v43 = vpop.f32.mrf.mxu1  ;;  %2756 = vmatmul.mubr.bf16.gmra.mxu1 %v5211_v44  ;;  %4232 = vmatmul.mubr.bf16.gmra.mxu0 %v5207_v54 }
 0x158   : > { %v5395_v24 = vadd.f32 %v3880_v53, %v2206_v11  ;;  %2763 = vmatprep.mubr.bf16.mxu1 %v5295_v3  ;;  %4235 = vmatprep.mubr.bf16.mxu0 %v5217_v13  ;;  %v1547_v3 = vsel %vm1227_vm1, %v1542_v35, %v1546_v41  ;;  %v2214_v13 = vadd.f32 %v5339_v42, %v5308_v1 }
 0x159   : > { %v3794_v48 = vpop.f32.mrf.mxu0  ;;  %v3882_v33 = vpop.f32.mrf.mxu1  ;;  %v2219_v42 = vadd.f32 %v5349_v34, %v5308_v1  ;;  %v1551_v15 = vsel %vm1436_vm0, %v1549_v59, %v1550_v9 }
 0x15a   : > { %v5401_v19 = vadd.f32 %v3794_v48, %v3793_v21  ;;  %v3883_v25 = vadd.f32 %v3882_v33, %v3881_v43  ;;  %v2227_v48 = vadd.f32 %v5365_v45, %v5308_v1 }
 0x15b   : > { %v3796_v12 = vpop.f32.mrf.mxu0  ;;  %v3884_v44 = vpop.f32.mrf.mxu1 }
 0x15c   : > { %v5403_v20 = vadd.f32 %v3883_v25, %v2211_v40 }
 0x15d   : > { %v3797_v54 = vpop.f32.mrf.mxu0  ;;  %v3885_v8 = vpop.f32.mrf.mxu1 }
 0x15e   : > { %v5408_v60 = vadd.f32 %v3797_v54, %v3796_v12  ;;  %v3886_v16 = vadd.f32 %v3885_v8, %v3884_v44 }
 0x15f   : > { %v3799_v14 = vpop.f32.mrf.mxu0  ;;  %v3887_v62 = vpop.f32.mrf.mxu1  ;;  %2764 = vmatmul.mubr.bf16.gmra.mxu1 %v5219_v63  ;;  %4236 = vmatmul.mubr.bf16.gmra.mxu0 %v5227_v57 }
 0x160   : > { %v5412_v10 = vadd.f32 %v3886_v16, %v2214_v13  ;;  %2771 = vmatprep.mubr.bf16.mxu1 %v1547_v3  ;;  %4239 = vmatprep.mubr.bf16.mxu0 %v5282_v47  ;;  %v2222_v47 = vadd.f32 %v5355_v2, %v5308_v1 }
 0x161   : > { %v3800_v56 = vpop.f32.mrf.mxu0  ;;  %v3888_v0 = vpop.f32.mrf.mxu1 }
 0x162   : > { %v5418_v50 = vadd.f32 %v3800_v56, %v3799_v14  ;;  %v3889_v27 = vadd.f32 %v3888_v0, %v3887_v62  ;;  %v2235_v14 = vadd.f32 %v5384_v46, %v5308_v1 }
 0x163   : > { %v3802_v4 = vpop.f32.mrf.mxu0  ;;  %v3890_v63 = vpop.f32.mrf.mxu1 }
 0x164   : > { %v5420_v55 = vadd.f32 %v3889_v27, %v2219_v42 }
 0x165   : > { %v3803_v57 = vpop.f32.mrf.mxu0  ;;  %v3891_v58 = vpop.f32.mrf.mxu1 }
 0x166   : > { %v5425_v11 = vadd.f32 %v3803_v57, %v3802_v4  ;;  %v3892_v61 = vadd.f32 %v3891_v58, %v3890_v63  ;;  %v2238_v4 = vadd.f32 %v5391_v38, %v5308_v1 }
 0x167   : > { %v3893_v53 = vpop.f32.mrf.mxu1  ;;  %2772 = vmatmul.mubr.bf16.gmra.mxu1 %v5369_v51  ;;  %v3805_v34 = vpop.f32.mrf.mxu0  ;;  %4240 = vmatmul.mubr.bf16.gmra.mxu0 %v1551_v15  ;;  %v2230_v51 = vadd.f32 %v5373_v31, %v5308_v1 }
 0x168   : > { %v5428_v21 = vadd.f32 %v3892_v61, %v2222_v47 }
 0x169   : > { %v3894_v43 = vpop.f32.mrf.mxu1  ;;  %v3806_v33 = vpop.f32.mrf.mxu0 }
 0x16a   : > { %v3895_v35 = vadd.f32 %v3894_v43, %v3893_v53  ;;  %v5432_v41 = vadd.f32 %v3806_v33, %v3805_v34  ;;  %v2243_v34 = vadd.f32 %v5401_v19, %v5308_v1 }
 0x16b   : > { %v3896_v40 = vpop.f32.mrf.mxu1  ;;  %v3808_v2 = vpop.f32.mrf.mxu0 }
 0x16c   : > { %v5434_v25 = vadd.f32 %v3895_v35, %v2227_v48 }
 0x16d   : > { %v3897_v12 = vpop.f32.mrf.mxu1  ;;  %v3809_v44 = vpop.f32.mrf.mxu0 }
 0x16e   : > { %v3898_v54 = vadd.f32 %v3897_v12, %v3896_v40  ;;  %v5438_v8 = vadd.f32 %v3809_v44, %v3808_v2  ;;  %v2246_v12 = vadd.f32 %v5408_v60, %v5308_v1 }
 0x16f   : > { %v3899_v3 = vpop.f32.mrf.mxu1  ;;  %v3963_v13 = vpop.f32.mrf.mxu0 }
 0x170   : > { %v5440_v16 = vadd.f32 %v3898_v54, %v2230_v51 }
 0x171   : > { %v3900_v45 = vpop.f32.mrf.mxu1  ;;  %v3964_v62 = vpop.f32.mrf.mxu0 }
 0x172   : > { %v3901_v56 = vadd.f32 %v3900_v45, %v3899_v3  ;;  %v3965_v0 = vadd.f32 %v3964_v62, %v3963_v13 }
 0x173   : > { %v3902_v59 = vpop.f32.mrf.mxu1  ;;  %v3966_v9 = vpop.f32.mrf.mxu0 }
 0x174   : > { %v5444_v42 = vadd.f32 %v3901_v56, %v2235_v14  ;;  %v5447_v31 = vadd.f32 %v3965_v0, %v5320_v26  ;;  %v2251_v14 = vadd.f32 %v5418_v50, %v5308_v1 }
 0x175   : > { %v3903_v27 = vpop.f32.mrf.mxu1  ;;  %v3967_v63 = vpop.f32.mrf.mxu0 }
 0x176   : > { %v3904_v57 = vadd.f32 %v3903_v27, %v3902_v59  ;;  %v3968_v15 = vadd.f32 %v3967_v63, %v3966_v9 }
 0x177   : > { %v3905_v58 = vpop.f32.mrf.mxu1  ;;  %v3969_v47 = vpop.f32.mrf.mxu0 }
 0x178   : > { %v5451_v46 = vadd.f32 %v3904_v57, %v2238_v4  ;;  %v5454_v61 = vadd.f32 %v3968_v15, %v5327_v52  ;;  %v2254_v4 = vadd.f32 %v5425_v11, %v5308_v1 }
 0x179   : > { %v3906_v53 = vpop.f32.mrf.mxu1  ;;  %v3970_v26 = vpop.f32.mrf.mxu0 }
 0x17a   : > { %v3907_v43 = vadd.f32 %v3906_v53, %v3905_v58  ;;  %v3971_v48 = vadd.f32 %v3970_v26, %v3969_v47 }
 0x17b   : > { %v3908_v33 = vpop.f32.mrf.mxu1  ;;  %v3972_v35 = vpop.f32.mrf.mxu0 }
 0x17c   : > { %v5458_v38 = vadd.f32 %v3907_v43, %v2243_v34  ;;  %v5461_v40 = vadd.f32 %v3971_v48, %v5335_v29  ;;  %v2259_v34 = vadd.f32 %v5432_v41, %v5308_v1 }
 0x17d   : > { %v3909_v2 = vpop.f32.mrf.mxu1  ;;  %v3973_v52 = vpop.f32.mrf.mxu0 }
 0x17e   : > { %v3910_v51 = vadd.f32 %v3909_v2, %v3908_v33  ;;  %v3974_v44 = vadd.f32 %v3973_v52, %v3972_v35 }
 0x17f   : > { %v3911_v54 = vpop.f32.mrf.mxu1  ;;  %v3975_v3 = vpop.f32.mrf.mxu0 }
 0x180   : > { %v5465_v19 = vadd.f32 %v3910_v51, %v2246_v12  ;;  %v5468_v13 = vadd.f32 %v3974_v44, %v5343_v36  ;;  %v2262_v12 = vadd.f32 %v5438_v8, %v5308_v1 }
 0x181   : > { %v3912_v45 = vpop.f32.mrf.mxu1  ;;  %v3976_v29 = vpop.f32.mrf.mxu0 }
 0x182   : > { %v3913_v62 = vadd.f32 %v3912_v45, %v3911_v54  ;;  %v3977_v56 = vadd.f32 %v3976_v29, %v3975_v3 }
 0x183   : > { %v3914_v0 = vpop.f32.mrf.mxu1  ;;  %v3978_v59 = vpop.f32.mrf.mxu0 }
 0x184   : > { %v5472_v60 = vadd.f32 %v3913_v62, %v2251_v14  ;;  %v5475_v9 = vadd.f32 %v3977_v56, %v5351_v7  ;;  %v2267_v14 = vadd.f32 %v5245_v32, %v5308_v1 }
 0x185   : > { %v3915_v27 = vpop.f32.mrf.mxu1  ;;  %v3979_v36 = vpop.f32.mrf.mxu0 }
 0x186   : > { %v3916_v63 = vadd.f32 %v3915_v27, %v3914_v0  ;;  %v3980_v57 = vadd.f32 %v3979_v36, %v3978_v59 }
 0x187   : > { %v3917_v15 = vpop.f32.mrf.mxu1  ;;  %v3981_v58 = vpop.f32.mrf.mxu0 }
 0x188   : > { %v5479_v50 = vadd.f32 %v3916_v63, %v2254_v4  ;;  %v5482_v47 = vadd.f32 %v3980_v57, %v5359_v18  ;;  %v2270_v4 = vadd.f32 %v5250_v39, %v5308_v1 }
 0x189   : > { %v3918_v53 = vpop.f32.mrf.mxu1  ;;  %v3982_v7 = vpop.f32.mrf.mxu0 }
 0x18a   : > { %v3919_v26 = vadd.f32 %v3918_v53, %v3917_v15  ;;  %v3983_v43 = vadd.f32 %v3982_v7, %v3981_v58 }
 0x18b   : > { %v3920_v48 = vpop.f32.mrf.mxu1  ;;  %v3984_v33 = vpop.f32.mrf.mxu0 }
 0x18c   : > { %v5486_v11 = vadd.f32 %v3919_v26, %v2259_v34  ;;  %v5489_v35 = vadd.f32 %v3983_v43, %v5367_v5  ;;  %v2275_v34 = vadd.f32 %v5260_v6, %v5308_v1 }
 0x18d   : > { %v3921_v2 = vpop.f32.mrf.mxu1  ;;  %v3985_v18 = vpop.f32.mrf.mxu0 }
 0x18e   : > { %v3922_v52 = vadd.f32 %v3921_v2, %v3920_v48  ;;  %v3986_v51 = vadd.f32 %v3985_v18, %v3984_v33 }
 0x18f   : > { %v3923_v44 = vpop.f32.mrf.mxu1  ;;  %v3987_v54 = vpop.f32.mrf.mxu0 }
 0x190   : > { %v5493_v41 = vadd.f32 %v3922_v52, %v2262_v12  ;;  %v5496_v3 = vadd.f32 %v3986_v51, %v5377_v22  ;;  %v2278_v12 = vadd.f32 %v5266_v17, %v5308_v1 }
 0x191   : > { %v3924_v45 = vpop.f32.mrf.mxu1  ;;  %v3988_v5 = vpop.f32.mrf.mxu0 }
 0x192   : > { %v3925_v29 = vadd.f32 %v3924_v45, %v3923_v44  ;;  %v3989_v62 = vadd.f32 %v3988_v5, %v3987_v54 }
 0x193   : > { %v3926_v56 = vpop.f32.mrf.mxu1  ;;  %v3990_v0 = vpop.f32.mrf.mxu0 }
 0x194   : > { %v5500_v8 = vadd.f32 %v3925_v29, %v2267_v14  ;;  %v5503_v59 = vadd.f32 %v3989_v62, %v5386_v37  ;;  %v2283_v14 = vadd.f32 %v5278_v30, %v5308_v1 }
 0x195   : > { %v3927_v27 = vpop.f32.mrf.mxu1  ;;  %v3991_v22 = vpop.f32.mrf.mxu0 }
 0x196   : > { %v3928_v36 = vadd.f32 %v3927_v27, %v3926_v56  ;;  %v3992_v63 = vadd.f32 %v3991_v22, %v3990_v0 }
 0x197   : > { %v3929_v57 = vpop.f32.mrf.mxu1  ;;  %v3993_v15 = vpop.f32.mrf.mxu0 }
 0x198   : > { %v5507_v32 = vadd.f32 %v3928_v36, %v2270_v4  ;;  %v5510_v58 = vadd.f32 %v3992_v63, %v5395_v24  ;;  %v2286_v4 = vadd.f32 %v5285_v23, %v5308_v1 }
 0x199   : > { %v3930_v53 = vpop.f32.mrf.mxu1  ;;  %v3994_v37 = vpop.f32.mrf.mxu0 }
 0x19a   : > { %v3931_v7 = vadd.f32 %v3930_v53, %v3929_v57  ;;  %v3995_v26 = vadd.f32 %v3994_v37, %v3993_v15 }
 0x19b   : > { %v3932_v43 = vpop.f32.mrf.mxu1  ;;  %v3996_v48 = vpop.f32.mrf.mxu0 }
 0x19c   : > { %v5514_v39 = vadd.f32 %v3931_v7, %v2275_v34  ;;  %v5517_v33 = vadd.f32 %v3995_v26, %v5403_v20  ;;  %v2291_v34 = vadd.f32 %v5301_v28, %v5308_v1 }
 0x19d   : > { %v3933_v2 = vpop.f32.mrf.mxu1  ;;  %v3997_v24 = vpop.f32.mrf.mxu0 }
 0x19e   : > { %v3934_v18 = vadd.f32 %v3933_v2, %v3932_v43  ;;  %v3998_v52 = vadd.f32 %v3997_v24, %v3996_v48 }
 0x19f   : > { %v3935_v51 = vpop.f32.mrf.mxu1  ;;  %v3999_v44 = vpop.f32.mrf.mxu0 }
 0x1a0   : > { %v5521_v6 = vadd.f32 %v3934_v18, %v2278_v12  ;;  %v5524_v54 = vadd.f32 %v3998_v52, %v5412_v10  ;;  %v2294_v12 = vadd.f32 %v5303_v49, %v5308_v1 }
 0x1a1   : > { %v3936_v45 = vpop.f32.mrf.mxu1  ;;  %v4000_v20 = vpop.f32.mrf.mxu0 }
 0x1a2   : > { %v3937_v5 = vadd.f32 %v3936_v45, %v3935_v51  ;;  %v4001_v29 = vadd.f32 %v4000_v20, %v3999_v44 }
 0x1a3   : > { %v3938_v62 = vpop.f32.mrf.mxu1  ;;  %v4002_v56 = vpop.f32.mrf.mxu0 }
 0x1a4   : > { %v5528_v17 = vadd.f32 %v3937_v5, %v2283_v14  ;;  %v5531_v0 = vadd.f32 %v4001_v29, %v5420_v55 }
 0x1a5   : > { %v3939_v27 = vpop.f32.mrf.mxu1  ;;  %v4003_v10 = vpop.f32.mrf.mxu0 }
 0x1a6   : > { %v3940_v22 = vadd.f32 %v3939_v27, %v3938_v62  ;;  %v4004_v36 = vadd.f32 %v4003_v10, %v4002_v56 }
 0x1a7   : > { %v3941_v63 = vpop.f32.mrf.mxu1  ;;  %v4005_v57 = vpop.f32.mrf.mxu0 }
 0x1a8   : > { %v5535_v30 = vadd.f32 %v3940_v22, %v2286_v4  ;;  %v5538_v15 = vadd.f32 %v4004_v36, %v5428_v21 }
 0x1a9   : > { %v3942_v53 = vpop.f32.mrf.mxu1  ;;  %v4006_v55 = vpop.f32.mrf.mxu0 }
 0x1aa   : > { %v3943_v37 = vadd.f32 %v3942_v53, %v3941_v63  ;;  %v4007_v7 = vadd.f32 %v4006_v55, %v4005_v57 }
 0x1ab   : > { %v3944_v26 = vpop.f32.mrf.mxu1  ;;  %v4008_v43 = vpop.f32.mrf.mxu0 }
 0x1ac   : > { %v5542_v23 = vadd.f32 %v3943_v37, %v2291_v34  ;;  %v5545_v48 = vadd.f32 %v4007_v7, %v5434_v25 }
 0x1ad   : > { %v3945_v2 = vpop.f32.mrf.mxu1  ;;  %v4009_v21 = vpop.f32.mrf.mxu0 }
 0x1ae   : > { %v3946_v24 = vadd.f32 %v3945_v2, %v3944_v26  ;;  %v4010_v18 = vadd.f32 %v4009_v21, %v4008_v43 }
 0x1af   : > { %v4075_v52 = vpop.f32.mrf.mxu1  ;;  %v4011_v51 = vpop.f32.mrf.mxu0 }
 0x1b0   : > { %v5549_v28 = vadd.f32 %v3946_v24, %v2294_v12  ;;  %v5552_v44 = vadd.f32 %v4010_v18, %v5440_v16 }
 0x1b1   : > { %v4076_v45 = vpop.f32.mrf.mxu1  ;;  %v4012_v14 = vpop.f32.mrf.mxu0 }
 0x1b2   : > { %5813 = vst [vmem:[#allocation3_spill] sm:$0xff] %v5549_v28  ;;  %v4077_v20 = vadd.f32 %v4076_v45, %v4075_v52  ;;  %v4013_v5 = vadd.f32 %v4012_v14, %v4011_v51 }
 0x1b3   : > { %v5554_v25 = vpop.f32.mrf.mxu1  ;;  %v4014_v29 = vpop.f32.mrf.mxu0 }
 0x1b4   : > { %v5557_v62 = vadd.f32 %v4077_v20, %v5447_v31  ;;  %v5560_v49 = vadd.f32 %v4013_v5, %v5444_v42 }
 0x1b5   : > { %v5562_v1 = vpop.f32.mrf.mxu1  ;;  %v4015_v56 = vpop.f32.mrf.mxu0 }
 0x1b6   : > { %v4016_v27 = vadd.f32 %v4015_v56, %v4014_v29 }
 0x1b7   : > { %v5564_v4 = vpop.f32.mrf.mxu1  ;;  %v4017_v16 = vpop.f32.mrf.mxu0 }
 0x1b8   : > { %v5567_v10 = vadd.f32 %v4016_v27, %v5451_v46 }
 0x1b9   : > { %v5569_v22 = vpop.f32.mrf.mxu1  ;;  %v4018_v36 = vpop.f32.mrf.mxu0 }
 0x1ba   : > { %v4019_v63 = vadd.f32 %v4018_v36, %v4017_v16 }
 0x1bb   : > { %v5571_v57 = vpop.f32.mrf.mxu1  ;;  %v4020_v31 = vpop.f32.mrf.mxu0 }
 0x1bc   : > { %v5574_v42 = vadd.f32 %v4019_v63, %v5458_v38 }
 0x1bd   : > { %v5576_v53 = vpop.f32.mrf.mxu1  ;;  %v4021_v34 = vpop.f32.mrf.mxu0 }
 0x1be   : > { %v4022_v55 = vadd.f32 %v4021_v34, %v4020_v31 }
 0x1bf   : > { %v5578_v37 = vpop.f32.mrf.mxu1  ;;  %v4023_v7 = vpop.f32.mrf.mxu0 }
 0x1c0   : > { %v5581_v46 = vadd.f32 %v4022_v55, %v5465_v19 }
 0x1c1   : > { %v5583_v26 = vpop.f32.mrf.mxu1  ;;  %v4024_v43 = vpop.f32.mrf.mxu0 }
 0x1c2   : > { %v4025_v2 = vadd.f32 %v4024_v43, %v4023_v7 }
 0x1c3   : > { %v5585_v12 = vpop.f32.mrf.mxu1  ;;  %v4026_v21 = vpop.f32.mrf.mxu0 }
 0x1c4   : > { %v5588_v38 = vadd.f32 %v4025_v2, %v5472_v60 }
 0x1c5   : > { %v5590_v24 = vpop.f32.mrf.mxu1  ;;  %v4027_v18 = vpop.f32.mrf.mxu0 }
 0x1c6   : > { %5814 = vst [vmem:[#allocation4_spill] sm:$0xff] %v5588_v38  ;;  %v4028_v52 = vadd.f32 %v4027_v18, %v4026_v21 }
 0x1c7   : > { %v5592_v51 = vpop.f32.mrf.mxu1  ;;  %v4029_v45 = vpop.f32.mrf.mxu0 }
 0x1c8   : > { %v5595_v19 = vadd.f32 %v4028_v52, %v5479_v50 }
 0x1c9   : > { %v5597_v14 = vpop.f32.mrf.mxu1  ;;  %v4030_v20 = vpop.f32.mrf.mxu0 }
 0x1ca   : > { %5815 = vst [vmem:[#allocation5_spill] sm:$0xff] %v5595_v19  ;;  %v4031_v5 = vadd.f32 %v4030_v20, %v4029_v45 }
 0x1cb   : > { %v5599_v29 = vpop.f32.mrf.mxu1  ;;  %v4032_v56 = vpop.f32.mrf.mxu0 }
 0x1cc   : > { %v5602_v60 = vadd.f32 %v4031_v5, %v5486_v11 }
 0x1cd   : > { %v5604_v27 = vpop.f32.mrf.mxu1  ;;  %v4033_v16 = vpop.f32.mrf.mxu0 }
 0x1ce   : > { %5816 = vst [vmem:[#allocation6_spill] sm:$0xff] %v5602_v60  ;;  %v4034_v36 = vadd.f32 %v4033_v16, %v4032_v56 }
 0x1cf   : > { %v5606_v63 = vpop.f32.mrf.mxu1  ;;  %v4035_v31 = vpop.f32.mrf.mxu0 }
 0x1d0   : > { %v5609_v50 = vadd.f32 %v4034_v36, %v5493_v41 }
 0x1d1   : > { %v5611_v34 = vpop.f32.mrf.mxu1  ;;  %v4036_v55 = vpop.f32.mrf.mxu0 }
 0x1d2   : > { %5817 = vst [vmem:[#allocation7_spill] sm:$0xff] %v5609_v50  ;;  %v4037_v7 = vadd.f32 %v4036_v55, %v4035_v31 }
 0x1d3   : > { %v5613_v43 = vpop.f32.mrf.mxu1  ;;  %v4038_v2 = vpop.f32.mrf.mxu0 }
 0x1d4   : > { %v5616_v11 = vadd.f32 %v4037_v7, %v5500_v8 }
 0x1d5   : > { %v5618_v21 = vpop.f32.mrf.mxu1  ;;  %v4039_v18 = vpop.f32.mrf.mxu0 }
 0x1d6   : > { %5818 = vst [vmem:[#allocation8_spill] sm:$0xff] %v5616_v11  ;;  %v4040_v52 = vadd.f32 %v4039_v18, %v4038_v2 }
 0x1d7   : > { %v5620_v45 = vpop.f32.mrf.mxu1  ;;  %v4041_v20 = vpop.f32.mrf.mxu0 }
 0x1d8   : > { %v5623_v41 = vadd.f32 %v4040_v52, %v5507_v32 }
 0x1d9   : > { %v5625_v5 = vpop.f32.mrf.mxu1  ;;  %v4042_v56 = vpop.f32.mrf.mxu0 }
 0x1da   : > { %5819 = vst [vmem:[#allocation9_spill] sm:$0xff] %v5623_v41  ;;  %v4043_v16 = vadd.f32 %v4042_v56, %v4041_v20 }
 0x1db   : > { %v5627_v36 = vpop.f32.mrf.mxu1  ;;  %v4044_v31 = vpop.f32.mrf.mxu0 }
 0x1dc   : > { %v5630_v8 = vadd.f32 %v4043_v16, %v5514_v39 }
 0x1dd   : > { %v5632_v55 = vpop.f32.mrf.mxu1  ;;  %v4045_v7 = vpop.f32.mrf.mxu0 }
 0x1de   : > { %5820 = vst [vmem:[#allocation10_spill] sm:$0xff] %v5630_v8  ;;  %v4046_v2 = vadd.f32 %v4045_v7, %v4044_v31 }
 0x1df   : > { %v5634_v18 = vpop.f32.mrf.mxu1  ;;  %v4047_v28 = vpop.f32.mrf.mxu0 }
 0x1e0   : > { %v5637_v32 = vadd.f32 %v4046_v2, %v5521_v6 }
 0x1e1   : > { %v5639_v52 = vpop.f32.mrf.mxu1  ;;  %v4048_v41 = vpop.f32.mrf.mxu0 }
 0x1e2   : > { %5821 = vst [vmem:[#allocation11_spill] sm:$0xff] %v5637_v32  ;;  %v4049_v20 = vadd.f32 %v4048_v41, %v4047_v28 }
 0x1e3   : > { %v5641_v56 = vpop.f32.mrf.mxu1  ;;  %v4050_v11 = vpop.f32.mrf.mxu0 }
 0x1e4   : > { %v5644_v39 = vadd.f32 %v4049_v20, %v5528_v17 }
 0x1e5   : > { %v5646_v16 = vpop.f32.mrf.mxu1  ;;  %v4051_v8 = vpop.f32.mrf.mxu0 }
 0x1e6   : > { %5822 = vst [vmem:[#allocation12_spill] sm:$0xff] %v5644_v39  ;;  %v4052_v31 = vadd.f32 %v4051_v8, %v4050_v11  ;;  %v4083_v8 = vadd.f32 %v5569_v22, %v5564_v4  ;;  %v4089_v4 = vadd.f32 %v5583_v26, %v5578_v37 }
 0x1e7   : > { %v5648_v7 = vpop.f32.mrf.mxu1  ;;  %v4053_v19 = vpop.f32.mrf.mxu0 }
 0x1e8   : > { %v5651_v6 = vadd.f32 %v4052_v31, %v5535_v30  ;;  %v4086_v30 = vadd.f32 %v5576_v53, %v5571_v57 }
 0x1e9   : > { %v5653_v2 = vpop.f32.mrf.mxu1  ;;  %v4054_v32 = vpop.f32.mrf.mxu0 }
 0x1ea   : > { %5823 = vst [vmem:[#allocation13_spill] sm:$0xff] %v5651_v6  ;;  %v4055_v28 = vadd.f32 %v4054_v32, %v4053_v19  ;;  %v4080_v32 = vadd.f32 %v5562_v1, %v5554_v25  ;;  %v4095_v1 = vadd.f32 %v5597_v14, %v5592_v51 }
 0x1eb   : > { %v5655_v41 = vpop.f32.mrf.mxu1  ;;  %v5657_v50 = vpop.f32.mrf.mxu0 }
 0x1ec   : > { %5824 = vst [vmem:[#allocation14_spill] sm:$0xff] %v5657_v50  ;;  %v5660_v17 = vadd.f32 %v4055_v28, %v5542_v23  ;;  %v2662_v28 = vadd.f32 %v4083_v8, %v5461_v40  ;;  %v2657_v39 = vadd.f32 %v4080_v32, %v5454_v61  ;;  %v4098_v40 = vadd.f32 %v5604_v27, %v5599_v29 }
 0x1ed   : > { %v5662_v20 = vpop.f32.mrf.mxu1  ;;  %v5664_v11 = vpop.f32.mrf.mxu0 }
 0x1ee   : > { %5825 = vst [vmem:[#allocation15_spill] sm:$0xff] %v5660_v17  ;;  %5826 = vst [vmem:[#allocation16_spill] sm:$0xff] %v5664_v11  ;;  %v2665_v17 = vadd.f32 %v4086_v30, %v5468_v13  ;;  %v4092_v30 = vadd.f32 %v5590_v24, %v5585_v12  ;;  %v4110_v24 = vadd.f32 %v5632_v55, %v5627_v36 }
 0x1ef   : > { %v5670_v31 = vpop.f32.mrf.mxu1  ;;  %v4213_v19 = vpop.f32.mrf.mxu0 }
 0x1f0   : > { %v2823_v57 = vadd.f32 %v4213_v19, %v2662_v28  ;;  %v2678_v19 = vadd.f32 %v4095_v1, %v5489_v35  ;;  %v4101_v35 = vadd.f32 %v5611_v34, %v5606_v63  ;;  %v4104_v63 = vadd.f32 %v5618_v21, %v5613_v43 }
 0x1f1   : > { %v5674_v6 = vpop.f32.mrf.mxu1  ;;  %v2814_v23 = vpop.f32.mrf.mxu0 }
 0x1f2   : > { %v2815_v53 = vadd.f32 %v2814_v23, %v5557_v62  ;;  %v3140_v23 = vmul.f32 %v2823_v57, %v2823_v57 }
 0x1f3   : > { %v5678_v11 = vpop.f32.mrf.mxu1  ;;  %v4214_v22 = vpop.f32.mrf.mxu0 }
 0x1f4   : > { %v2826_v50 = vadd.f32 %v4214_v22, %v2665_v17  ;;  %v2670_v17 = vadd.f32 %v4089_v4, %v5475_v9  ;;  %v3138_v51 = vmul.f32 %v2815_v53, %v2815_v53 }
 0x1f5   : > { %v5684_v25 = vpop.f32.mrf.mxu1  ;;  %v2817_v13 = vpop.f32.mrf.mxu0 }
 0x1f6   : > { %v3621_v62 = vpack.c.bf16 %v2826_v50, %v2823_v57  ;;  %v2818_v37 = vadd.f32 %v2817_v13, %v2657_v39  ;;  %v2681_v39 = vadd.f32 %v4098_v40, %v5496_v3  ;;  %v3141_v13 = vmul.f32 %v2826_v50, %v2826_v50 }
 0x1f7   : > { %v5697_v61 = vpop.f32.mrf.mxu1  ;;  %v4217_v26 = vpop.f32.mrf.mxu0  ;;  %v4107_v3 = vadd.f32 %v5625_v5, %v5620_v45 }
 0x1f8   : > { %3708 = vst [vmem:[%s5695_s16 + $0x8] sm:$0xff] %v3621_v62   ;;  %v3616_v14 = vpack.c.bf16 %v2818_v37, %v2815_v53  ;;  %v3101_v29 = vadd.f32 %v2818_v37, %v2815_v53  ;;  %v3139_v27 = vmul.f32 %v2818_v37, %v2818_v37  ;;  %v2839_v37 = vadd.f32 %v4217_v26, %v2678_v19 }
 0x1f9   : > { %v5701_v8 = vpop.f32.mrf.mxu1  ;;  %v2830_v32 = vpop.f32.mrf.mxu0 }
 0x1fa   : > { %3617 = vst [vmem:[%s5695_s16] sm:$0xff] %v3616_v14   ;;  %v3102_v28 = vadd.f32 %v3101_v29, %v2823_v57  ;;  %v3170_v22 = vadd.f32 %v3139_v27, %v3138_v51  ;;  %v2831_v9 = vadd.f32 %v2830_v32, %v2670_v17  ;;  %v2673_v57 = vadd.f32 %v4092_v30, %v5482_v47 }
 0x1fb   : > { %v5708_v4 = vpop.f32.mrf.mxu1  ;;  %v4218_v53 = vpop.f32.mrf.mxu0  ;;  %v2694_v27 = vadd.f32 %v4107_v3, %v5517_v33  ;;  %v2697_v30 = vadd.f32 %v4110_v24, %v5524_v54  ;;  %v3144_v32 = vmul.f32 %v2839_v37, %v2839_v37 }
 0x1fc   : > { %v3171_v62 = vadd.f32 %v3170_v22, %v3140_v23  ;;  %v3103_v60 = vadd.f32 %v3102_v28, %v2826_v50  ;;  %v2842_v38 = vadd.f32 %v4218_v53, %v2681_v39  ;;  %v3142_v17 = vmul.f32 %v2831_v9, %v2831_v9 }
 0x1fd   : > { %v5710_v12 = vpop.f32.mrf.mxu1  ;;  %v2833_v1 = vpop.f32.mrf.mxu0 }
 0x1fe   : > { %v3104_v40 = vadd.f32 %v3103_v60, %v2831_v9  ;;  %v3172_v26 = vadd.f32 %v3171_v62, %v3141_v13  ;;  %v3631_v50 = vpack.c.bf16 %v2842_v38, %v2839_v37  ;;  %v2834_v14 = vadd.f32 %v2833_v1, %v2673_v57 }
 0x1ff   : > { %v5719_v51 = vpop.f32.mrf.mxu1  ;;  %v4221_v29 = vpop.f32.mrf.mxu0  ;;  %v2686_v60 = vadd.f32 %v4101_v35, %v5503_v59  ;;  %v4113_v59 = vadd.f32 %v5639_v52, %v5634_v18  ;;  %v3145_v33 = vmul.f32 %v2842_v38, %v2842_v38  ;;  %v4122_v35 = vadd.f32 %v5662_v20, %v5655_v41 }
 0x200   : > { %v3173_v34 = vadd.f32 %v3172_v26, %v3142_v17  ;;  %3710 = vst [vmem:[%s5695_s16 + $0x18] sm:$0xff] %v3631_v50   ;;  %v3626_v5 = vpack.c.bf16 %v2834_v14, %v2831_v9  ;;  %v3105_v36 = vadd.f32 %v3104_v40, %v2834_v14  ;;  %v3143_v47 = vmul.f32 %v2834_v14, %v2834_v14 }
 0x201   : > { %v5724_v45 = vpop.f32.mrf.mxu1  ;;  %v2846_v55 = vpop.f32.mrf.mxu0  ;;  %v2855_v28 = vadd.f32 %v4221_v29, %v2694_v27  ;;  %v2689_v9 = vadd.f32 %v4104_v63, %v5510_v58  ;;  %v4116_v18 = vadd.f32 %v5646_v16, %v5641_v56  ;;  %v2702_v41 = vadd.f32 %v4113_v59, %v5531_v0 }
 0x202   : > { %3709 = vst [vmem:[%s5695_s16 + $0x10] sm:$0xff] %v3626_v5   ;;  %v3106_v39 = vadd.f32 %v3105_v36, %v2839_v37  ;;  %v3174_v43 = vadd.f32 %v3173_v34, %v3143_v47  ;;  %v2847_v21 = vadd.f32 %v2846_v55, %v2686_v60  ;;  %v4119_v37 = vadd.f32 %v5653_v2, %v5648_v7 }
 0x203   : > { %v5729_v19 = vpop.f32.mrf.mxu1  ;;  %v4222_v23 = vpop.f32.mrf.mxu0  ;;  %v2713_v14 = vadd.f32 %v4122_v35, %v5552_v44  ;;  %v3148_v63 = vmul.f32 %v2855_v28, %v2855_v28  ;;  %v2705_v60 = vadd.f32 %v4116_v18, %v5538_v15  ;;  %v4125_v0 = vadd.f32 %v5674_v6, %v5670_v31 }
 0x204   : > { %v2858_v22 = vadd.f32 %v4222_v23, %v2697_v30  ;;  %v3175_v54 = vadd.f32 %v3174_v43, %v3144_v32  ;;  %v3107_v53 = vadd.f32 %v3106_v39, %v2842_v38  ;;  %v3146_v1 = vmul.f32 %v2847_v21, %v2847_v21 }
 0x205   : > { %v5733_v13 = vpop.f32.mrf.mxu1  ;;  %v2849_v62 = vpop.f32.mrf.mxu0  ;;  %v2710_v50 = vadd.f32 %v4119_v37, %v5545_v48  ;;  %v4131_v44 = vadd.f32 %v5701_v8, %v5697_v61  ;;  %v4134_v39 = vadd.f32 %v5710_v12, %v5708_v4  ;;  %v4128_v6 = vadd.f32 %v5684_v25, %v5678_v11 }
 0x206   : > { %v3641_v3 = vpack.c.bf16 %v2858_v22, %v2855_v28  ;;  %v2850_v24 = vadd.f32 %v2849_v62, %v2689_v9  ;;  %v3108_v57 = vadd.f32 %v3107_v53, %v2847_v21  ;;  %v3176_v40 = vadd.f32 %v3175_v54, %v3145_v33 }
 0x207   : > { %v5741_v58 = vpop.f32.mrf.mxu1  ;;  %v4225_v17 = vpop.f32.mrf.mxu0  ;;  %v3149_v27 = vmul.f32 %v2858_v22, %v2858_v22  ;;  %v2718_v8 = vadd.f32 %v4125_v0, %v5560_v49  ;;  %v2726_v12 = vadd.f32 %v4131_v44, %v5574_v42  ;;  %v2729_v53 = vadd.f32 %v4134_v39, %v5581_v46 }
 0x208   : > { %3712 = vst [vmem:[%s5695_s16 + $0x28] sm:$0xff] %v3641_v3   ;;  %v3636_v38 = vpack.c.bf16 %v2850_v24, %v2847_v21  ;;  %v3147_v52 = vmul.f32 %v2850_v24, %v2850_v24  ;;  %v3177_v7 = vadd.f32 %v3176_v40, %v3146_v1  ;;  %v3109_v2 = vadd.f32 %v3108_v57, %v2850_v24 }
 0x209   : > { %v4142_v26 = vpop.f32.mrf.mxu1  ;;  %v2862_v20 = vpop.f32.mrf.mxu0  ;;  %v2871_v16 = vadd.f32 %v4225_v17, %v2710_v50  ;;  %v4137_v25 = vadd.f32 %v5724_v45, %v5719_v51  ;;  %v2721_v40 = vadd.f32 %v4128_v6, %v5567_v10  ;;  %v4140_v42 = vadd.f32 %v5733_v13, %v5729_v19  ;;  %v5827_v13 = vld [vmem:[#allocation4_spill] sm:$0xff] }
 0x20a   : > { %3711 = vst [vmem:[%s5695_s16 + $0x20] sm:$0xff] %v3636_v38   ;;  %v3110_v34 = vadd.f32 %v3109_v2, %v2855_v28  ;;  %v3178_v5 = vadd.f32 %v3177_v7, %v3147_v52  ;;  %v2863_v36 = vadd.f32 %v2862_v20, %v2702_v41  ;;  %v4143_v52 = vadd.f32 %v4142_v26, %v5741_v58  ;;  %v5828_v58 = vld [vmem:[#allocation6_spill] sm:$0xff] }
 0x20b   : > { %v4144_v29 = vpop.f32.mrf.mxu1  ;;  %v4226_v56 = vpop.f32.mrf.mxu0  ;;  %v3152_v37 = vmul.f32 %v2871_v16, %v2871_v16 }
 0x20c   : > { %v2874_v47 = vadd.f32 %v4226_v56, %v2713_v14  ;;  %v3179_v30 = vadd.f32 %v3178_v5, %v3148_v63  ;;  %v3111_v48 = vadd.f32 %v3110_v34, %v2858_v22  ;;  %v3150_v28 = vmul.f32 %v2863_v36, %v2863_v36 }
 0x20d   : > { %v4145_v55 = vpop.f32.mrf.mxu1  ;;  %v2865_v32 = vpop.f32.mrf.mxu0  ;;  %v2742_v26 = vadd.f32 %v4143_v52, %v5828_v58 }
 0x20e   : > { %v3651_v43 = vpack.c.bf16 %v2874_v47, %v2871_v16  ;;  %v2866_v21 = vadd.f32 %v2865_v32, %v2705_v60  ;;  %v3112_v15 = vadd.f32 %v3111_v48, %v2863_v36  ;;  %v3180_v9 = vadd.f32 %v3179_v30, %v3149_v27 }
 0x20f   : > { %v4147_v23 = vpop.f32.mrf.mxu1  ;;  %v4229_v59 = vpop.f32.mrf.mxu0  ;;  %v3153_v17 = vmul.f32 %v2874_v47, %v2874_v47  ;;  %v4146_v2 = vadd.f32 %v4145_v55, %v4144_v29 }
 0x210   : > { %3714 = vst [vmem:[%s5695_s16 + $0x38] sm:$0xff] %v3651_v43   ;;  %v3646_v31 = vpack.c.bf16 %v2866_v21, %v2863_v36  ;;  %v3151_v22 = vmul.f32 %v2866_v21, %v2866_v21  ;;  %v3181_v54 = vadd.f32 %v3180_v9, %v3150_v28  ;;  %v3113_v61 = vadd.f32 %v3112_v15, %v2866_v21 }
 0x211   : > { %v4148_v33 = vpop.f32.mrf.mxu1  ;;  %v2878_v4 = vpop.f32.mrf.mxu0  ;;  %v2887_v57 = vadd.f32 %v4229_v59, %v2726_v12  ;;  %v2734_v36 = vadd.f32 %v4137_v25, %v5827_v13 }
 0x212   : > { %3713 = vst [vmem:[%s5695_s16 + $0x30] sm:$0xff] %v3646_v31   ;;  %v3114_v35 = vadd.f32 %v3113_v61, %v2871_v16  ;;  %v3182_v3 = vadd.f32 %v3181_v54, %v3151_v22  ;;  %v2879_v24 = vadd.f32 %v2878_v4, %v2718_v8  ;;  %v5829_v16 = vld [vmem:[#allocation7_spill] sm:$0xff]  ;;  %v4149_v39 = vadd.f32 %v4148_v33, %v4147_v23 }
 0x213   : > { %v4150_v62 = vpop.f32.mrf.mxu1  ;;  %v4230_v11 = vpop.f32.mrf.mxu0  ;;  %v2745_v29 = vadd.f32 %v4146_v2, %v5829_v16  ;;  %v3156_v0 = vmul.f32 %v2887_v57, %v2887_v57 }
 0x214   : > { %v2890_v1 = vadd.f32 %v4230_v11, %v2729_v53  ;;  %v3183_v46 = vadd.f32 %v3182_v3, %v3152_v37  ;;  %v3115_v18 = vadd.f32 %v3114_v35, %v2874_v47  ;;  %v3154_v20 = vmul.f32 %v2879_v24, %v2879_v24  ;;  %v5830_v47 = vld [vmem:[#allocation5_spill] sm:$0xff]  ;;  %v5831_v35 = vld [vmem:[#allocation10_spill] sm:$0xff] }
 0x215   : > { %v4151_v49 = vpop.f32.mrf.mxu1  ;;  %v2881_v38 = vpop.f32.mrf.mxu0  ;;  %v2737_v60 = vadd.f32 %v4140_v42, %v5830_v47  ;;  %v5836_v47 = vld [vmem:[#allocation14_spill] sm:$0xff] }
 0x216   : > { %v3661_v7 = vpack.c.bf16 %v2890_v1, %v2887_v57  ;;  %v2882_v41 = vadd.f32 %v2881_v38, %v2721_v40  ;;  %v3116_v45 = vadd.f32 %v3115_v18, %v2879_v24  ;;  %v3184_v50 = vadd.f32 %v3183_v46, %v3153_v17  ;;  %v5833_v40 = vld [vmem:[#allocation8_spill] sm:$0xff] }
 0x217   : > { %v4153_v51 = vpop.f32.mrf.mxu1  ;;  %v4233_v10 = vpop.f32.mrf.mxu0  ;;  %v3157_v28 = vmul.f32 %v2890_v1, %v2890_v1  ;;  %v4152_v53 = vadd.f32 %v4151_v49, %v4150_v62  ;;  %v2750_v17 = vadd.f32 %v4149_v39, %v5833_v40 }
 0x218   : > { %3716 = vst [vmem:[%s5695_s16 + $0x48] sm:$0xff] %v3661_v7   ;;  %v3656_v14 = vpack.c.bf16 %v2882_v41, %v2879_v24  ;;  %v3155_v63 = vmul.f32 %v2882_v41, %v2882_v41  ;;  %v3185_v5 = vadd.f32 %v3184_v50, %v3154_v20  ;;  %v3117_v19 = vadd.f32 %v3116_v45, %v2882_v41  ;;  %v5832_v24 = vld [vmem:[#allocation11_spill] sm:$0xff] }
 0x219   : > { %v4154_v34 = vpop.f32.mrf.mxu1  ;;  %v2894_v56 = vpop.f32.mrf.mxu0  ;;  %v2903_v44 = vadd.f32 %v4233_v10, %v2742_v26 }
 0x21a   : > { %3715 = vst [vmem:[%s5695_s16 + $0x40] sm:$0xff] %v3656_v14   ;;  %v3118_v27 = vadd.f32 %v3117_v19, %v2887_v57  ;;  %v3186_v30 = vadd.f32 %v3185_v5, %v3155_v63  ;;  %v2895_v48 = vadd.f32 %v2894_v56, %v2734_v36  ;;  %v4155_v21 = vadd.f32 %v4154_v34, %v4153_v51  ;;  %v5834_v51 = vld [vmem:[#allocation9_spill] sm:$0xff]  ;;  %v5835_v19 = vld [vmem:[#allocation12_spill] sm:$0xff] }
 0x21b   : > { %v4156_v55 = vpop.f32.mrf.mxu1  ;;  %v4234_v32 = vpop.f32.mrf.mxu0  ;;  %v3160_v38 = vmul.f32 %v2903_v44, %v2903_v44  ;;  %v2753_v45 = vadd.f32 %v4152_v53, %v5834_v51 }
 0x21c   : > { %v2906_v43 = vadd.f32 %v4234_v32, %v2745_v29  ;;  %v3187_v9 = vadd.f32 %v3186_v30, %v3156_v0  ;;  %v3119_v59 = vadd.f32 %v3118_v27, %v2890_v1  ;;  %v3158_v4 = vmul.f32 %v2895_v48, %v2895_v48 }
 0x21d   : > { %v4157_v15 = vpop.f32.mrf.mxu1  ;;  %v2897_v6 = vpop.f32.mrf.mxu0  ;;  %v2758_v3 = vadd.f32 %v4155_v21, %v5831_v35 }
 0x21e   : > { %v4158_v31 = vadd.f32 %v4157_v15, %v4156_v55  ;;  %v3671_v22 = vpack.c.bf16 %v2906_v43, %v2903_v44  ;;  %v2898_v54 = vadd.f32 %v2897_v6, %v2737_v60  ;;  %v3120_v8 = vadd.f32 %v3119_v59, %v2895_v48  ;;  %v5837_v60 = vld [vmem:[#allocation16_spill] sm:$0xff]  ;;  %v5838_v15 = vld [vmem:[#allocation13_spill] sm:$0xff] }
 0x21f   : > { %v4159_v61 = vpop.f32.mrf.mxu1  ;;  %v3188_v12 = vadd.f32 %v3187_v9, %v3157_v28  ;;  %v4237_v37 = vpop.f32.mrf.mxu0  ;;  %v3161_v50 = vmul.f32 %v2906_v43, %v2906_v43  ;;  %v4058_v55 = vadd.f32 %v5837_v60, %v5836_v47 }
 0x220   : > { %3718 = vst [vmem:[%s5695_s16 + $0x58] sm:$0xff] %v3671_v22   ;;  %v3666_v23 = vpack.c.bf16 %v2898_v54, %v2895_v48  ;;  %v3159_v33 = vmul.f32 %v2898_v54, %v2898_v54  ;;  %v2761_v11 = vadd.f32 %v4158_v31, %v5832_v24  ;;  %v3121_v1 = vadd.f32 %v3120_v8, %v2898_v54  ;;  %v5839_v54 = vld [vmem:[#allocation15_spill] sm:$0xff] }
 0x221   : > { %v4160_v25 = vpop.f32.mrf.mxu1  ;;  %v3189_v57 = vadd.f32 %v3188_v12, %v3158_v4  ;;  %v2910_v42 = vpop.f32.mrf.mxu0  ;;  %v2919_v2 = vadd.f32 %v4237_v37, %v2758_v3  ;;  %v5840_v8 = vld [vmem:[#allocation3_spill] sm:$0xff] }
 0x222   : > { %3717 = vst [vmem:[%s5695_s16 + $0x50] sm:$0xff] %v3666_v23   ;;  %v4161_v46 = vadd.f32 %v4160_v25, %v4159_v61  ;;  %v3122_v52 = vadd.f32 %v3121_v1, %v2903_v44  ;;  %v2911_v49 = vadd.f32 %v2910_v42, %v2750_v17  ;;  %v2616_v4 = vadd.f32 %v4058_v55, %v5840_v8 }
 0x223   : > { %v4162_v18 = vpop.f32.mrf.mxu1  ;;  %v3190_v62 = vadd.f32 %v3189_v57, %v3159_v33  ;;  %v4238_v7 = vpop.f32.mrf.mxu0 }
 0x224   : > { %v2922_v41 = vadd.f32 %v4238_v7, %v2761_v11  ;;  %v3123_v14 = vadd.f32 %v3122_v52, %v2906_v43  ;;  %v2766_v13 = vadd.f32 %v4161_v46, %v5835_v19  ;;  %v3162_v26 = vmul.f32 %v2911_v49, %v2911_v49 }
 0x225   : > { %v4163_v20 = vpop.f32.mrf.mxu1  ;;  %v3191_v10 = vadd.f32 %v3190_v62, %v3160_v38  ;;  %v2913_v63 = vpop.f32.mrf.mxu0  ;;  %v3164_v43 = vmul.f32 %v2919_v2, %v2919_v2 }
 0x226   : > { %v3681_v34 = vpack.c.bf16 %v2922_v41, %v2919_v2  ;;  %v2914_v5 = vadd.f32 %v2913_v63, %v2753_v45  ;;  %v4164_v36 = vadd.f32 %v4163_v20, %v4162_v18  ;;  %v3124_v58 = vadd.f32 %v3123_v14, %v2911_v49 }
 0x227   : > { %v4165_v56 = vpop.f32.mrf.mxu1  ;;  %v3192_v16 = vadd.f32 %v3191_v10, %v3161_v50  ;;  %v4241_v29 = vpop.f32.mrf.mxu0  ;;  %v3165_v59 = vmul.f32 %v2922_v41, %v2922_v41 }
 0x228   : > { %3720 = vst [vmem:[%s5695_s16 + $0x68] sm:$0xff] %v3681_v34   ;;  %v3676_v0 = vpack.c.bf16 %v2914_v5, %v2911_v49  ;;  %v3163_v27 = vmul.f32 %v2914_v5, %v2914_v5  ;;  %v3125_v32 = vadd.f32 %v3124_v58, %v2914_v5  ;;  %v2769_v28 = vadd.f32 %v4164_v36, %v5838_v15 }
 0x229   : > { %v4166_v30 = vpop.f32.mrf.mxu1  ;;  %v3193_v48 = vadd.f32 %v3192_v16, %v3162_v26  ;;  %v2926_v44 = vpop.f32.mrf.mxu0 }
 0x22a   : > { %v4167_v39 = vadd.f32 %v4166_v30, %v4165_v56  ;;  %3719 = vst [vmem:[%s5695_s16 + $0x60] sm:$0xff] %v3676_v0   ;;  %v2927_v21 = vadd.f32 %v2926_v44, %v2766_v13  ;;  %v3126_v6 = vadd.f32 %v3125_v32, %v2919_v2 }
 0x22b   : > { %v4168_v9 = vpop.f32.mrf.mxu1  ;;  %v3194_v31 = vadd.f32 %v3193_v48, %v3163_v27  ;;  %v4242_v22 = vpop.f32.mrf.mxu0 }
 0x22c   : > { %v2774_v61 = vadd.f32 %v4167_v39, %v5839_v54  ;;  %v3166_v12 = vmul.f32 %v2927_v21, %v2927_v21  ;;  %v3127_v23 = vadd.f32 %v3126_v6, %v2922_v41 }
 0x22d   : > { %v4169_v53 = vpop.f32.mrf.mxu1  ;;  %v3195_v37 = vadd.f32 %v3194_v31, %v3164_v43  ;;  %v2929_v33 = vpop.f32.mrf.mxu0 }
 0x22e   : > { %v2935_v35 = vadd.f32 %v4241_v29, %v2774_v61  ;;  %v4170_v3 = vadd.f32 %v4169_v53, %v4168_v9  ;;  %v2930_v24 = vadd.f32 %v2929_v33, %v2769_v28  ;;  %v3128_v11 = vadd.f32 %v3127_v23, %v2927_v21 }
 0x22f   : > { %v3196_v25 = vadd.f32 %v3195_v37, %v3165_v59 }
 0x230   : > { %v2777_v57 = vadd.f32 %v4170_v3, %v2616_v4  ;;  %v3686_v1 = vpack.c.bf16 %v2930_v24, %v2927_v21  ;;  %v3167_v40 = vmul.f32 %v2930_v24, %v2930_v24  ;;  %v3129_v42 = vadd.f32 %v3128_v11, %v2930_v24 }
 0x231   : > { %v3197_v17 = vadd.f32 %v3196_v25, %v3166_v12  ;;  %v3168_v46 = vmul.f32 %v2935_v35, %v2935_v35 }
 0x232   : > { %v2938_v18 = vadd.f32 %v4242_v22, %v2777_v57  ;;  %3721 = vst [vmem:[%s5695_s16 + $0x70] sm:$0xff] %v3686_v1   ;;  %v3130_v52 = vadd.f32 %v3129_v42, %v2935_v35 }
 0x233   : > { %v3198_v38 = vadd.f32 %v3197_v17, %v3167_v40 }
 0x234   : > { %v3691_v62 = vpack.c.bf16 %v2938_v18, %v2935_v35  ;;  %v3169_v49 = vmul.f32 %v2938_v18, %v2938_v18  ;;  %v3131_v2 = vadd.f32 %v3130_v52, %v2938_v18 }
 0x235   : > { %v3199_v7 = vadd.f32 %v3198_v38, %v3168_v46 }
 0x236   : > { %3722 = vst [vmem:[%s5695_s16 + $0x78] sm:$0xff] %v3691_v62   ;;  %v3132_v41 = vrot.slane %v3131_v2, 4 }
 0x237   : > { %v3200_v51 = vadd.f32 %v3199_v7, %v3169_v49 }
 0x238   : > { %v3133_v45 = vadd.f32 %v3132_v41, %v3131_v2 }
 0x239   : > { %v3201_v20 = vrot.slane %v3200_v51, 4 }
 0x23a   : > { %v3134_v50 = vrot.slane %v3133_v45, 2 }
 0x23b   : > { %v3202_v10 = vadd.f32 %v3201_v20, %v3200_v51 }
 0x23c   : > { %v3135_v14 = vadd.f32 %v3134_v50, %v3133_v45 }
 0x23d   : > { %v3203_v63 = vrot.slane %v3202_v10, 2 }
 0x23e   : > { %v3136_v34 = vrot.slane %v3135_v14, 1 }
 0x23f   : > { %v3204_v5 = vadd.f32 %v3203_v63, %v3202_v10 }
 0x240   : > { %v3137_v13 = vadd.f32 %v3136_v34, %v3135_v14 }
 0x241   : > { %v3205_v19 = vrot.slane %v3204_v5, 1 }
 0x243   : > { %v3206_v36 = vadd.f32 %v3205_v19, %v3204_v5 }
 0x245   : > { %v3208_v56 = vsel %vm919_vm6, %v3137_v13, %v3206_v36 }
 0x246   : > { %3209 = vst [vmem:[%s262_s26] sm:$0x3] %v3208_v56 }
 0x247 PF: > { %s17_s21 = sadd.s32 1, %s4395_s21  }
 0x248   : > { %p14_p4 = scmp.ge.s32.totalorder %s17_s21, 4  }
 0x24a   :  { %16 = sbr.rel (!%p14_p4) target bundleno = 1 (0x1), region = 83 }

</bundles_post_ra>
